<compile_context>
chip_gen: v5e
topology: v5e:2x2
jax: 0.10.0
libtpu: 0.0.40
codegen_flags: <defaults>
</compile_context>

<pallas_src>
import math

import jax
import jax.numpy as jnp
from jax import lax
from jax.experimental import pallas as pl
from jax.experimental.pallas import tpu as pltpu

# ----- config (mirrors the fields MambaBlock reads from its config) -----
D_MODEL = 32          # config.n_embd
D_STATE = 16          # config.mamba_d_state
D_CONV = 4            # config.mamba_d_conv
EXPAND = 2            # config.mamba_expand
D_INNER = EXPAND * D_MODEL
DT_RANK = math.ceil(D_MODEL / 16)
BATCH = 2
SEQLEN = 16

LANE = 128
XPROJ_W = D_INNER + 2 * D_STATE                      # 96 useful fused x_proj cols
XPROJ_PAD = ((XPROJ_W + LANE - 1) // LANE) * LANE    # padded to 128 lanes
OUT_PAD = ((D_MODEL + LANE - 1) // LANE) * LANE      # lane-dense out_proj width


def _softplus(x):
    return jnp.maximum(x, 0.0) + jnp.log1p(jnp.exp(-jnp.abs(x)))


def _silu(x):
    return x * jax.nn.sigmoid(x)


def _make_mamba_kernel(b_tile, L):
    BL = b_tile * L
    BLS = BL * D_STATE

    def kernel(x_ref, w_in_ref, conv_w_ref, conv_b_ref, w_dbc_ref, b_dt_ref,
               neg_a_ref, d_ref, w_out_ref, r_ref, m2_ref, rt_ref, ones_bd_ref,
               out_ref, dA_s, dBu_s, h_s):
        x = x_ref[...].reshape(BL, D_MODEL)            # (B_TILE*L, d_model)

        # ---- fused input projection: one (BL,32)x(32,128) MXU matmul ----
        xz = jnp.dot(x, w_in_ref[...], preferred_element_type=jnp.float32)
        xi = xz[:, :D_INNER]                            # (BL, d_inner)
        z = xz[:, D_INNER:2 * D_INNER]                  # (BL, d_inner)

        # ---- causal depthwise conv1d per batch element (no cross-batch leak) ----
        conv_w = conv_w_ref[...]                        # (d_conv, d_inner)
        bias_l = jnp.broadcast_to(conv_b_ref[...], (L, D_INNER))
        accs = []
        for b in range(b_tile):                         # static unroll, B_TILE small
            xb = xi[b * L:(b + 1) * L, :]
            xpad = jnp.concatenate(
                [jnp.zeros((D_CONV - 1, D_INNER), jnp.float32), xb], axis=0)
            acc = bias_l
            for k in range(D_CONV):                     # static unroll, K=4
                acc = acc + xpad[k:k + L, :] * conv_w[k:k + 1, :]
            accs.append(acc)
        u = _silu(jnp.concatenate(accs, axis=0))        # (BL, d_inner)

        # ---- fused x_proj + dt_proj: one (BL,64)x(64,128) matmul ----
        dbc = jnp.dot(u, w_dbc_ref[...], preferred_element_type=jnp.float32)
        dt = _softplus(dbc[:, :D_INNER] + b_dt_ref[...])            # (BL, d_inner)
        bc_small = dbc[:, D_INNER:D_INNER + 2 * D_STATE]            # [B | C] (BL, 32)

        # ---- expansion to per-(b,l,s) rows — all on the (slack) MXU ----
        R = r_ref[...]                                   # (BLS, BL) 0/1, host-built
        ex1 = jnp.dot(R, jnp.concatenate([dt, dt * u], axis=1),
                      preferred_element_type=jnp.float32)           # (BLS, 128)
        dt_e = ex1[:, :D_INNER]
        dtu_e = ex1[:, D_INNER:2 * D_INNER]
        ex2 = jnp.dot(R, bc_small, preferred_element_type=jnp.float32)  # (BLS, 32)
        bcast = jnp.dot(ex2 * m2_ref[...], ones_bd_ref[...],
                        preferred_element_type=jnp.float32)         # (BLS, 128)
        b_bcast = bcast[:, :D_INNER]                     # B[b,l,s] on all lanes
        c_bcast = bcast[:, D_INNER:2 * D_INNER]          # C[b,l,s] on all lanes

        # ---- hoisted scan coefficients (A = -exp(A_log) prefolded on host) ----
        dA_s[...] = jnp.exp(dt_e * neg_a_ref[...])       # single EUP exp
        dBu_s[...] = dtu_e * b_bcast                     # dt * B * u

        # ---- selective scan: unrolled, B_TILE independent chains interleaved ----
        hs = [jnp.zeros((D_STATE, D_INNER), jnp.float32) for _ in range(b_tile)]
        for t in range(L):                               # static unroll, L=16
            for b in range(b_tile):
                lo = (b * L + t) * D_STATE
                hs[b] = dA_s[lo:lo + D_STATE, :] * hs[b] + dBu_s[lo:lo + D_STATE, :]
                h_s[lo:lo + D_STATE, :] = hs[b]

        # ---- epilogue: C segment-sum (MXU), skip, gate, lane-dense out_proj ----
        y = jnp.dot(rt_ref[...], h_s[...] * c_bcast,
                    preferred_element_type=jnp.float32)              # (BL, d_inner)
        y = y + d_ref[...] * u
        y = y * _silu(z)
        yw = jnp.dot(y, w_out_ref[...], preferred_element_type=jnp.float32)  # (BL,128)
        out_ref[...] = yw.reshape(b_tile, L, OUT_PAD)

    return kernel


def mamba_block(x, params, b_tile=None):
    (w_inx, w_inz, conv_w, conv_b, w_dtp, w_bp, w_cp,
     w_dt, b_dt, a_log, d_param, w_out) = params
    B, L, _ = x.shape
    if b_tile is None:
        b_tile = B          # collapse the batch grid (best for 1-TC v5e/v6e)
    assert B % b_tile == 0
    BL = b_tile * L
    BLS = BL * D_STATE
    f32 = jnp.float32

    # ---- host-side parameter fusion / constant folding (layout only) ----
    w_in_fused = jnp.concatenate([w_inx, w_inz], axis=1)               # (dm, 128)
    w_dbc = jnp.concatenate(
        [w_dtp @ w_dt, w_bp, w_cp,
         jnp.zeros((D_INNER, XPROJ_PAD - XPROJ_W), f32)], axis=1)      # (di, 128)
    w_out_pad = jnp.concatenate(
        [w_out, jnp.zeros((D_INNER, OUT_PAD - D_MODEL), f32)], axis=1)  # (di, 128)
    neg_a_rep = jnp.tile((-jnp.exp(a_log)).T, (BL, 1))                 # (BLS, di)

    # host-built 0/1 expansion / selection matrices (were in-kernel iotas in v2)
    rows = jnp.arange(BLS)
    R = (rows[:, None] // D_STATE == jnp.arange(BL)[None, :]).astype(f32)      # (BLS, BL)
    M = (rows[:, None] % D_STATE == jnp.arange(D_STATE)[None, :]).astype(f32)  # (BLS, S)
    M2 = jnp.concatenate([M, M], axis=1)                                       # (BLS, 2S)
    RT = R.T                                                                   # (BL, BLS)
    ones_bd = jnp.zeros((2 * D_STATE, 2 * D_INNER), f32)
    ones_bd = ones_bd.at[:D_STATE, :D_INNER].set(1.0)
    ones_bd = ones_bd.at[D_STATE:, D_INNER:].set(1.0)                          # (32, 128)

    def rep_spec(shape):
        nd = len(shape)
        return pl.BlockSpec(shape, lambda g, _nd=nd: (0,) * _nd)

    grid_spec = pltpu.PrefetchScalarGridSpec(
        num_scalar_prefetch=0,
        grid=(B // b_tile,),
        in_specs=[
            pl.BlockSpec((b_tile, L, D_MODEL), lambda g: (g, 0, 0)),   # x
            rep_spec((D_MODEL, 2 * D_INNER)),                          # fused in_proj
            rep_spec((D_CONV, D_INNER)),                               # conv weight
            rep_spec((1, D_INNER)),                                    # conv bias
            rep_spec((D_INNER, XPROJ_PAD)),                            # fused x_proj|dt_proj
            rep_spec((1, D_INNER)),                                    # dt_proj bias
            rep_spec((BLS, D_INNER)),                                  # -exp(A_log)^T replicated
            rep_spec((1, D_INNER)),                                    # D
            rep_spec((D_INNER, OUT_PAD)),                              # padded out_proj
            rep_spec((BLS, BL)),                                       # R (row -> (b,l))
            rep_spec((BLS, 2 * D_STATE)),                              # [M | M]
            rep_spec((BL, BLS)),                                       # RT (segment sum)
            rep_spec((2 * D_STATE, 2 * D_INNER)),                      # block-diag ones
        ],
        out_specs=pl.BlockSpec((b_tile, L, OUT_PAD), lambda g: (g, 0, 0)),
        scratch_shapes=[
            pltpu.VMEM((BLS, D_INNER), f32),                           # dA, all steps
            pltpu.VMEM((BLS, D_INNER), f32),                           # dt*B*u, all steps
            pltpu.VMEM((BLS, D_INNER), f32),                           # h history
        ],
    )
    out_pad = pl.pallas_call(
        _make_mamba_kernel(b_tile, L),
        out_shape=jax.ShapeDtypeStruct((B, L, OUT_PAD), f32),
        grid_spec=grid_spec,
        compiler_params=pltpu.CompilerParams(
            dimension_semantics=("parallel",)),
    )(x, w_in_fused, conv_w, conv_b, w_dbc, b_dt, neg_a_rep, d_param,
      w_out_pad, R, M2, RT, ones_bd)
    return out_pad[:, :, :D_MODEL]


def mamba_ref(x, params):
    """Pure-JAX reference (same math, unfused weights) for correctness checking."""
    (w_inx, w_inz, conv_w, conv_b, w_dtp, w_bp, w_cp,
     w_dt, b_dt, a_log, d_param, w_out) = params

    def one(xb):
        L = xb.shape[0]
        xi = xb @ w_inx
        z = xb @ w_inz
        xpad = jnp.concatenate(
            [jnp.zeros((D_CONV - 1, D_INNER), jnp.float32), xi], axis=0)
        acc = jnp.broadcast_to(conv_b[0], (L, D_INNER))
        for k in range(D_CONV):
            acc = acc + xpad[k:k + L] * conv_w[k][None, :]
        u = _silu(acc)
        dt = _softplus(u @ w_dtp @ w_dt + b_dt[0][None, :])
        Bm = u @ w_bp
        Cm = u @ w_cp
        A = -jnp.exp(a_log)

        def step(h, inp):
            dt_t, u_t, B_t, C_t = inp
            h = jnp.exp(dt_t[:, None] * A) * h + (dt_t * u_t)[:, None] * B_t[None, :]
            y_t = jnp.sum(h * C_t[None, :], axis=1) + d_param[0] * u_t
            return h, y_t

        _, ys = lax.scan(step, jnp.zeros((D_INNER, D_STATE), jnp.float32),
                         (dt, u, Bm, Cm))
        return (ys * _silu(z)) @ w_out

    return jax.vmap(one)(x)


def init_params(key):
    ks = jax.random.split(key, 9)
    s = 0.05
    w_inx = jax.random.normal(ks[0], (D_MODEL, D_INNER), jnp.float32) * s
    w_inz = jax.random.normal(ks[1], (D_MODEL, D_INNER), jnp.float32) * s
    conv_w = jax.random.normal(ks[2], (D_CONV, D_INNER), jnp.float32) * s
    conv_b = jax.random.normal(ks[3], (1, D_INNER), jnp.float32) * s
    w_dtp = jax.random.normal(ks[4], (D_INNER, DT_RANK), jnp.float32) * s
    w_bp = jax.random.normal(ks[5], (D_INNER, D_STATE), jnp.float32) * s
    w_cp = jax.random.normal(ks[6], (D_INNER, D_STATE), jnp.float32) * s
    w_dt = jax.random.normal(ks[7], (DT_RANK, D_INNER), jnp.float32) * s
    b_dt = jnp.full((1, D_INNER), -4.0, jnp.float32)       # ~ softplus^-1(small dt)
    a_log = jnp.log(jnp.broadcast_to(
        jnp.arange(1, D_STATE + 1, dtype=jnp.float32), (D_INNER, D_STATE)))
    d_param = jnp.ones((1, D_INNER), jnp.float32)
    w_out = jax.random.normal(ks[8], (D_INNER, D_MODEL), jnp.float32) * s
    return (w_inx, w_inz, conv_w, conv_b, w_dtp, w_bp, w_cp,
            w_dt, b_dt, a_log, d_param, w_out)


if __name__ == "__main__":
    key = jax.random.PRNGKey(0)
    pkey, xkey = jax.random.split(key)
    params = init_params(pkey)
    x = jax.random.normal(xkey, (BATCH, SEQLEN, D_MODEL), jnp.float32)

    out = jax.block_until_ready(mamba_block(x, params))
    ref = jax.block_until_ready(mamba_ref(x, params))
    assert out.shape == (BATCH, SEQLEN, D_MODEL)
    assert jnp.allclose(out, ref, rtol=1e-2, atol=1e-3), "mismatch vs JAX reference"
    print("KERNEL_OK")
</pallas_src>

<mosaic_0001>
module attributes {stable_mosaic.version = 11 : i64} {
  func.func @kernel(%arg0: i32, %arg1: memref<2x16x32xf32, #tpu.memory_space<vmem>>, %arg2: memref<32x128xf32, #tpu.memory_space<vmem>>, %arg3: memref<4x64xf32, #tpu.memory_space<vmem>>, %arg4: memref<1x64xf32, #tpu.memory_space<vmem>>, %arg5: memref<64x128xf32, #tpu.memory_space<vmem>>, %arg6: memref<1x64xf32, #tpu.memory_space<vmem>>, %arg7: memref<512x64xf32, #tpu.memory_space<vmem>>, %arg8: memref<1x64xf32, #tpu.memory_space<vmem>>, %arg9: memref<64x128xf32, #tpu.memory_space<vmem>>, %arg10: memref<512x32xf32, #tpu.memory_space<vmem>>, %arg11: memref<512x32xf32, #tpu.memory_space<vmem>>, %arg12: memref<32x512xf32, #tpu.memory_space<vmem>>, %arg13: memref<32x128xf32, #tpu.memory_space<vmem>>, %arg14: memref<2x16x128xf32, #tpu.memory_space<vmem>>, %arg15: memref<512x64xf32, #tpu.memory_space<vmem>>, %arg16: memref<512x64xf32, #tpu.memory_space<vmem>>, %arg17: memref<512x64xf32, #tpu.memory_space<vmem>>) attributes {dimension_semantics = [#tpu.dimension_semantics<parallel>], iteration_bounds = array<i64: 1>, scalar_prefetch = 0 : i64, scratch_operands = 3 : i64, tpu.core_type = #tpu.core_type<tc>, window_params = [{transform_indices = @transform_0, window_bounds = array<i64: 2, 16, 32>}, {pipeline_mode = #tpu.pipeline_mode<synchronous>, transform_indices = @transform_1, window_bounds = array<i64: 32, 128>}, {pipeline_mode = #tpu.pipeline_mode<synchronous>, transform_indices = @transform_2, window_bounds = array<i64: 4, 64>}, {pipeline_mode = #tpu.pipeline_mode<synchronous>, transform_indices = @transform_3, window_bounds = array<i64: 1, 64>}, {pipeline_mode = #tpu.pipeline_mode<synchronous>, transform_indices = @transform_4, window_bounds = array<i64: 64, 128>}, {pipeline_mode = #tpu.pipeline_mode<synchronous>, transform_indices = @transform_5, window_bounds = array<i64: 1, 64>}, {pipeline_mode = #tpu.pipeline_mode<synchronous>, transform_indices = @transform_6, window_bounds = array<i64: 512, 64>}, {pipeline_mode = #tpu.pipeline_mode<synchronous>, transform_indices = @transform_7, window_bounds = array<i64: 1, 64>}, {pipeline_mode = #tpu.pipeline_mode<synchronous>, transform_indices = @transform_8, window_bounds = array<i64: 64, 128>}, {pipeline_mode = #tpu.pipeline_mode<synchronous>, transform_indices = @transform_9, window_bounds = array<i64: 512, 32>}, {pipeline_mode = #tpu.pipeline_mode<synchronous>, transform_indices = @transform_10, window_bounds = array<i64: 512, 32>}, {pipeline_mode = #tpu.pipeline_mode<synchronous>, transform_indices = @transform_11, window_bounds = array<i64: 32, 512>}, {pipeline_mode = #tpu.pipeline_mode<synchronous>, transform_indices = @transform_12, window_bounds = array<i64: 32, 128>}, {transform_indices = @transform_13, window_bounds = array<i64: 2, 16, 128>}]} {
    %c0 = arith.constant 0 : index
    %c0_0 = arith.constant 0 : index
    %c0_1 = arith.constant 0 : index
    %0 = vector.load %arg1[%c0, %c0_0, %c0_1] : memref<2x16x32xf32, #tpu.memory_space<vmem>>, vector<2x16x32xf32>
    %1 = vector.shape_cast %0 : vector<2x16x32xf32> to vector<32x32xf32>
    %c0_2 = arith.constant 0 : index
    %c0_3 = arith.constant 0 : index
    %2 = vector.load %arg2[%c0_2, %c0_3] : memref<32x128xf32, #tpu.memory_space<vmem>>, vector<32x128xf32>
    %cst = arith.constant dense<0.000000e+00> : vector<32x128xf32>
    %3 = tpu.matmul %1, %2, %cst {dimension_numbers = #tpu.dot_dimension_numbers<[1], [0], [0], [1], [0, 0, 1, 1], [], []>} : vector<32x32xf32>, vector<32x128xf32>, vector<32x128xf32> -> vector<32x128xf32>
    %4 = vector.extract_strided_slice %3 {offsets = [0, 0], sizes = [32, 64], strides = [1, 1]} : vector<32x128xf32> to vector<32x64xf32>
    %5 = vector.extract_strided_slice %3 {offsets = [0, 64], sizes = [32, 64], strides = [1, 1]} : vector<32x128xf32> to vector<32x64xf32>
    %c0_4 = arith.constant 0 : index
    %c0_5 = arith.constant 0 : index
    %6 = vector.load %arg3[%c0_4, %c0_5] : memref<4x64xf32, #tpu.memory_space<vmem>>, vector<4x64xf32>
    %c0_6 = arith.constant 0 : index
    %c0_7 = arith.constant 0 : index
    %7 = vector.load %arg4[%c0_6, %c0_7] : memref<1x64xf32, #tpu.memory_space<vmem>>, vector<1x64xf32>
    %8 = vector.shape_cast %7 : vector<1x64xf32> to vector<1x64xf32>
    %9 = vector.broadcast %8 : vector<1x64xf32> to vector<16x64xf32>
    %10 = vector.extract_strided_slice %4 {offsets = [0, 0], sizes = [16, 64], strides = [1, 1]} : vector<32x64xf32> to vector<16x64xf32>
    %cst_8 = arith.constant 0.000000e+00 : f32
    %11 = vector.broadcast %cst_8 : f32 to vector<3x64xf32>
    %12 = tpu.concatenate %11, %10 in 0 : vector<3x64xf32>, vector<16x64xf32> -> vector<19x64xf32>
    %13 = vector.extract_strided_slice %12 {offsets = [0, 0], sizes = [16, 64], strides = [1, 1]} : vector<19x64xf32> to vector<16x64xf32>
    %14 = vector.extract_strided_slice %6 {offsets = [0, 0], sizes = [1, 64], strides = [1, 1]} : vector<4x64xf32> to vector<1x64xf32>
    %15 = vector.broadcast %14 : vector<1x64xf32> to vector<16x64xf32>
    %16 = arith.mulf %13, %15 : vector<16x64xf32>
    %17 = arith.addf %9, %16 : vector<16x64xf32>
    %18 = vector.extract_strided_slice %12 {offsets = [1, 0], sizes = [16, 64], strides = [1, 1]} : vector<19x64xf32> to vector<16x64xf32>
    %19 = vector.extract_strided_slice %6 {offsets = [1, 0], sizes = [1, 64], strides = [1, 1]} : vector<4x64xf32> to vector<1x64xf32>
    %20 = vector.broadcast %19 : vector<1x64xf32> to vector<16x64xf32>
    %21 = arith.mulf %18, %20 : vector<16x64xf32>
    %22 = arith.addf %17, %21 : vector<16x64xf32>
    %23 = vector.extract_strided_slice %12 {offsets = [2, 0], sizes = [16, 64], strides = [1, 1]} : vector<19x64xf32> to vector<16x64xf32>
    %24 = vector.extract_strided_slice %6 {offsets = [2, 0], sizes = [1, 64], strides = [1, 1]} : vector<4x64xf32> to vector<1x64xf32>
    %25 = vector.broadcast %24 : vector<1x64xf32> to vector<16x64xf32>
    %26 = arith.mulf %23, %25 : vector<16x64xf32>
    %27 = arith.addf %22, %26 : vector<16x64xf32>
    %28 = vector.extract_strided_slice %12 {offsets = [3, 0], sizes = [16, 64], strides = [1, 1]} : vector<19x64xf32> to vector<16x64xf32>
    %29 = vector.extract_strided_slice %6 {offsets = [3, 0], sizes = [1, 64], strides = [1, 1]} : vector<4x64xf32> to vector<1x64xf32>
    %30 = vector.broadcast %29 : vector<1x64xf32> to vector<16x64xf32>
    %31 = arith.mulf %28, %30 : vector<16x64xf32>
    %32 = arith.addf %27, %31 : vector<16x64xf32>
    %33 = vector.extract_strided_slice %4 {offsets = [16, 0], sizes = [16, 64], strides = [1, 1]} : vector<32x64xf32> to vector<16x64xf32>
    %cst_9 = arith.constant 0.000000e+00 : f32
    %34 = vector.broadcast %cst_9 : f32 to vector<3x64xf32>
    %35 = tpu.concatenate %34, %33 in 0 : vector<3x64xf32>, vector<16x64xf32> -> vector<19x64xf32>
    %36 = vector.extract_strided_slice %35 {offsets = [0, 0], sizes = [16, 64], strides = [1, 1]} : vector<19x64xf32> to vector<16x64xf32>
    %37 = vector.extract_strided_slice %6 {offsets = [0, 0], sizes = [1, 64], strides = [1, 1]} : vector<4x64xf32> to vector<1x64xf32>
    %38 = vector.broadcast %37 : vector<1x64xf32> to vector<16x64xf32>
    %39 = arith.mulf %36, %38 : vector<16x64xf32>
    %40 = arith.addf %9, %39 : vector<16x64xf32>
    %41 = vector.extract_strided_slice %35 {offsets = [1, 0], sizes = [16, 64], strides = [1, 1]} : vector<19x64xf32> to vector<16x64xf32>
    %42 = vector.extract_strided_slice %6 {offsets = [1, 0], sizes = [1, 64], strides = [1, 1]} : vector<4x64xf32> to vector<1x64xf32>
    %43 = vector.broadcast %42 : vector<1x64xf32> to vector<16x64xf32>
    %44 = arith.mulf %41, %43 : vector<16x64xf32>
    %45 = arith.addf %40, %44 : vector<16x64xf32>
    %46 = vector.extract_strided_slice %35 {offsets = [2, 0], sizes = [16, 64], strides = [1, 1]} : vector<19x64xf32> to vector<16x64xf32>
    %47 = vector.extract_strided_slice %6 {offsets = [2, 0], sizes = [1, 64], strides = [1, 1]} : vector<4x64xf32> to vector<1x64xf32>
    %48 = vector.broadcast %47 : vector<1x64xf32> to vector<16x64xf32>
    %49 = arith.mulf %46, %48 : vector<16x64xf32>
    %50 = arith.addf %45, %49 : vector<16x64xf32>
    %51 = vector.extract_strided_slice %35 {offsets = [3, 0], sizes = [16, 64], strides = [1, 1]} : vector<19x64xf32> to vector<16x64xf32>
    %52 = vector.extract_strided_slice %6 {offsets = [3, 0], sizes = [1, 64], strides = [1, 1]} : vector<4x64xf32> to vector<1x64xf32>
    %53 = vector.broadcast %52 : vector<1x64xf32> to vector<16x64xf32>
    %54 = arith.mulf %51, %53 : vector<16x64xf32>
    %55 = arith.addf %50, %54 : vector<16x64xf32>
    %56 = tpu.concatenate %32, %55 in 0 : vector<16x64xf32>, vector<16x64xf32> -> vector<32x64xf32>
    %57 = arith.negf %56 : vector<32x64xf32>
    %58 = math.exp %57 : vector<32x64xf32>
    %cst_10 = arith.constant 1.000000e+00 : f32
    %59 = vector.broadcast %cst_10 : f32 to vector<32x64xf32>
    %60 = arith.addf %59, %58 : vector<32x64xf32>
    %61 = arith.divf %59, %60 : vector<32x64xf32>
    %62 = arith.mulf %56, %61 : vector<32x64xf32>
    %c0_11 = arith.constant 0 : index
    %c0_12 = arith.constant 0 : index
    %63 = vector.load %arg5[%c0_11, %c0_12] : memref<64x128xf32, #tpu.memory_space<vmem>>, vector<64x128xf32>
    %cst_13 = arith.constant dense<0.000000e+00> : vector<32x128xf32>
    %64 = tpu.matmul %62, %63, %cst_13 {dimension_numbers = #tpu.dot_dimension_numbers<[1], [0], [0], [1], [0, 0, 1, 1], [], []>} : vector<32x64xf32>, vector<64x128xf32>, vector<32x128xf32> -> vector<32x128xf32>
    %65 = vector.extract_strided_slice %64 {offsets = [0, 0], sizes = [32, 64], strides = [1, 1]} : vector<32x128xf32> to vector<32x64xf32>
    %c0_14 = arith.constant 0 : index
    %c0_15 = arith.constant 0 : index
    %66 = vector.load %arg6[%c0_14, %c0_15] : memref<1x64xf32, #tpu.memory_space<vmem>>, vector<1x64xf32>
    %67 = vector.broadcast %66 : vector<1x64xf32> to vector<32x64xf32>
    %68 = arith.addf %65, %67 : vector<32x64xf32>
    %cst_16 = arith.constant 0.000000e+00 : f32
    %69 = vector.broadcast %cst_16 : f32 to vector<32x64xf32>
    %70 = arith.maximumf %68, %69 : vector<32x64xf32>
    %71 = math.absf %68 : vector<32x64xf32>
    %cst_17 = arith.constant 0.000000e+00 : f32
    %72 = vector.broadcast %cst_17 : f32 to vector<32x64xf32>
    %73 = arith.subf %72, %71 : vector<32x64xf32>
    %74 = math.exp %73 : vector<32x64xf32>
    %75 = math.log1p %74 : vector<32x64xf32>
    %76 = arith.addf %70, %75 : vector<32x64xf32>
    %77 = vector.extract_strided_slice %64 {offsets = [0, 64], sizes = [32, 32], strides = [1, 1]} : vector<32x128xf32> to vector<32x32xf32>
    %c0_18 = arith.constant 0 : index
    %c0_19 = arith.constant 0 : index
    %78 = vector.load %arg10[%c0_18, %c0_19] : memref<512x32xf32, #tpu.memory_space<vmem>>, vector<512x32xf32>
    %79 = arith.mulf %76, %62 : vector<32x64xf32>
    %80 = tpu.concatenate %76, %79 in 1 : vector<32x64xf32>, vector<32x64xf32> -> vector<32x128xf32>
    %cst_20 = arith.constant dense<0.000000e+00> : vector<512x128xf32>
    %81 = tpu.matmul %78, %80, %cst_20 {dimension_numbers = #tpu.dot_dimension_numbers<[1], [0], [0], [1], [0, 0, 1, 1], [], []>} : vector<512x32xf32>, vector<32x128xf32>, vector<512x128xf32> -> vector<512x128xf32>
    %82 = vector.extract_strided_slice %81 {offsets = [0, 0], sizes = [512, 64], strides = [1, 1]} : vector<512x128xf32> to vector<512x64xf32>
    %83 = vector.extract_strided_slice %81 {offsets = [0, 64], sizes = [512, 64], strides = [1, 1]} : vector<512x128xf32> to vector<512x64xf32>
    %cst_21 = arith.constant dense<0.000000e+00> : vector<512x32xf32>
    %84 = tpu.matmul %78, %77, %cst_21 {dimension_numbers = #tpu.dot_dimension_numbers<[1], [0], [0], [1], [0, 0, 1, 1], [], []>} : vector<512x32xf32>, vector<32x32xf32>, vector<512x32xf32> -> vector<512x32xf32>
    %c0_22 = arith.constant 0 : index
    %c0_23 = arith.constant 0 : index
    %85 = vector.load %arg11[%c0_22, %c0_23] : memref<512x32xf32, #tpu.memory_space<vmem>>, vector<512x32xf32>
    %86 = arith.mulf %84, %85 : vector<512x32xf32>
    %c0_24 = arith.constant 0 : index
    %c0_25 = arith.constant 0 : index
    %87 = vector.load %arg13[%c0_24, %c0_25] : memref<32x128xf32, #tpu.memory_space<vmem>>, vector<32x128xf32>
    %cst_26 = arith.constant dense<0.000000e+00> : vector<512x128xf32>
    %88 = tpu.matmul %86, %87, %cst_26 {dimension_numbers = #tpu.dot_dimension_numbers<[1], [0], [0], [1], [0, 0, 1, 1], [], []>} : vector<512x32xf32>, vector<32x128xf32>, vector<512x128xf32> -> vector<512x128xf32>
    %89 = vector.extract_strided_slice %88 {offsets = [0, 0], sizes = [512, 64], strides = [1, 1]} : vector<512x128xf32> to vector<512x64xf32>
    %90 = vector.extract_strided_slice %88 {offsets = [0, 64], sizes = [512, 64], strides = [1, 1]} : vector<512x128xf32> to vector<512x64xf32>
    %c0_27 = arith.constant 0 : index
    %c0_28 = arith.constant 0 : index
    %91 = vector.load %arg7[%c0_27, %c0_28] : memref<512x64xf32, #tpu.memory_space<vmem>>, vector<512x64xf32>
    %92 = arith.mulf %82, %91 : vector<512x64xf32>
    %93 = math.exp %92 : vector<512x64xf32>
    %c0_29 = arith.constant 0 : index
    %c0_30 = arith.constant 0 : index
    %94 = vector.load %arg15[%c0_29, %c0_30] : memref<512x64xf32, #tpu.memory_space<vmem>>, vector<512x64xf32>
    tpu.vector_store %arg15[%c0_29, %c0_30], %93 {strides = array<i32>} : memref<512x64xf32, #tpu.memory_space<vmem>>, vector<512x64xf32>,
    %95 = arith.mulf %83, %89 : vector<512x64xf32>
    %c0_31 = arith.constant 0 : index
    %c0_32 = arith.constant 0 : index
    %96 = vector.load %arg16[%c0_31, %c0_32] : memref<512x64xf32, #tpu.memory_space<vmem>>, vector<512x64xf32>
    tpu.vector_store %arg16[%c0_31, %c0_32], %95 {strides = array<i32>} : memref<512x64xf32, #tpu.memory_space<vmem>>, vector<512x64xf32>,
    %cst_33 = arith.constant 0.000000e+00 : f32
    %97 = vector.broadcast %cst_33 : f32 to vector<16x64xf32>
    %cst_34 = arith.constant 0.000000e+00 : f32
    %98 = vector.broadcast %cst_34 : f32 to vector<16x64xf32>
    %c0_35 = arith.constant 0 : index
    %c0_36 = arith.constant 0 : index
    %99 = vector.load %arg15[%c0_35, %c0_36] : memref<512x64xf32, #tpu.memory_space<vmem>>, vector<16x64xf32>
    %100 = arith.mulf %99, %97 : vector<16x64xf32>
    %c0_37 = arith.constant 0 : index
    %c0_38 = arith.constant 0 : index
    %101 = vector.load %arg16[%c0_37, %c0_38] : memref<512x64xf32, #tpu.memory_space<vmem>>, vector<16x64xf32>
    %102 = arith.addf %100, %101 : vector<16x64xf32>
    %c0_39 = arith.constant 0 : index
    %c0_40 = arith.constant 0 : index
    %103 = vector.load %arg17[%c0_39, %c0_40] : memref<512x64xf32, #tpu.memory_space<vmem>>, vector<16x64xf32>
    tpu.vector_store %arg17[%c0_39, %c0_40], %102 {strides = array<i32>} : memref<512x64xf32, #tpu.memory_space<vmem>>, vector<16x64xf32>,
    %c256 = arith.constant 256 : index
    %c0_41 = arith.constant 0 : index
    %104 = vector.load %arg15[%c256, %c0_41] : memref<512x64xf32, #tpu.memory_space<vmem>>, vector<16x64xf32>
    %105 = arith.mulf %104, %98 : vector<16x64xf32>
    %c256_42 = arith.constant 256 : index
    %c0_43 = arith.constant 0 : index
    %106 = vector.load %arg16[%c256_42, %c0_43] : memref<512x64xf32, #tpu.memory_space<vmem>>, vector<16x64xf32>
    %107 = arith.addf %105, %106 : vector<16x64xf32>
    %c256_44 = arith.constant 256 : index
    %c0_45 = arith.constant 0 : index
    %108 = vector.load %arg17[%c256_44, %c0_45] : memref<512x64xf32, #tpu.memory_space<vmem>>, vector<16x64xf32>
    tpu.vector_store %arg17[%c256_44, %c0_45], %107 {strides = array<i32>} : memref<512x64xf32, #tpu.memory_space<vmem>>, vector<16x64xf32>,
    %c16 = arith.constant 16 : index
    %c0_46 = arith.constant 0 : index
    %109 = vector.load %arg15[%c16, %c0_46] : memref<512x64xf32, #tpu.memory_space<vmem>>, vector<16x64xf32>
    %110 = arith.mulf %109, %102 : vector<16x64xf32>
    %c16_47 = arith.constant 16 : index
    %c0_48 = arith.constant 0 : index
    %111 = vector.load %arg16[%c16_47, %c0_48] : memref<512x64xf32, #tpu.memory_space<vmem>>, vector<16x64xf32>
    %112 = arith.addf %110, %111 : vector<16x64xf32>
    %c16_49 = arith.constant 16 : index
    %c0_50 = arith.constant 0 : index
    %113 = vector.load %arg17[%c16_49, %c0_50] : memref<512x64xf32, #tpu.memory_space<vmem>>, vector<16x64xf32>
    tpu.vector_store %arg17[%c16_49, %c0_50], %112 {strides = array<i32>} : memref<512x64xf32, #tpu.memory_space<vmem>>, vector<16x64xf32>,
    %c272 = arith.constant 272 : index
    %c0_51 = arith.constant 0 : index
    %114 = vector.load %arg15[%c272, %c0_51] : memref<512x64xf32, #tpu.memory_space<vmem>>, vector<16x64xf32>
    %115 = arith.mulf %114, %107 : vector<16x64xf32>
    %c272_52 = arith.constant 272 : index
    %c0_53 = arith.constant 0 : index
    %116 = vector.load %arg16[%c272_52, %c0_53] : memref<512x64xf32, #tpu.memory_space<vmem>>, vector<16x64xf32>
    %117 = arith.addf %115, %116 : vector<16x64xf32>
    %c272_54 = arith.constant 272 : index
    %c0_55 = arith.constant 0 : index
    %118 = vector.load %arg17[%c272_54, %c0_55] : memref<512x64xf32, #tpu.memory_space<vmem>>, vector<16x64xf32>
    tpu.vector_store %arg17[%c272_54, %c0_55], %117 {strides = array<i32>} : memref<512x64xf32, #tpu.memory_space<vmem>>, vector<16x64xf32>,
    %c32 = arith.constant 32 : index
    %c0_56 = arith.constant 0 : index
    %119 = vector.load %arg15[%c32, %c0_56] : memref<512x64xf32, #tpu.memory_space<vmem>>, vector<16x64xf32>
    %120 = arith.mulf %119, %112 : vector<16x64xf32>
    %c32_57 = arith.constant 32 : index
    %c0_58 = arith.constant 0 : index
    %121 = vector.load %arg16[%c32_57, %c0_58] : memref<512x64xf32, #tpu.memory_space<vmem>>, vector<16x64xf32>
    %122 = arith.addf %120, %121 : vector<16x64xf32>
    %c32_59 = arith.constant 32 : index
    %c0_60 = arith.constant 0 : index
    %123 = vector.load %arg17[%c32_59, %c0_60] : memref<512x64xf32, #tpu.memory_space<vmem>>, vector<16x64xf32>
    tpu.vector_store %arg17[%c32_59, %c0_60], %122 {strides = array<i32>} : memref<512x64xf32, #tpu.memory_space<vmem>>, vector<16x64xf32>,
    %c288 = arith.constant 288 : index
    %c0_61 = arith.constant 0 : index
    %124 = vector.load %arg15[%c288, %c0_61] : memref<512x64xf32, #tpu.memory_space<vmem>>, vector<16x64xf32>
    %125 = arith.mulf %124, %117 : vector<16x64xf32>
    %c288_62 = arith.constant 288 : index
    %c0_63 = arith.constant 0 : index
    %126 = vector.load %arg16[%c288_62, %c0_63] : memref<512x64xf32, #tpu.memory_space<vmem>>, vector<16x64xf32>
    %127 = arith.addf %125, %126 : vector<16x64xf32>
    %c288_64 = arith.constant 288 : index
    %c0_65 = arith.constant 0 : index
    %128 = vector.load %arg17[%c288_64, %c0_65] : memref<512x64xf32, #tpu.memory_space<vmem>>, vector<16x64xf32>
    tpu.vector_store %arg17[%c288_64, %c0_65], %127 {strides = array<i32>} : memref<512x64xf32, #tpu.memory_space<vmem>>, vector<16x64xf32>,
    %c48 = arith.constant 48 : index
    %c0_66 = arith.constant 0 : index
    %129 = vector.load %arg15[%c48, %c0_66] : memref<512x64xf32, #tpu.memory_space<vmem>>, vector<16x64xf32>
    %130 = arith.mulf %129, %122 : vector<16x64xf32>
    %c48_67 = arith.constant 48 : index
    %c0_68 = arith.constant 0 : index
    %131 = vector.load %arg16[%c48_67, %c0_68] : memref<512x64xf32, #tpu.memory_space<vmem>>, vector<16x64xf32>
    %132 = arith.addf %130, %131 : vector<16x64xf32>
    %c48_69 = arith.constant 48 : index
    %c0_70 = arith.constant 0 : index
    %133 = vector.load %arg17[%c48_69, %c0_70] : memref<512x64xf32, #tpu.memory_space<vmem>>, vector<16x64xf32>
    tpu.vector_store %arg17[%c48_69, %c0_70], %132 {strides = array<i32>} : memref<512x64xf32, #tpu.memory_space<vmem>>, vector<16x64xf32>,
    %c304 = arith.constant 304 : index
    %c0_71 = arith.constant 0 : index
    %134 = vector.load %arg15[%c304, %c0_71] : memref<512x64xf32, #tpu.memory_space<vmem>>, vector<16x64xf32>
    %135 = arith.mulf %134, %127 : vector<16x64xf32>
    %c304_72 = arith.constant 304 : index
    %c0_73 = arith.constant 0 : index
    %136 = vector.load %arg16[%c304_72, %c0_73] : memref<512x64xf32, #tpu.memory_space<vmem>>, vector<16x64xf32>
    %137 = arith.addf %135, %136 : vector<16x64xf32>
    %c304_74 = arith.constant 304 : index
    %c0_75 = arith.constant 0 : index
    %138 = vector.load %arg17[%c304_74, %c0_75] : memref<512x64xf32, #tpu.memory_space<vmem>>, vector<16x64xf32>
    tpu.vector_store %arg17[%c304_74, %c0_75], %137 {strides = array<i32>} : memref<512x64xf32, #tpu.memory_space<vmem>>, vector<16x64xf32>,
    %c64 = arith.constant 64 : index
    %c0_76 = arith.constant 0 : index
    %139 = vector.load %arg15[%c64, %c0_76] : memref<512x64xf32, #tpu.memory_space<vmem>>, vector<16x64xf32>
    %140 = arith.mulf %139, %132 : vector<16x64xf32>
    %c64_77 = arith.constant 64 : index
    %c0_78 = arith.constant 0 : index
    %141 = vector.load %arg16[%c64_77, %c0_78] : memref<512x64xf32, #tpu.memory_space<vmem>>, vector<16x64xf32>
    %142 = arith.addf %140, %141 : vector<16x64xf32>
    %c64_79 = arith.constant 64 : index
    %c0_80 = arith.constant 0 : index
    %143 = vector.load %arg17[%c64_79, %c0_80] : memref<512x64xf32, #tpu.memory_space<vmem>>, vector<16x64xf32>
    tpu.vector_store %arg17[%c64_79, %c0_80], %142 {strides = array<i32>} : memref<512x64xf32, #tpu.memory_space<vmem>>, vector<16x64xf32>,
    %c320 = arith.constant 320 : index
    %c0_81 = arith.constant 0 : index
    %144 = vector.load %arg15[%c320, %c0_81] : memref<512x64xf32, #tpu.memory_space<vmem>>, vector<16x64xf32>
    %145 = arith.mulf %144, %137 : vector<16x64xf32>
    %c320_82 = arith.constant 320 : index
    %c0_83 = arith.constant 0 : index
    %146 = vector.load %arg16[%c320_82, %c0_83] : memref<512x64xf32, #tpu.memory_space<vmem>>, vector<16x64xf32>
    %147 = arith.addf %145, %146 : vector<16x64xf32>
    %c320_84 = arith.constant 320 : index
    %c0_85 = arith.constant 0 : index
    %148 = vector.load %arg17[%c320_84, %c0_85] : memref<512x64xf32, #tpu.memory_space<vmem>>, vector<16x64xf32>
    tpu.vector_store %arg17[%c320_84, %c0_85], %147 {strides = array<i32>} : memref<512x64xf32, #tpu.memory_space<vmem>>, vector<16x64xf32>,
    %c80 = arith.constant 80 : index
    %c0_86 = arith.constant 0 : index
    %149 = vector.load %arg15[%c80, %c0_86] : memref<512x64xf32, #tpu.memory_space<vmem>>, vector<16x64xf32>
    %150 = arith.mulf %149, %142 : vector<16x64xf32>
    %c80_87 = arith.constant 80 : index
    %c0_88 = arith.constant 0 : index
    %151 = vector.load %arg16[%c80_87, %c0_88] : memref<512x64xf32, #tpu.memory_space<vmem>>, vector<16x64xf32>
    %152 = arith.addf %150, %151 : vector<16x64xf32>
    %c80_89 = arith.constant 80 : index
    %c0_90 = arith.constant 0 : index
    %153 = vector.load %arg17[%c80_89, %c0_90] : memref<512x64xf32, #tpu.memory_space<vmem>>, vector<16x64xf32>
    tpu.vector_store %arg17[%c80_89, %c0_90], %152 {strides = array<i32>} : memref<512x64xf32, #tpu.memory_space<vmem>>, vector<16x64xf32>,
    %c336 = arith.constant 336 : index
    %c0_91 = arith.constant 0 : index
    %154 = vector.load %arg15[%c336, %c0_91] : memref<512x64xf32, #tpu.memory_space<vmem>>, vector<16x64xf32>
    %155 = arith.mulf %154, %147 : vector<16x64xf32>
    %c336_92 = arith.constant 336 : index
    %c0_93 = arith.constant 0 : index
    %156 = vector.load %arg16[%c336_92, %c0_93] : memref<512x64xf32, #tpu.memory_space<vmem>>, vector<16x64xf32>
    %157 = arith.addf %155, %156 : vector<16x64xf32>
    %c336_94 = arith.constant 336 : index
    %c0_95 = arith.constant 0 : index
    %158 = vector.load %arg17[%c336_94, %c0_95] : memref<512x64xf32, #tpu.memory_space<vmem>>, vector<16x64xf32>
    tpu.vector_store %arg17[%c336_94, %c0_95], %157 {strides = array<i32>} : memref<512x64xf32, #tpu.memory_space<vmem>>, vector<16x64xf32>,
    %c96 = arith.constant 96 : index
    %c0_96 = arith.constant 0 : index
    %159 = vector.load %arg15[%c96, %c0_96] : memref<512x64xf32, #tpu.memory_space<vmem>>, vector<16x64xf32>
    %160 = arith.mulf %159, %152 : vector<16x64xf32>
    %c96_97 = arith.constant 96 : index
    %c0_98 = arith.constant 0 : index
    %161 = vector.load %arg16[%c96_97, %c0_98] : memref<512x64xf32, #tpu.memory_space<vmem>>, vector<16x64xf32>
    %162 = arith.addf %160, %161 : vector<16x64xf32>
    %c96_99 = arith.constant 96 : index
    %c0_100 = arith.constant 0 : index
    %163 = vector.load %arg17[%c96_99, %c0_100] : memref<512x64xf32, #tpu.memory_space<vmem>>, vector<16x64xf32>
    tpu.vector_store %arg17[%c96_99, %c0_100], %162 {strides = array<i32>} : memref<512x64xf32, #tpu.memory_space<vmem>>, vector<16x64xf32>,
    %c352 = arith.constant 352 : index
    %c0_101 = arith.constant 0 : index
    %164 = vector.load %arg15[%c352, %c0_101] : memref<512x64xf32, #tpu.memory_space<vmem>>, vector<16x64xf32>
    %165 = arith.mulf %164, %157 : vector<16x64xf32>
    %c352_102 = arith.constant 352 : index
    %c0_103 = arith.constant 0 : index
    %166 = vector.load %arg16[%c352_102, %c0_103] : memref<512x64xf32, #tpu.memory_space<vmem>>, vector<16x64xf32>
    %167 = arith.addf %165, %166 : vector<16x64xf32>
    %c352_104 = arith.constant 352 : index
    %c0_105 = arith.constant 0 : index
    %168 = vector.load %arg17[%c352_104, %c0_105] : memref<512x64xf32, #tpu.memory_space<vmem>>, vector<16x64xf32>
    tpu.vector_store %arg17[%c352_104, %c0_105], %167 {strides = array<i32>} : memref<512x64xf32, #tpu.memory_space<vmem>>, vector<16x64xf32>,
    %c112 = arith.constant 112 : index
    %c0_106 = arith.constant 0 : index
    %169 = vector.load %arg15[%c112, %c0_106] : memref<512x64xf32, #tpu.memory_space<vmem>>, vector<16x64xf32>
    %170 = arith.mulf %169, %162 : vector<16x64xf32>
    %c112_107 = arith.constant 112 : index
    %c0_108 = arith.constant 0 : index
    %171 = vector.load %arg16[%c112_107, %c0_108] : memref<512x64xf32, #tpu.memory_space<vmem>>, vector<16x64xf32>
    %172 = arith.addf %170, %171 : vector<16x64xf32>
    %c112_109 = arith.constant 112 : index
    %c0_110 = arith.constant 0 : index
    %173 = vector.load %arg17[%c112_109, %c0_110] : memref<512x64xf32, #tpu.memory_space<vmem>>, vector<16x64xf32>
    tpu.vector_store %arg17[%c112_109, %c0_110], %172 {strides = array<i32>} : memref<512x64xf32, #tpu.memory_space<vmem>>, vector<16x64xf32>,
    %c368 = arith.constant 368 : index
    %c0_111 = arith.constant 0 : index
    %174 = vector.load %arg15[%c368, %c0_111] : memref<512x64xf32, #tpu.memory_space<vmem>>, vector<16x64xf32>
    %175 = arith.mulf %174, %167 : vector<16x64xf32>
    %c368_112 = arith.constant 368 : index
    %c0_113 = arith.constant 0 : index
    %176 = vector.load %arg16[%c368_112, %c0_113] : memref<512x64xf32, #tpu.memory_space<vmem>>, vector<16x64xf32>
    %177 = arith.addf %175, %176 : vector<16x64xf32>
    %c368_114 = arith.constant 368 : index
    %c0_115 = arith.constant 0 : index
    %178 = vector.load %arg17[%c368_114, %c0_115] : memref<512x64xf32, #tpu.memory_space<vmem>>, vector<16x64xf32>
    tpu.vector_store %arg17[%c368_114, %c0_115], %177 {strides = array<i32>} : memref<512x64xf32, #tpu.memory_space<vmem>>, vector<16x64xf32>,
    %c128 = arith.constant 128 : index
    %c0_116 = arith.constant 0 : index
    %179 = vector.load %arg15[%c128, %c0_116] : memref<512x64xf32, #tpu.memory_space<vmem>>, vector<16x64xf32>
    %180 = arith.mulf %179, %172 : vector<16x64xf32>
    %c128_117 = arith.constant 128 : index
    %c0_118 = arith.constant 0 : index
    %181 = vector.load %arg16[%c128_117, %c0_118] : memref<512x64xf32, #tpu.memory_space<vmem>>, vector<16x64xf32>
    %182 = arith.addf %180, %181 : vector<16x64xf32>
    %c128_119 = arith.constant 128 : index
    %c0_120 = arith.constant 0 : index
    %183 = vector.load %arg17[%c128_119, %c0_120] : memref<512x64xf32, #tpu.memory_space<vmem>>, vector<16x64xf32>
    tpu.vector_store %arg17[%c128_119, %c0_120], %182 {strides = array<i32>} : memref<512x64xf32, #tpu.memory_space<vmem>>, vector<16x64xf32>,
    %c384 = arith.constant 384 : index
    %c0_121 = arith.constant 0 : index
    %184 = vector.load %arg15[%c384, %c0_121] : memref<512x64xf32, #tpu.memory_space<vmem>>, vector<16x64xf32>
    %185 = arith.mulf %184, %177 : vector<16x64xf32>
    %c384_122 = arith.constant 384 : index
    %c0_123 = arith.constant 0 : index
    %186 = vector.load %arg16[%c384_122, %c0_123] : memref<512x64xf32, #tpu.memory_space<vmem>>, vector<16x64xf32>
    %187 = arith.addf %185, %186 : vector<16x64xf32>
    %c384_124 = arith.constant 384 : index
    %c0_125 = arith.constant 0 : index
    %188 = vector.load %arg17[%c384_124, %c0_125] : memref<512x64xf32, #tpu.memory_space<vmem>>, vector<16x64xf32>
    tpu.vector_store %arg17[%c384_124, %c0_125], %187 {strides = array<i32>} : memref<512x64xf32, #tpu.memory_space<vmem>>, vector<16x64xf32>,
    %c144 = arith.constant 144 : index
    %c0_126 = arith.constant 0 : index
    %189 = vector.load %arg15[%c144, %c0_126] : memref<512x64xf32, #tpu.memory_space<vmem>>, vector<16x64xf32>
    %190 = arith.mulf %189, %182 : vector<16x64xf32>
    %c144_127 = arith.constant 144 : index
    %c0_128 = arith.constant 0 : index
    %191 = vector.load %arg16[%c144_127, %c0_128] : memref<512x64xf32, #tpu.memory_space<vmem>>, vector<16x64xf32>
    %192 = arith.addf %190, %191 : vector<16x64xf32>
    %c144_129 = arith.constant 144 : index
    %c0_130 = arith.constant 0 : index
    %193 = vector.load %arg17[%c144_129, %c0_130] : memref<512x64xf32, #tpu.memory_space<vmem>>, vector<16x64xf32>
    tpu.vector_store %arg17[%c144_129, %c0_130], %192 {strides = array<i32>} : memref<512x64xf32, #tpu.memory_space<vmem>>, vector<16x64xf32>,
    %c400 = arith.constant 400 : index
    %c0_131 = arith.constant 0 : index
    %194 = vector.load %arg15[%c400, %c0_131] : memref<512x64xf32, #tpu.memory_space<vmem>>, vector<16x64xf32>
    %195 = arith.mulf %194, %187 : vector<16x64xf32>
    %c400_132 = arith.constant 400 : index
    %c0_133 = arith.constant 0 : index
    %196 = vector.load %arg16[%c400_132, %c0_133] : memref<512x64xf32, #tpu.memory_space<vmem>>, vector<16x64xf32>
    %197 = arith.addf %195, %196 : vector<16x64xf32>
    %c400_134 = arith.constant 400 : index
    %c0_135 = arith.constant 0 : index
    %198 = vector.load %arg17[%c400_134, %c0_135] : memref<512x64xf32, #tpu.memory_space<vmem>>, vector<16x64xf32>
    tpu.vector_store %arg17[%c400_134, %c0_135], %197 {strides = array<i32>} : memref<512x64xf32, #tpu.memory_space<vmem>>, vector<16x64xf32>,
    %c160 = arith.constant 160 : index
    %c0_136 = arith.constant 0 : index
    %199 = vector.load %arg15[%c160, %c0_136] : memref<512x64xf32, #tpu.memory_space<vmem>>, vector<16x64xf32>
    %200 = arith.mulf %199, %192 : vector<16x64xf32>
    %c160_137 = arith.constant 160 : index
    %c0_138 = arith.constant 0 : index
    %201 = vector.load %arg16[%c160_137, %c0_138] : memref<512x64xf32, #tpu.memory_space<vmem>>, vector<16x64xf32>
    %202 = arith.addf %200, %201 : vector<16x64xf32>
    %c160_139 = arith.constant 160 : index
    %c0_140 = arith.constant 0 : index
    %203 = vector.load %arg17[%c160_139, %c0_140] : memref<512x64xf32, #tpu.memory_space<vmem>>, vector<16x64xf32>
    tpu.vector_store %arg17[%c160_139, %c0_140], %202 {strides = array<i32>} : memref<512x64xf32, #tpu.memory_space<vmem>>, vector<16x64xf32>,
    %c416 = arith.constant 416 : index
    %c0_141 = arith.constant 0 : index
    %204 = vector.load %arg15[%c416, %c0_141] : memref<512x64xf32, #tpu.memory_space<vmem>>, vector<16x64xf32>
    %205 = arith.mulf %204, %197 : vector<16x64xf32>
    %c416_142 = arith.constant 416 : index
    %c0_143 = arith.constant 0 : index
    %206 = vector.load %arg16[%c416_142, %c0_143] : memref<512x64xf32, #tpu.memory_space<vmem>>, vector<16x64xf32>
    %207 = arith.addf %205, %206 : vector<16x64xf32>
    %c416_144 = arith.constant 416 : index
    %c0_145 = arith.constant 0 : index
    %208 = vector.load %arg17[%c416_144, %c0_145] : memref<512x64xf32, #tpu.memory_space<vmem>>, vector<16x64xf32>
    tpu.vector_store %arg17[%c416_144, %c0_145], %207 {strides = array<i32>} : memref<512x64xf32, #tpu.memory_space<vmem>>, vector<16x64xf32>,
    %c176 = arith.constant 176 : index
    %c0_146 = arith.constant 0 : index
    %209 = vector.load %arg15[%c176, %c0_146] : memref<512x64xf32, #tpu.memory_space<vmem>>, vector<16x64xf32>
    %210 = arith.mulf %209, %202 : vector<16x64xf32>
    %c176_147 = arith.constant 176 : index
    %c0_148 = arith.constant 0 : index
    %211 = vector.load %arg16[%c176_147, %c0_148] : memref<512x64xf32, #tpu.memory_space<vmem>>, vector<16x64xf32>
    %212 = arith.addf %210, %211 : vector<16x64xf32>
    %c176_149 = arith.constant 176 : index
    %c0_150 = arith.constant 0 : index
    %213 = vector.load %arg17[%c176_149, %c0_150] : memref<512x64xf32, #tpu.memory_space<vmem>>, vector<16x64xf32>
    tpu.vector_store %arg17[%c176_149, %c0_150], %212 {strides = array<i32>} : memref<512x64xf32, #tpu.memory_space<vmem>>, vector<16x64xf32>,
    %c432 = arith.constant 432 : index
    %c0_151 = arith.constant 0 : index
    %214 = vector.load %arg15[%c432, %c0_151] : memref<512x64xf32, #tpu.memory_space<vmem>>, vector<16x64xf32>
    %215 = arith.mulf %214, %207 : vector<16x64xf32>
    %c432_152 = arith.constant 432 : index
    %c0_153 = arith.constant 0 : index
    %216 = vector.load %arg16[%c432_152, %c0_153] : memref<512x64xf32, #tpu.memory_space<vmem>>, vector<16x64xf32>
    %217 = arith.addf %215, %216 : vector<16x64xf32>
    %c432_154 = arith.constant 432 : index
    %c0_155 = arith.constant 0 : index
    %218 = vector.load %arg17[%c432_154, %c0_155] : memref<512x64xf32, #tpu.memory_space<vmem>>, vector<16x64xf32>
    tpu.vector_store %arg17[%c432_154, %c0_155], %217 {strides = array<i32>} : memref<512x64xf32, #tpu.memory_space<vmem>>, vector<16x64xf32>,
    %c192 = arith.constant 192 : index
    %c0_156 = arith.constant 0 : index
    %219 = vector.load %arg15[%c192, %c0_156] : memref<512x64xf32, #tpu.memory_space<vmem>>, vector<16x64xf32>
    %220 = arith.mulf %219, %212 : vector<16x64xf32>
    %c192_157 = arith.constant 192 : index
    %c0_158 = arith.constant 0 : index
    %221 = vector.load %arg16[%c192_157, %c0_158] : memref<512x64xf32, #tpu.memory_space<vmem>>, vector<16x64xf32>
    %222 = arith.addf %220, %221 : vector<16x64xf32>
    %c192_159 = arith.constant 192 : index
    %c0_160 = arith.constant 0 : index
    %223 = vector.load %arg17[%c192_159, %c0_160] : memref<512x64xf32, #tpu.memory_space<vmem>>, vector<16x64xf32>
    tpu.vector_store %arg17[%c192_159, %c0_160], %222 {strides = array<i32>} : memref<512x64xf32, #tpu.memory_space<vmem>>, vector<16x64xf32>,
    %c448 = arith.constant 448 : index
    %c0_161 = arith.constant 0 : index
    %224 = vector.load %arg15[%c448, %c0_161] : memref<512x64xf32, #tpu.memory_space<vmem>>, vector<16x64xf32>
    %225 = arith.mulf %224, %217 : vector<16x64xf32>
    %c448_162 = arith.constant 448 : index
    %c0_163 = arith.constant 0 : index
    %226 = vector.load %arg16[%c448_162, %c0_163] : memref<512x64xf32, #tpu.memory_space<vmem>>, vector<16x64xf32>
    %227 = arith.addf %225, %226 : vector<16x64xf32>
    %c448_164 = arith.constant 448 : index
    %c0_165 = arith.constant 0 : index
    %228 = vector.load %arg17[%c448_164, %c0_165] : memref<512x64xf32, #tpu.memory_space<vmem>>, vector<16x64xf32>
    tpu.vector_store %arg17[%c448_164, %c0_165], %227 {strides = array<i32>} : memref<512x64xf32, #tpu.memory_space<vmem>>, vector<16x64xf32>,
    %c208 = arith.constant 208 : index
    %c0_166 = arith.constant 0 : index
    %229 = vector.load %arg15[%c208, %c0_166] : memref<512x64xf32, #tpu.memory_space<vmem>>, vector<16x64xf32>
    %230 = arith.mulf %229, %222 : vector<16x64xf32>
    %c208_167 = arith.constant 208 : index
    %c0_168 = arith.constant 0 : index
    %231 = vector.load %arg16[%c208_167, %c0_168] : memref<512x64xf32, #tpu.memory_space<vmem>>, vector<16x64xf32>
    %232 = arith.addf %230, %231 : vector<16x64xf32>
    %c208_169 = arith.constant 208 : index
    %c0_170 = arith.constant 0 : index
    %233 = vector.load %arg17[%c208_169, %c0_170] : memref<512x64xf32, #tpu.memory_space<vmem>>, vector<16x64xf32>
    tpu.vector_store %arg17[%c208_169, %c0_170], %232 {strides = array<i32>} : memref<512x64xf32, #tpu.memory_space<vmem>>, vector<16x64xf32>,
    %c464 = arith.constant 464 : index
    %c0_171 = arith.constant 0 : index
    %234 = vector.load %arg15[%c464, %c0_171] : memref<512x64xf32, #tpu.memory_space<vmem>>, vector<16x64xf32>
    %235 = arith.mulf %234, %227 : vector<16x64xf32>
    %c464_172 = arith.constant 464 : index
    %c0_173 = arith.constant 0 : index
    %236 = vector.load %arg16[%c464_172, %c0_173] : memref<512x64xf32, #tpu.memory_space<vmem>>, vector<16x64xf32>
    %237 = arith.addf %235, %236 : vector<16x64xf32>
    %c464_174 = arith.constant 464 : index
    %c0_175 = arith.constant 0 : index
    %238 = vector.load %arg17[%c464_174, %c0_175] : memref<512x64xf32, #tpu.memory_space<vmem>>, vector<16x64xf32>
    tpu.vector_store %arg17[%c464_174, %c0_175], %237 {strides = array<i32>} : memref<512x64xf32, #tpu.memory_space<vmem>>, vector<16x64xf32>,
    %c224 = arith.constant 224 : index
    %c0_176 = arith.constant 0 : index
    %239 = vector.load %arg15[%c224, %c0_176] : memref<512x64xf32, #tpu.memory_space<vmem>>, vector<16x64xf32>
    %240 = arith.mulf %239, %232 : vector<16x64xf32>
    %c224_177 = arith.constant 224 : index
    %c0_178 = arith.constant 0 : index
    %241 = vector.load %arg16[%c224_177, %c0_178] : memref<512x64xf32, #tpu.memory_space<vmem>>, vector<16x64xf32>
    %242 = arith.addf %240, %241 : vector<16x64xf32>
    %c224_179 = arith.constant 224 : index
    %c0_180 = arith.constant 0 : index
    %243 = vector.load %arg17[%c224_179, %c0_180] : memref<512x64xf32, #tpu.memory_space<vmem>>, vector<16x64xf32>
    tpu.vector_store %arg17[%c224_179, %c0_180], %242 {strides = array<i32>} : memref<512x64xf32, #tpu.memory_space<vmem>>, vector<16x64xf32>,
    %c480 = arith.constant 480 : index
    %c0_181 = arith.constant 0 : index
    %244 = vector.load %arg15[%c480, %c0_181] : memref<512x64xf32, #tpu.memory_space<vmem>>, vector<16x64xf32>
    %245 = arith.mulf %244, %237 : vector<16x64xf32>
    %c480_182 = arith.constant 480 : index
    %c0_183 = arith.constant 0 : index
    %246 = vector.load %arg16[%c480_182, %c0_183] : memref<512x64xf32, #tpu.memory_space<vmem>>, vector<16x64xf32>
    %247 = arith.addf %245, %246 : vector<16x64xf32>
    %c480_184 = arith.constant 480 : index
    %c0_185 = arith.constant 0 : index
    %248 = vector.load %arg17[%c480_184, %c0_185] : memref<512x64xf32, #tpu.memory_space<vmem>>, vector<16x64xf32>
    tpu.vector_store %arg17[%c480_184, %c0_185], %247 {strides = array<i32>} : memref<512x64xf32, #tpu.memory_space<vmem>>, vector<16x64xf32>,
    %c240 = arith.constant 240 : index
    %c0_186 = arith.constant 0 : index
    %249 = vector.load %arg15[%c240, %c0_186] : memref<512x64xf32, #tpu.memory_space<vmem>>, vector<16x64xf32>
    %250 = arith.mulf %249, %242 : vector<16x64xf32>
    %c240_187 = arith.constant 240 : index
    %c0_188 = arith.constant 0 : index
    %251 = vector.load %arg16[%c240_187, %c0_188] : memref<512x64xf32, #tpu.memory_space<vmem>>, vector<16x64xf32>
    %252 = arith.addf %250, %251 : vector<16x64xf32>
    %c240_189 = arith.constant 240 : index
    %c0_190 = arith.constant 0 : index
    %253 = vector.load %arg17[%c240_189, %c0_190] : memref<512x64xf32, #tpu.memory_space<vmem>>, vector<16x64xf32>
    tpu.vector_store %arg17[%c240_189, %c0_190], %252 {strides = array<i32>} : memref<512x64xf32, #tpu.memory_space<vmem>>, vector<16x64xf32>,
    %c496 = arith.constant 496 : index
    %c0_191 = arith.constant 0 : index
    %254 = vector.load %arg15[%c496, %c0_191] : memref<512x64xf32, #tpu.memory_space<vmem>>, vector<16x64xf32>
    %255 = arith.mulf %254, %247 : vector<16x64xf32>
    %c496_192 = arith.constant 496 : index
    %c0_193 = arith.constant 0 : index
    %256 = vector.load %arg16[%c496_192, %c0_193] : memref<512x64xf32, #tpu.memory_space<vmem>>, vector<16x64xf32>
    %257 = arith.addf %255, %256 : vector<16x64xf32>
    %c496_194 = arith.constant 496 : index
    %c0_195 = arith.constant 0 : index
    %258 = vector.load %arg17[%c496_194, %c0_195] : memref<512x64xf32, #tpu.memory_space<vmem>>, vector<16x64xf32>
    tpu.vector_store %arg17[%c496_194, %c0_195], %257 {strides = array<i32>} : memref<512x64xf32, #tpu.memory_space<vmem>>, vector<16x64xf32>,
    %c0_196 = arith.constant 0 : index
    %c0_197 = arith.constant 0 : index
    %259 = vector.load %arg12[%c0_196, %c0_197] : memref<32x512xf32, #tpu.memory_space<vmem>>, vector<32x512xf32>
    %c0_198 = arith.constant 0 : index
    %c0_199 = arith.constant 0 : index
    %260 = vector.load %arg17[%c0_198, %c0_199] : memref<512x64xf32, #tpu.memory_space<vmem>>, vector<512x64xf32>
    %261 = arith.mulf %260, %90 : vector<512x64xf32>
    %cst_200 = arith.constant dense<0.000000e+00> : vector<32x64xf32>
    %262 = tpu.matmul %259, %261, %cst_200 {dimension_numbers = #tpu.dot_dimension_numbers<[1], [0], [0], [1], [0, 0, 1, 1], [], []>} : vector<32x512xf32>, vector<512x64xf32>, vector<32x64xf32> -> vector<32x64xf32>
    %c0_201 = arith.constant 0 : index
    %c0_202 = arith.constant 0 : index
    %263 = vector.load %arg8[%c0_201, %c0_202] : memref<1x64xf32, #tpu.memory_space<vmem>>, vector<1x64xf32>
    %264 = vector.broadcast %263 : vector<1x64xf32> to vector<32x64xf32>
    %265 = arith.mulf %264, %62 : vector<32x64xf32>
    %266 = arith.addf %262, %265 : vector<32x64xf32>
    %267 = arith.negf %5 : vector<32x64xf32>
    %268 = math.exp %267 : vector<32x64xf32>
    %cst_203 = arith.constant 1.000000e+00 : f32
    %269 = vector.broadcast %cst_203 : f32 to vector<32x64xf32>
    %270 = arith.addf %269, %268 : vector<32x64xf32>
    %271 = arith.divf %269, %270 : vector<32x64xf32>
    %272 = arith.mulf %5, %271 : vector<32x64xf32>
    %273 = arith.mulf %266, %272 : vector<32x64xf32>
    %c0_204 = arith.constant 0 : index
    %c0_205 = arith.constant 0 : index
    %274 = vector.load %arg9[%c0_204, %c0_205] : memref<64x128xf32, #tpu.memory_space<vmem>>, vector<64x128xf32>
    %cst_206 = arith.constant dense<0.000000e+00> : vector<32x128xf32>
    %275 = tpu.matmul %273, %274, %cst_206 {dimension_numbers = #tpu.dot_dimension_numbers<[1], [0], [0], [1], [0, 0, 1, 1], [], []>} : vector<32x64xf32>, vector<64x128xf32>, vector<32x128xf32> -> vector<32x128xf32>
    %276 = vector.shape_cast %275 : vector<32x128xf32> to vector<2x16x128xf32>
    %c0_207 = arith.constant 0 : index
    %c0_208 = arith.constant 0 : index
    %c0_209 = arith.constant 0 : index
    %277 = vector.load %arg14[%c0_207, %c0_208, %c0_209] : memref<2x16x128xf32, #tpu.memory_space<vmem>>, vector<2x16x128xf32>
    tpu.vector_store %arg14[%c0_207, %c0_208, %c0_209], %276 {strides = array<i32>} : memref<2x16x128xf32, #tpu.memory_space<vmem>>, vector<2x16x128xf32>,
    return
  }
  func.func @transform_0(%arg0: i32) -> (i32, i32, i32) {
    %c0_i32 = arith.constant 0 : i32
    %c0_i32_0 = arith.constant 0 : i32
    %c0_i32_1 = arith.constant 0 : i32
    return %arg0, %c0_i32, %c0_i32_0 : i32, i32, i32
  }
  func.func @transform_1(%arg0: i32) -> (i32, i32) {
    %c0_i32 = arith.constant 0 : i32
    %c0_i32_0 = arith.constant 0 : i32
    %c0_i32_1 = arith.constant 0 : i32
    return %c0_i32, %c0_i32_0 : i32, i32
  }
  func.func @transform_2(%arg0: i32) -> (i32, i32) {
    %c0_i32 = arith.constant 0 : i32
    %c0_i32_0 = arith.constant 0 : i32
    %c0_i32_1 = arith.constant 0 : i32
    return %c0_i32, %c0_i32_0 : i32, i32
  }
  func.func @transform_3(%arg0: i32) -> (i32, i32) {
    %c0_i32 = arith.constant 0 : i32
    %c0_i32_0 = arith.constant 0 : i32
    %c0_i32_1 = arith.constant 0 : i32
    return %c0_i32, %c0_i32_0 : i32, i32
  }
  func.func @transform_4(%arg0: i32) -> (i32, i32) {
    %c0_i32 = arith.constant 0 : i32
    %c0_i32_0 = arith.constant 0 : i32
    %c0_i32_1 = arith.constant 0 : i32
    return %c0_i32, %c0_i32_0 : i32, i32
  }
  func.func @transform_5(%arg0: i32) -> (i32, i32) {
    %c0_i32 = arith.constant 0 : i32
    %c0_i32_0 = arith.constant 0 : i32
    %c0_i32_1 = arith.constant 0 : i32
    return %c0_i32, %c0_i32_0 : i32, i32
  }
  func.func @transform_6(%arg0: i32) -> (i32, i32) {
    %c0_i32 = arith.constant 0 : i32
    %c0_i32_0 = arith.constant 0 : i32
    %c0_i32_1 = arith.constant 0 : i32
    return %c0_i32, %c0_i32_0 : i32, i32
  }
  func.func @transform_7(%arg0: i32) -> (i32, i32) {
    %c0_i32 = arith.constant 0 : i32
    %c0_i32_0 = arith.constant 0 : i32
    %c0_i32_1 = arith.constant 0 : i32
    return %c0_i32, %c0_i32_0 : i32, i32
  }
  func.func @transform_8(%arg0: i32) -> (i32, i32) {
    %c0_i32 = arith.constant 0 : i32
    %c0_i32_0 = arith.constant 0 : i32
    %c0_i32_1 = arith.constant 0 : i32
    return %c0_i32, %c0_i32_0 : i32, i32
  }
  func.func @transform_9(%arg0: i32) -> (i32, i32) {
    %c0_i32 = arith.constant 0 : i32
    %c0_i32_0 = arith.constant 0 : i32
    %c0_i32_1 = arith.constant 0 : i32
    return %c0_i32, %c0_i32_0 : i32, i32
  }
  func.func @transform_10(%arg0: i32) -> (i32, i32) {
    %c0_i32 = arith.constant 0 : i32
    %c0_i32_0 = arith.constant 0 : i32
    %c0_i32_1 = arith.constant 0 : i32
    return %c0_i32, %c0_i32_0 : i32, i32
  }
  func.func @transform_11(%arg0: i32) -> (i32, i32) {
    %c0_i32 = arith.constant 0 : i32
    %c0_i32_0 = arith.constant 0 : i32
    %c0_i32_1 = arith.constant 0 : i32
    return %c0_i32, %c0_i32_0 : i32, i32
  }
  func.func @transform_12(%arg0: i32) -> (i32, i32) {
    %c0_i32 = arith.constant 0 : i32
    %c0_i32_0 = arith.constant 0 : i32
    %c0_i32_1 = arith.constant 0 : i32
    return %c0_i32, %c0_i32_0 : i32, i32
  }
  func.func @transform_13(%arg0: i32) -> (i32, i32, i32) {
    %c0_i32 = arith.constant 0 : i32
    %c0_i32_0 = arith.constant 0 : i32
    %c0_i32_1 = arith.constant 0 : i32
    return %arg0, %c0_i32, %c0_i32_0 : i32, i32, i32
  }
}

</mosaic_0001>

<bundles_post_ra>
// kernel: tpu_custom_call.1
= control target key start
LH: loop header
LB: loop body
LE: loop exit
PB: predicated region body
PF: predicated region fallthrough
CT: control target
= control target key end

     0   :  { %s6185_s0 = inlined_call_operand.vmem [shape: f32[2,16,32], index: 0, kind: input, shape index: {}]   ;;  %s6186_s1 = inlined_call_operand.vmem [shape: f32[32,128], index: 1, kind: input, shape index: {}]   ;;  %s6187_s2 = inlined_call_operand.vmem [shape: f32[4,64], index: 2, kind: input, shape index: {}]   ;;  %s6188_s3 = inlined_call_operand.vmem [shape: f32[1,64], index: 3, kind: input, shape index: {}]   ;;  %s6189_s4 = inlined_call_operand.vmem [shape: f32[64,128], index: 4, kind: input, shape index: {}]   ;;  %s6190_s5 = inlined_call_operand.vmem [shape: f32[1,64], index: 5, kind: input, shape index: {}]   ;;  %s6191_s6 = inlined_call_operand.vmem [shape: f32[512,64], index: 6, kind: input, shape index: {}]   ;;  %s6192_s7 = inlined_call_operand.vmem [shape: f32[1,64], index: 7, kind: input, shape index: {}]   ;;  %s6193_s8 = inlined_call_operand.vmem [shape: f32[64,128], index: 8, kind: input, shape index: {}]   ;;  %s6194_s9 = inlined_call_operand.vmem [shape: f32[512,32], index: 9, kind: input, shape index: {}]   ;;  %s6195_s10 = inlined_call_operand.vmem [shape: f32[512,32], index: 10, kind: input, shape index: {}]   ;;  %s6196_s11 = inlined_call_operand.vmem [shape: f32[32,512], index: 11, kind: input, shape index: {}]   ;;  %s6197_s12 = inlined_call_operand.vmem [shape: f32[32,128], index: 12, kind: input, shape index: {}]   ;;  %s6198_s13 = inlined_call_operand.hbm [shape: f32[2,16,128], index: 13, kind: output, shape index: {}]  }
   0x1   :  { %v52_v0 = vld [vmem:[%s6186_s1 + $0x18] sm:$0xff]  ;;  %v51_v1 = vld [vmem:[%s6186_s1 + $0x10] sm:$0xff]  ;;  %v50_v2 = vld [vmem:[%s6186_s1 + $0x8] sm:$0xff] }
   0x2   :  { %78 = vmatpush.msra.mxu0 %v52_v0  ;;  %3600 = vmatpush.msra.mxu1 %v52_v0 }
   0x4   :  { %79 = vmatpush.msra.mxu0 %v51_v1  ;;  %3601 = vmatpush.msra.mxu1 %v51_v1 }
   0x5   :  { %18 = vsyncpa [#allocation6], 0  ;;  %v49_v3 = vld [vmem:[%s6186_s1] sm:$0xff]  ;;  %vm53_vm0 = vcmask 261120   ;;  %v46_v5 = vld [vmem:[%s6185_s0 + $0x8] sm:$0xff]  ;;  %vm102_vm1 = vcmask 1042432  }
   0x6   :  { %80 = vmatpush.msra.mxu0 %v50_v2  ;;  %3602 = vmatpush.msra.mxu1 %v50_v2  ;;  %v45_v4 = vld [vmem:[%s6185_s0] sm:$0xff]  ;;  %v47_v6 = vld [vmem:[%s6185_s0 + $0x10] sm:$0xff]  ;;  %v48_v7 = vld [vmem:[%s6185_s0 + $0x18] sm:$0xff]  ;;  %vm122_vm2 = vcmask 1046528   ;;  %vm139_vm3 = vcmask 1045504   ;;  %vm156_vm4 = vcmask 1044480  }
   0x7   :  { %v95_v8 = vld [vmem:[%s6187_s2] sm:$0xf]  ;;  %v311_v9 = vld [vmem:[%s6189_s4 + $0x38] sm:$0xff]  ;;  %v310_v10 = vld [vmem:[%s6189_s4 + $0x30] sm:$0xff]  ;;  %vm312_vm10 = vcmask 523264   ;;  %s3376_s18 = sshll.u32 %s6198_s13, 4  ;;  %s3377_s18 = int_to_ptr.hbm [resolvable:$true] %s3376_s18 }
   0x8   :  { %81 = vmatpush.msra.mxu0 %v49_v3  ;;  %3603 = vmatpush.msra.mxu1 %v49_v3  ;;  %v309_v11 = vld [vmem:[%s6189_s4 + $0x28] sm:$0xff]  ;;  %v3967_v12 = vperm.slane %v95_v8, 1  ;;  %v3971_v14 = vperm.slane %v95_v8, 0  ;;  %v3973_v15 = vperm.slane %v95_v8, 2  ;;  %v308_v17 = vld [vmem:[%s6189_s4 + $0x20] sm:$0xff]  ;;  %v3981_v19 = vperm.slane %v95_v8, 3 }
   0x9   :  { %3388 = vmatmul.msk.f32.vlgmr.msra.gmra.mxu0 %vm53_vm0, %v45_v4  ;;  %3389 = vmatmul.msk.f32.vlgmr.msra.gmra.mxu1 %vm53_vm0, %v46_v5  ;;  %v3987_v21 = vld [vmem:[%s6188_s3] ss:$0 sm:$0xff]  ;;  %v307_v22 = vld [vmem:[%s6189_s4 + $0x18] sm:$0xff]  ;;  %v306_v29 = vld [vmem:[%s6189_s4 + $0x10] sm:$0xff]  ;;  %s3855_s3 = smov 128   ;;  %s3856_s19 = smov 8  }
   0xa   :  { %333 = vmatpush.msrb.mxu1 %v311_v9  ;;  %v305_v36 = vld [vmem:[%s6189_s4 + $0x8] sm:$0xff]  ;;  %v304_v43 = vld [vmem:[%s6189_s4] sm:$0xff] }
   0xc   :  { %334 = vmatpush.msrb.mxu1 %v310_v10 }
   0xe   :  { %335 = vmatpush.msrb.mxu1 %v309_v11 }
  0x10   :  { %336 = vmatpush.msrb.mxu1 %v308_v17 }
  0x11   :  { %3390 = vmatmul.msk.f32.gmra.mxu1 %vm53_vm0, %v47_v6 }
  0x12   :  { %337 = vmatpush.msrb.mxu1 %v307_v22 }
  0x14   :  { %338 = vmatpush.msrb.mxu1 %v306_v29 }
  0x16   :  { %339 = vmatpush.msrb.mxu1 %v305_v36 }
  0x18   :  { %340 = vmatpush.msrb.mxu1 %v304_v43 }
  0x19   :  { %3391 = vmatmul.msk.f32.gmra.mxu1 %vm53_vm0, %v48_v7 }
  0x86   :  { %v3969_v13 = vpop.f32.mrf.mxu0  ;;  %v3975_v16 = vpop.f32.mrf.mxu1 }
  0x87   :  { %6230 = vst [vmem:[#allocation8_spill] sm:$0xff] %v3969_v13  ;;  %v103_v18 = vrot.slane %v3969_v13, 5  ;;  %v104_v20 = vrot.slane %v3975_v16, 5 }
  0x88   :  { %6231 = vst [vmem:[#allocation9_spill] sm:$0xff] %v3975_v16 }
  0x89   :  { %v109_v23 = vsel %vm102_vm1, 0.0, %v103_v18  ;;  %v105_v24 = vsel %vm102_vm1, %v103_v18, %v104_v20  ;;  %v118_v25 = vmul.f32 %v3967_v12, %v104_v20  ;;  %v135_v35 = vmul.f32 %v3973_v15, %v104_v20 }
  0x8a   :  { %v111_v26 = vmul.f32 %v3971_v14, %v109_v23  ;;  %v116_v27 = vmul.f32 %v3967_v12, %v109_v23  ;;  %v133_v28 = vmul.f32 %v3973_v15, %v109_v23  ;;  %v150_v30 = vmul.f32 %v3981_v19, %v109_v23 }
  0x8b   :  { %v117_v31 = vmul.f32 %v3967_v12, %v105_v24  ;;  %v126_v34 = vrot.slane %v118_v25, 1  ;;  %v134_v38 = vmul.f32 %v3973_v15, %v105_v24  ;;  %v151_v39 = vmul.f32 %v3981_v19, %v105_v24 }
  0x8c   :  { %v113_v32 = vadd.f32 %v3987_v21, %v111_v26  ;;  %v123_v33 = vrot.slane %v116_v27, 1  ;;  %v112_v40 = vmul.f32 %v3971_v14, %v105_v24  ;;  %v140_v41 = vrot.slane %v133_v28, 2 }
  0x8d   :  { %v124_v37 = vrot.slane %v117_v31, 1  ;;  %v141_v46 = vrot.slane %v134_v38, 2  ;;  %v157_v47 = vrot.slane %v150_v30, 3  ;;  %v158_v49 = vrot.slane %v151_v39, 3 }
  0x8e   :  { %v4011_v42 = vpop.f32.mrf.mxu1  ;;  %v114_v50 = vadd.f32 %v3987_v21, %v112_v40  ;;  %v143_v52 = vrot.slane %v135_v35, 2  ;;  %v152_v53 = vmul.f32 %v3981_v19, %v104_v20 }
  0x8f   :  { %6232 = vst [vmem:[#allocation10_spill] sm:$0xff] %v4011_v42  ;;  %v168_v44 = vrot.slane %v4011_v42, 5  ;;  %v125_v45 = vsel %vm122_vm2, %v123_v33, %v124_v37  ;;  %v127_v51 = vsel %vm122_vm2, %v124_v37, %v126_v34  ;;  %v142_v54 = vsel %vm139_vm3, %v140_v41, %v141_v46 }
  0x90   :  { %v130_v48 = vadd.f32 %v125_v45, %v113_v32  ;;  %v159_v57 = vsel %vm156_vm4, %v157_v47, %v158_v49  ;;  %v131_v58 = vadd.f32 %v127_v51, %v114_v50  ;;  %v144_v60 = vsel %vm139_vm3, %v141_v46, %v143_v52 }
  0x91   :  { %v174_v55 = vsel %vm102_vm1, 0.0, %v168_v44  ;;  %v160_v61 = vrot.slane %v152_v53, 3 }
  0x92   :  { %v147_v56 = vadd.f32 %v142_v54, %v130_v48  ;;  %v179_v62 = vmul.f32 %v174_v55, %v3967_v12  ;;  %v148_v0 = vadd.f32 %v144_v60, %v131_v58  ;;  %v175_v4 = vmul.f32 %v174_v55, %v3971_v14 }
  0x93   :  { %v161_v3 = vsel %vm156_vm4, %v158_v49, %v160_v61  ;;  %v194_v5 = vmul.f32 %v174_v55, %v3973_v15  ;;  %v209_v7 = vmul.f32 %v174_v55, %v3981_v19 }
  0x94   :  { %v4024_v59 = vadd.f32 %v159_v57, %v147_v56  ;;  %v4035_v6 = vadd.f32 %v161_v3, %v148_v0  ;;  %v185_v11 = vrot.slane %v179_v62, 1  ;;  %v177_v28 = vadd.f32 %v3987_v21, %v175_v4 }
  0x95   :  { %v200_v31 = vrot.slane %v194_v5, 2  ;;  %v215_v36 = vrot.slane %v209_v7, 3 }
  0x96   :  { %v4028_v63 = vpop.f32.mrf.mxu1  ;;  %v3392_v2 = vmul.f32 -1.442695, %v4024_v59  ;;  %v3393_v17 = vmul.f32 -1.442695, %v4035_v6 }
  0x97   :  { %6233 = vst [vmem:[#allocation11_spill] sm:$0xff] %v4028_v63  ;;  %v169_v1 = vrot.slane %v4028_v63, 5 }
  0x98   :  { %3651 = vpow2.f32 %v3392_v2 }
  0x99   :  { %v170_v8 = vsel %vm102_vm1, %v168_v44, %v169_v1  ;;  %v181_v9 = vmul.f32 %v169_v1, %v3967_v12  ;;  %v196_v10 = vmul.f32 %v169_v1, %v3973_v15  ;;  %3653 = vpow2.f32 %v3393_v17 }
  0x9a   :  { %v180_v18 = vmul.f32 %v170_v8, %v3967_v12  ;;  %v195_v20 = vmul.f32 %v170_v8, %v3973_v15  ;;  %v210_v23 = vmul.f32 %v170_v8, %v3981_v19  ;;  %v176_v24 = vmul.f32 %v170_v8, %v3971_v14 }
  0x9b   :  { %v188_v22 = vrot.slane %v181_v9, 1  ;;  %v203_v27 = vrot.slane %v196_v10, 2  ;;  %v211_v30 = vmul.f32 %v169_v1, %v3981_v19 }
  0x9c   :  { %v186_v25 = vrot.slane %v180_v18, 1  ;;  %v201_v26 = vrot.slane %v195_v20, 2  ;;  %v178_v29 = vadd.f32 %v3987_v21, %v176_v24  ;;  %v216_v15 = vrot.slane %v210_v23, 3 }
  0x9d   :  { %v218_v35 = vrot.slane %v211_v30, 3 }
  0x9e   :  { %v187_v12 = vsel %vm122_vm2, %v185_v11, %v186_v25  ;;  %v189_v32 = vsel %vm122_vm2, %v186_v25, %v188_v22  ;;  %v202_v14 = vsel %vm139_vm3, %v200_v31, %v201_v26  ;;  %v204_v37 = vsel %vm139_vm3, %v201_v26, %v203_v27  ;;  %v3652_v38 = vpop.eup %3651 }
  0x9f   :  { %v192_v33 = vadd.f32 %v187_v12, %v177_v28  ;;  %v193_v34 = vadd.f32 %v189_v32, %v178_v29  ;;  %v3654_v21 = vpop.eup %3653  ;;  %v236_v41 = vadd.f32 1.0, %v3652_v38  ;;  %v217_v19 = vsel %vm156_vm4, %v215_v36, %v216_v15 }
  0xa0   :  { %v219_v43 = vsel %vm156_vm4, %v216_v15, %v218_v35  ;;  %v237_v44 = vadd.f32 1.0, %v3654_v21 }
  0xa1   :  { %v207_v39 = vadd.f32 %v202_v14, %v192_v33  ;;  %v208_v40 = vadd.f32 %v204_v37, %v193_v34  ;;  %3655 = vrcp.f32 %v236_v41  ;;  %v251_v55 = vand.u32 2147483648, %v236_v41 }
  0xa2   :  { %3657 = vrcp.f32 %v237_v44  ;;  %v249_v60 = vand.u32 2147483647, %v236_v41  ;;  %vm245_vm6 = vweird.f32 %v236_v41  ;;  %v266_v7 = vand.u32 2147483648, %v237_v44 }
  0xa3   :  { %v4055_v45 = vadd.f32 %v217_v19, %v207_v39  ;;  %v4057_v46 = vadd.f32 %v219_v43, %v208_v40  ;;  %v252_v2 = vor.u32 1.1754944e-38, %v251_v55  ;;  %vm260_vm11 = vweird.f32 %v237_v44  ;;  %v3649_v39 = vld [vmem:[%s6190_s5] ss:$0 sm:$0xff]  ;;  %s3853_s5 = smov 64  }
  0xa4   :  { %vm250_vm8 = vcmp.eq.f32.partialorder %v249_v60, 8.507059e+37  ;;  %v264_v9 = vand.u32 2147483647, %v237_v44  ;;  %v267_v18 = vor.u32 1.1754944e-38, %v266_v7 }
  0xa5   :  { %v3394_v47 = vmul.f32 -1.442695, %v4055_v45  ;;  %v3395_v48 = vmul.f32 -1.442695, %v4057_v46 }
  0xa6   :  { %vm265_vm13 = vcmp.eq.f32.partialorder %v264_v9, 8.507059e+37 }
  0xa7   :  { %3659 = vpow2.f32 %v3394_v47  ;;  %v3656_v49 = vpop.eup %3655 }
  0xa8   :  { %3661 = vpow2.f32 %v3395_v48  ;;  %v3658_v50 = vpop.eup %3657  ;;  %v241_v51 = vmul.f32 %v3656_v49, %v236_v41  ;;  %vm246_vm5 = vweird.f32 %v3656_v49 }
  0xa9   :  { %v256_v52 = vmul.f32 %v3658_v50, %v237_v44  ;;  %vm247_vm7 = vmor %vm245_vm6, %vm246_vm5  ;;  %vm261_vm9 = vweird.f32 %v3658_v50 }
  0xaa   :  { %v242_v53 = vsub.f32 1.0, %v241_v51  ;;  %vm262_vm12 = vmor %vm260_vm11, %vm261_vm9 }
  0xab   :  { %v257_v56 = vsub.f32 1.0, %v256_v52 }
  0xac   :  { %v243_v58 = vmul.f32 %v3656_v49, %v242_v53 }
  0xad   :  { %v3660_v54 = vpop.eup %3659  ;;  %v258_v62 = vmul.f32 %v3658_v50, %v257_v56 }
  0xae   :  { %v3662_v57 = vpop.eup %3661  ;;  %v238_v61 = vadd.f32 1.0, %v3660_v54  ;;  %v244_v1 = vadd.f32 %v3656_v49, %v243_v58 }
  0xaf   :  { %v239_v0 = vadd.f32 1.0, %v3662_v57  ;;  %v259_v4 = vadd.f32 %v3658_v50, %v258_v62 }
  0xb0   :  { %3663 = vrcp.f32 %v238_v61  ;;  %v248_v3 = vsel %vm247_vm7, %v3656_v49, %v244_v1  ;;  %v281_v25 = vand.u32 2147483648, %v238_v61  ;;  %vm275_vm15 = vweird.f32 %v238_v61 }
  0xb1   :  { %3665 = vrcp.f32 %v239_v0  ;;  %v253_v5 = vsel %vm250_vm8, %v252_v2, %v248_v3  ;;  %v263_v11 = vsel %vm262_vm12, %v3658_v50, %v259_v4  ;;  %v296_v34 = vand.u32 2147483648, %v239_v0 }
  0xb2   :  { %v4062_v8 = vmul.f32 %v253_v5, %v4024_v59  ;;  %v268_v23 = vsel %vm265_vm13, %v267_v18, %v263_v11  ;;  %v279_v59 = vand.u32 2147483647, %v238_v61  ;;  %v282_v30 = vor.u32 1.1754944e-38, %v281_v25 }
  0xb3   :  { %v4067_v28 = vmul.f32 %v268_v23, %v4035_v6  ;;  %vm290_vm4 = vweird.f32 %v239_v0  ;;  %v294_v6 = vand.u32 2147483647, %v239_v0  ;;  %v297_v14 = vor.u32 1.1754944e-38, %v296_v34 }
  0xb4   :  { %6234 = vst [vmem:[#allocation12_spill] sm:$0xff] %v4062_v8  ;;  %3396 = vmatmul.msk.f32.vlgmr.msrb.gmra.mxu1 %vm312_vm10, %v4062_v8  ;;  %vm280_vm2 = vcmp.eq.f32.partialorder %v279_v59, 8.507059e+37 }
  0xb5   :  { %6235 = vst [vmem:[#allocation13_spill] sm:$0xff] %v4067_v28  ;;  %vm295_vm6 = vcmp.eq.f32.partialorder %v294_v6, 8.507059e+37 }
  0xb6   :  { %v3664_v10 = vpop.eup %3663 }
  0xb7   :  { %v3666_v17 = vpop.eup %3665  ;;  %v271_v20 = vmul.f32 %v3664_v10, %v238_v61  ;;  %vm276_vm14 = vweird.f32 %v3664_v10 }
  0xb8   :  { %v286_v22 = vmul.f32 %v3666_v17, %v239_v0  ;;  %vm277_vm1 = vmor %vm275_vm15, %vm276_vm14  ;;  %vm291_vm3 = vweird.f32 %v3666_v17 }
  0xb9   :  { %v272_v24 = vsub.f32 1.0, %v271_v20  ;;  %vm292_vm5 = vmor %vm290_vm4, %vm291_vm3 }
  0xba   :  { %v287_v26 = vsub.f32 1.0, %v286_v22 }
  0xbb   :  { %v273_v27 = vmul.f32 %v3664_v10, %v272_v24 }
  0xbc   :  { %3397 = vmatmul.msk.f32.gmra.mxu1 %vm312_vm10, %v4067_v28  ;;  %v288_v31 = vmul.f32 %v3666_v17, %v287_v26 }
  0xbd   :  { %v274_v29 = vadd.f32 %v3664_v10, %v273_v27 }
  0xbe   :  { %v289_v33 = vadd.f32 %v3666_v17, %v288_v31 }
  0xbf   :  { %v278_v12 = vsel %vm277_vm1, %v3664_v10, %v274_v29 }
  0xc0   :  { %v283_v15 = vsel %vm280_vm2, %v282_v30, %v278_v12  ;;  %v293_v35 = vsel %vm292_vm5, %v3666_v17, %v289_v33 }
  0xc1   :  { %v4072_v32 = vmul.f32 %v283_v15, %v4055_v45  ;;  %v298_v36 = vsel %vm295_vm6, %v297_v14, %v293_v35 }
  0xc2   :  { %v4077_v37 = vmul.f32 %v298_v36, %v4057_v46 }
  0xc3   :  { %6236 = vst [vmem:[#allocation14_spill] sm:$0xff] %v4072_v32 }
  0xc4   :  { %3398 = vmatmul.msk.f32.gmra.mxu1 %vm312_vm10, %v4072_v32  ;;  %6237 = vst [vmem:[#allocation15_spill] sm:$0xff] %v4077_v37 }
  0xcc   :  { %3399 = vmatmul.msk.f32.gmra.mxu1 %vm312_vm10, %v4077_v37 }
 0x131   :  { %v342_v38 = vpop.f32.mrf.mxu1 }
 0x132   :  { %v4086_v41 = vadd.f32 %v3649_v39, %v342_v38 }
 0x134   :  { %v366_v43 = vand.u32 2147483647, %v4086_v41 }
 0x136   :  { %v370_v48 = vsub.f32 0.0, %v366_v43 }
 0x138   :  { %v374_v52 = vmul.f32 1.442695, %v370_v48 }
 0x139   :  { %v345_v40 = vpop.f32.mrf.mxu1 }
 0x13a   :  { %v4084_v21 = vadd.f32 %v3649_v39, %v345_v40  ;;  %v3643_v0 = vpack.i.bf16 %v342_v38, %v345_v40 }
 0x13c   :  { %v367_v19 = vand.u32 2147483647, %v4084_v21 }
 0x13e   :  { %v371_v46 = vsub.f32 0.0, %v367_v19 }
 0x140   :  { %v376_v50 = vmul.f32 1.442695, %v371_v46  ;;  %v363_v46 = vmax.f32 %v4084_v21, 0.0 }
 0x141   :  { %v348_v44 = vpop.f32.mrf.mxu1 }
 0x142   :  { %v360_v45 = vadd.f32 %v3649_v39, %v348_v44 }
 0x144   :  { %v368_v47 = vand.u32 2147483647, %v360_v45  ;;  %v364_v12 = vmax.f32 %v360_v45, 0.0 }
 0x146   :  { %v372_v49 = vsub.f32 0.0, %v368_v47 }
 0x148   :  { %v378_v51 = vmul.f32 1.442695, %v372_v49  ;;  %v362_v49 = vmax.f32 %v4086_v41, 0.0 }
 0x149   :  { %v351_v53 = vpop.f32.mrf.mxu1 }
 0x14a   :  { %3667 = vpow2.f32 %v378_v51  ;;  %v361_v54 = vadd.f32 %v3649_v39, %v351_v53  ;;  %v3638_v55 = vpack.i.bf16 %v348_v44, %v351_v53 }
 0x14b   :  { %3669 = vpow2.f32 %v376_v50 }
 0x14c   :  { %v369_v56 = vand.u32 2147483647, %v361_v54  ;;  %3639 = vrot.lane.b32.xlu1 %v3638_v55, %s3853_s5  ;;  %3671 = vpow2.f32 %v374_v52  ;;  %v365_v14 = vmax.f32 %v361_v54, 0.0 }
 0x14e   :  { %v373_v57 = vsub.f32 0.0, %v369_v56 }
 0x150   :  { %v3668_v58 = vpop.eup %3667  ;;  %v380_v60 = vmul.f32 1.442695, %v373_v57 }
 0x151   :  { %v400_v61 = vadd.f32 1.0, %v3668_v58  ;;  %v3670_v62 = vpop.eup %3669  ;;  %v403_v4 = vmul.f32 -0.5, %v3668_v58  ;;  %v406_v17 = vand.u32 2147483647, %v3668_v58 }
 0x152   :  { %3673 = vpow2.f32 %v380_v60  ;;  %v3672_v1 = vpop.eup %3671  ;;  %v391_v2 = vadd.f32 1.0, %v3670_v62  ;;  %v394_v18 = vmul.f32 -0.5, %v3670_v62  ;;  %v397_v31 = vand.u32 2147483647, %v3670_v62 }
 0x153   :  { %3675 = vlog2.f32 %v400_v61  ;;  %v382_v3 = vadd.f32 1.0, %v3672_v1  ;;  %v404_v10 = vadd.f32 1.0, %v403_v4  ;;  %v385_v22 = vmul.f32 -0.5, %v3672_v1  ;;  %v431_v61 = vld [vmem:[%s6194_s9 + $0x48] sm:$0xff] }
 0x154   :  { %3644 = vrot.lane.b32.xlu1 %v3643_v0, %s3853_s5  ;;  %3677 = vlog2.f32 %v391_v2  ;;  %vm407_vm7 = vcmp.lt.f32.partialorder %v406_v17, 0.0004427343  ;;  %v395_v59 = vadd.f32 1.0, %v394_v18  ;;  %v388_v35 = vand.u32 2147483647, %v3672_v1  ;;  %v433_v0 = vld [vmem:[%s6194_s9 + $0x58] sm:$0xff] }
 0x155   :  { %3679 = vlog2.f32 %v382_v3  ;;  %v405_v23 = vmul.f32 %v3668_v58, %v404_v10  ;;  %v386_v15 = vadd.f32 1.0, %v385_v22  ;;  %vm398_vm9 = vcmp.lt.f32.partialorder %v397_v31, 0.0004427343  ;;  %v422_v18 = vld [vmem:[%s6194_s9] sm:$0xff]  ;;  %v423_v22 = vld [vmem:[%s6194_s9 + $0x8] sm:$0xff] }
 0x156   :  { %v396_v39 = vmul.f32 %v3670_v62, %v395_v59  ;;  %vm389_vm11 = vcmp.lt.f32.partialorder %v388_v35, 0.0004427343  ;;  %v432_v62 = vld [vmem:[%s6194_s9 + $0x50] sm:$0xff]  ;;  %v426_v59 = vld [vmem:[%s6194_s9 + $0x20] sm:$0xff]  ;;  %v439_v31 = vld [vmem:[%s6194_s9 + $0x88] sm:$0xff] }
 0x157   :  { %v387_v43 = vmul.f32 %v3672_v1, %v386_v15  ;;  %v440_v15 = vld [vmem:[%s6194_s9 + $0x90] sm:$0xff]  ;;  %v442_v35 = vld [vmem:[%s6194_s9 + $0xa0] sm:$0xff] }
 0x158   :  { %v3674_v5 = vpop.eup %3673 }
 0x159   :  { %v3676_v7 = vpop.eup %3675  ;;  %v409_v9 = vadd.f32 1.0, %v3674_v5  ;;  %v412_v11 = vmul.f32 -0.5, %v3674_v5  ;;  %v415_v26 = vand.u32 2147483647, %v3674_v5 }
 0x15a   :  { %v402_v20 = vmul.f32 0.6931472, %v3676_v7  ;;  %v3678_v25 = vpop.eup %3677 }
 0x15b   :  { %3681 = vlog2.f32 %v409_v9  ;;  %v413_v24 = vadd.f32 1.0, %v412_v11  ;;  %v3680_v27 = vpop.eup %3679  ;;  %v393_v33 = vmul.f32 0.6931472, %v3678_v25  ;;  %vm416_vm8 = vcmp.lt.f32.partialorder %v415_v26, 0.0004427343  ;;  %v436_v25 = vld [vmem:[%s6194_s9 + $0x70] sm:$0xff] }
 0x15c   :  { %v408_v29 = vsel %vm407_vm7, %v405_v23, %v402_v20  ;;  %v384_v38 = vmul.f32 0.6931472, %v3680_v27  ;;  %v435_v23 = vld [vmem:[%s6194_s9 + $0x68] sm:$0xff]  ;;  %v425_v26 = vld [vmem:[%s6194_s9 + $0x18] sm:$0xff] }
 0x15d   :  { %v414_v6 = vmul.f32 %v3674_v5, %v413_v24  ;;  %v420_v36 = vadd.f32 %v408_v29, %v364_v12  ;;  %v399_v44 = vsel %vm398_vm9, %v396_v39, %v393_v33  ;;  %v434_v5 = vld [vmem:[%s6194_s9 + $0x60] sm:$0xff]  ;;  %v424_v24 = vld [vmem:[%s6194_s9 + $0x10] sm:$0xff]  ;;  %v437_v27 = vld [vmem:[%s6194_s9 + $0x78] sm:$0xff] }
 0x15e   :  { %v390_v48 = vsel %vm389_vm11, %v387_v43, %v384_v38  ;;  %v419_v50 = vadd.f32 %v399_v44, %v363_v46  ;;  %v438_v29 = vld [vmem:[%s6194_s9 + $0x80] sm:$0xff]  ;;  %v428_v12 = vld [vmem:[%s6194_s9 + $0x30] sm:$0xff]  ;;  %v429_v33 = vld [vmem:[%s6194_s9 + $0x38] sm:$0xff] }
 0x15f   :  { %v488_v45 = vmul.f32 %v420_v36, %v4072_v32  ;;  %v418_v52 = vadd.f32 %v390_v48, %v362_v49  ;;  %v445_v38 = vld [vmem:[%s6194_s9 + $0xb8] sm:$0xff]  ;;  %v446_v39 = vld [vmem:[%s6194_s9 + $0xc0] sm:$0xff]  ;;  %v448_v44 = vld [vmem:[%s6194_s9 + $0xd0] sm:$0xff] }
 0x160   :  { %v487_v53 = vmul.f32 %v419_v50, %v4067_v28  ;;  %v1267_v43 = vld [vmem:[%s6197_s12 + $0x18] sm:$0xff]  ;;  %v1266_v46 = vld [vmem:[%s6197_s12 + $0x10] sm:$0xff]  ;;  %v1264_v48 = vld [vmem:[%s6197_s12] sm:$0xff] }
 0x161   :  { %v3682_v30 = vpop.eup %3681  ;;  %v486_v54 = vmul.f32 %v418_v52, %v4062_v8  ;;  %v449_v49 = vld [vmem:[%s6194_s9 + $0xd8] sm:$0xff] }
 0x162   :  { %v411_v34 = vmul.f32 0.6931472, %v3682_v30  ;;  %v427_v30 = vld [vmem:[%s6194_s9 + $0x28] sm:$0xff] }
 0x163   :  { %v3633_v55 = vpack.i.bf16 %v486_v54, %v487_v53  ;;  %v1669_v53 = vld [vmem:[%s6191_s6] sm:$0xff]  ;;  %v1670_v54 = vld [vmem:[%s6191_s6 + $0x8] sm:$0xff] }
 0x164   :  { %v417_v40 = vsel %vm416_vm8, %v414_v6, %v411_v34  ;;  %v441_v34 = vld [vmem:[%s6194_s9 + $0x98] sm:$0xff]  ;;  %v430_v6 = vld [vmem:[%s6194_s9 + $0x40] sm:$0xff] }
 0x165   :  { %v421_v19 = vadd.f32 %v417_v40, %v365_v14  ;;  %v443_v14 = vld [vmem:[%s6194_s9 + $0xa8] sm:$0xff] }
 0x166   :  { %v447_v40 = vld [vmem:[%s6194_s9 + $0xc8] sm:$0xff] }
 0x167   :  { %v489_v47 = vmul.f32 %v421_v19, %v4077_v37  ;;  %v4666_v37 = vld [vmem:[%s6194_s9 + $0x1b8] sm:$0xff] }
 0x169   :  { %v3628_v51 = vpack.i.bf16 %v488_v45, %v489_v47  ;;  %v1265_v45 = vld [vmem:[%s6197_s12 + $0x8] sm:$0xff] }
 0x16b   :  { %3629 = vrot.lane.b32.xlu0 %v3628_v51, %s3853_s5  ;;  %v450_v51 = vld [vmem:[%s6194_s9 + $0xe0] sm:$0xff] }
 0x173   :  { %3634 = vrot.lane.b32.xlu0 %v3633_v55, %s3853_s5 }
 0x1be   :  { %v3640_v21 = vpop.permute.xlu1 %3639 }
 0x1bf   :  { %v3641_v56 = vunpack.i.l.bf16 %v3640_v21  ;;  %v3642_v57 = vunpack.i.h.bf16 %v3640_v21 }
 0x1c1   :  { %3613 = vmatpush.msra.mxu3 %v3641_v56 }
 0x1c3   :  { %3615 = vmatpush.msra.mxu3 %v3642_v57 }
 0x1c6   :  { %v3645_v58 = vpop.permute.xlu1 %3644 }
 0x1c7   :  { %v3646_v60 = vunpack.i.l.bf16 %v3645_v58  ;;  %v3647_v41 = vunpack.i.h.bf16 %v3645_v58  ;;  %v451_v58 = vld [vmem:[%s6194_s9 + $0xe8] sm:$0xff] }
 0x1c9   :  { %3617 = vmatpush.msra.mxu3 %v3646_v60 }
 0x1cb   :  { %3619 = vmatpush.msra.mxu3 %v3647_v41 }
 0x1cc   :  { %3473 = vmatmul.msk.f32.vlgmr.msra.gmra.mxu3 %vm53_vm0, %v431_v61 }
 0x1d4   :  { %3474 = vmatmul.msk.f32.gmra.mxu3 %vm53_vm0, %v432_v62 }
 0x1dc   :  { %3475 = vmatmul.msk.f32.gmra.mxu3 %vm53_vm0, %v433_v0 }
 0x1dd   :  { %v3630_v1 = vpop.permute.xlu0 %3629 }
 0x1de   :  { %v3632_v2 = vunpack.i.h.bf16 %v3630_v1  ;;  %v3631_v3 = vunpack.i.l.bf16 %v3630_v1 }
 0x1e0   :  { %v509_v4 = vsel %vm312_vm10, %v421_v19, %v3631_v3  ;;  %v508_v7 = vsel %vm312_vm10, %v420_v36, %v3632_v2  ;;  %v444_v36 = vld [vmem:[%s6194_s9 + $0xb0] sm:$0xff] }
 0x1e1   :  { %714 = vmatpush.msrb.mxu0 %v509_v4  ;;  %3604 = vmatpush.msra.mxu1 %v509_v4 }
 0x1e2   :  { %3605 = vmatpush.msra.mxu2 %v509_v4 }
 0x1e3   :  { %715 = vmatpush.msrb.mxu0 %v508_v7  ;;  %3606 = vmatpush.msra.mxu1 %v508_v7 }
 0x1e4   :  { %3607 = vmatpush.msra.mxu2 %v508_v7  ;;  %3476 = vmatmul.msk.f32.gmra.mxu3 %vm53_vm0, %v434_v5 }
 0x1e5   :  { %v3635_v9 = vpop.permute.xlu0 %3634 }
 0x1e6   :  { %v3637_v10 = vunpack.i.h.bf16 %v3635_v9  ;;  %v3636_v11 = vunpack.i.l.bf16 %v3635_v9 }
 0x1e8   :  { %v507_v17 = vsel %vm312_vm10, %v419_v50, %v3636_v11  ;;  %v506_v20 = vsel %vm312_vm10, %v418_v52, %v3637_v10  ;;  %v1672_v11 = vld [vmem:[%s6191_s6 + $0x18] sm:$0xff] }
 0x1e9   :  { %716 = vmatpush.msrb.mxu0 %v507_v17  ;;  %3608 = vmatpush.msra.mxu1 %v507_v17 }
 0x1ea   :  { %3609 = vmatpush.msra.mxu2 %v507_v17 }
 0x1eb   :  { %717 = vmatpush.msrb.mxu0 %v506_v20  ;;  %3610 = vmatpush.msra.mxu1 %v506_v20 }
 0x1ec   :  { %3611 = vmatpush.msra.mxu2 %v506_v20  ;;  %3400 = vmatmul.msk.f32.vlgmr.msrb.gmra.mxu0 %vm53_vm0, %v422_v18 }
 0x1ed   :  { %3401 = vmatmul.msk.f32.vlgmr.msra.gmra.mxu1 %vm53_vm0, %v423_v22  ;;  %939 = vmatpush.msra.mxu0 %v3641_v56 }
 0x1ee   :  { %3612 = vmatpush.msrb.mxu1 %v3641_v56  ;;  %3477 = vmatmul.msk.f32.gmra.mxu3 %vm53_vm0, %v435_v23 }
 0x1ef   :  { %940 = vmatpush.msra.mxu0 %v3642_v57  ;;  %3409 = vmatmul.msk.f32.vlgmr.msra.gmra.mxu2 %vm53_vm0, %v431_v61  ;;  %v1136_v61 = vld [vmem:[%s6195_s10] sm:$0xff] }
 0x1f0   :  { %3614 = vmatpush.msrb.mxu1 %v3642_v57 }
 0x1f1   :  { %941 = vmatpush.msra.mxu0 %v3646_v60 }
 0x1f2   :  { %3616 = vmatpush.msrb.mxu1 %v3646_v60 }
 0x1f3   :  { %942 = vmatpush.msra.mxu0 %v3647_v41 }
 0x1f4   :  { %3618 = vmatpush.msrb.mxu1 %v3647_v41  ;;  %3464 = vmatmul.msk.f32.vlgmr.msra.gmra.mxu0 %vm53_vm0, %v422_v18 }
 0x1f5   :  { %3402 = vmatmul.msk.f32.gmra.mxu1 %vm53_vm0, %v424_v24  ;;  %1472 = vmatpush.msrb.mxu0 %v1267_v43 }
 0x1f6   :  { %3478 = vmatmul.msk.f32.gmra.mxu3 %vm53_vm0, %v436_v25  ;;  %3620 = vmatpush.msra.mxu1 %v1267_v43  ;;  %v4357_v43 = vld [vmem:[%s6194_s9 + $0x110] sm:$0xff] }
 0x1f7   :  { %3410 = vmatmul.msk.f32.gmra.mxu2 %vm53_vm0, %v432_v62  ;;  %1473 = vmatpush.msrb.mxu0 %v1266_v46  ;;  %v1671_v62 = vld [vmem:[%s6191_s6 + $0x10] sm:$0xff] }
 0x1f8   :  { %3621 = vmatpush.msra.mxu1 %v1266_v46 }
 0x1f9   :  { %1474 = vmatpush.msrb.mxu0 %v1265_v45 }
 0x1fa   :  { %3622 = vmatpush.msra.mxu1 %v1265_v45  ;;  %v1676_v45 = vld [vmem:[%s6191_s6 + $0x38] sm:$0xff] }
 0x1fb   :  { %1475 = vmatpush.msrb.mxu0 %v1264_v48 }
 0x1fc   :  { %3623 = vmatpush.msra.mxu1 %v1264_v48 }
 0x1fd   :  { %3403 = vmatmul.msk.f32.gmra.mxu1 %vm53_vm0, %v425_v26 }
 0x1fe   :  { %3479 = vmatmul.msk.f32.gmra.mxu3 %vm53_vm0, %v437_v27 }
 0x1ff   :  { %3411 = vmatmul.msk.f32.gmra.mxu2 %vm53_vm0, %v433_v0 }
 0x205   :  { %3404 = vmatmul.msk.f32.gmra.mxu1 %vm53_vm0, %v426_v59 }
 0x206   :  { %3480 = vmatmul.msk.f32.gmra.mxu3 %vm53_vm0, %v438_v29 }
 0x207   :  { %3412 = vmatmul.msk.f32.gmra.mxu2 %vm53_vm0, %v434_v5  ;;  %v452_v5 = vld [vmem:[%s6194_s9 + $0xf0] sm:$0xff] }
 0x20d   :  { %3405 = vmatmul.msk.f32.gmra.mxu1 %vm53_vm0, %v427_v30 }
 0x20e   :  { %3481 = vmatmul.msk.f32.gmra.mxu3 %vm53_vm0, %v439_v31 }
 0x20f   :  { %3413 = vmatmul.msk.f32.gmra.mxu2 %vm53_vm0, %v435_v23 }
 0x215   :  { %3406 = vmatmul.msk.f32.gmra.mxu1 %vm53_vm0, %v428_v12 }
 0x216   :  { %3482 = vmatmul.msk.f32.gmra.mxu3 %vm53_vm0, %v440_v15 }
 0x217   :  { %3414 = vmatmul.msk.f32.gmra.mxu2 %vm53_vm0, %v436_v25  ;;  %v1673_v25 = vld [vmem:[%s6191_s6 + $0x20] sm:$0xff] }
 0x21d   :  { %3407 = vmatmul.msk.f32.gmra.mxu1 %vm53_vm0, %v429_v33 }
 0x21e   :  { %3483 = vmatmul.msk.f32.gmra.mxu3 %vm53_vm0, %v441_v34 }
 0x21f   :  { %3415 = vmatmul.msk.f32.gmra.mxu2 %vm53_vm0, %v437_v27 }
 0x225   :  { %3408 = vmatmul.msk.f32.gmra.mxu1 %vm53_vm0, %v430_v6 }
 0x226   :  { %3484 = vmatmul.msk.f32.gmra.mxu3 %vm53_vm0, %v442_v35 }
 0x227   :  { %3416 = vmatmul.msk.f32.gmra.mxu2 %vm53_vm0, %v438_v29  ;;  %v454_v29 = vld [vmem:[%s6194_s9 + $0x100] sm:$0xff] }
 0x22d   :  { %3465 = vmatmul.msk.f32.vlgmr.msrb.gmra.mxu1 %vm53_vm0, %v423_v22  ;;  %v453_v22 = vld [vmem:[%s6194_s9 + $0xf8] sm:$0xff] }
 0x22e   :  { %3485 = vmatmul.msk.f32.gmra.mxu3 %vm53_vm0, %v443_v14 }
 0x22f   :  { %3417 = vmatmul.msk.f32.gmra.mxu2 %vm53_vm0, %v439_v31 }
 0x235   :  { %3466 = vmatmul.msk.f32.gmra.mxu1 %vm53_vm0, %v424_v24 }
 0x236   :  { %3486 = vmatmul.msk.f32.gmra.mxu3 %vm53_vm0, %v444_v36 }
 0x237   :  { %3418 = vmatmul.msk.f32.gmra.mxu2 %vm53_vm0, %v440_v15 }
 0x23d   :  { %3467 = vmatmul.msk.f32.gmra.mxu1 %vm53_vm0, %v425_v26 }
 0x23e   :  { %3487 = vmatmul.msk.f32.gmra.mxu3 %vm53_vm0, %v445_v38 }
 0x23f   :  { %3419 = vmatmul.msk.f32.gmra.mxu2 %vm53_vm0, %v441_v34 }
 0x245   :  { %3468 = vmatmul.msk.f32.gmra.mxu1 %vm53_vm0, %v426_v59 }
 0x246   :  { %3488 = vmatmul.msk.f32.gmra.mxu3 %vm53_vm0, %v446_v39 }
 0x247   :  { %3420 = vmatmul.msk.f32.gmra.mxu2 %vm53_vm0, %v442_v35 }
 0x24d   :  { %3469 = vmatmul.msk.f32.gmra.mxu1 %vm53_vm0, %v427_v30 }
 0x24e   :  { %3489 = vmatmul.msk.f32.gmra.mxu3 %vm53_vm0, %v447_v40 }
 0x24f   :  { %v4226_v19 = vpop.f32.mrf.mxu3  ;;  %3421 = vmatmul.msk.f32.gmra.mxu2 %vm53_vm0, %v443_v14 }
 0x255   :  { %3470 = vmatmul.msk.f32.gmra.mxu1 %vm53_vm0, %v428_v12  ;;  %v1674_v12 = vld [vmem:[%s6191_s6 + $0x28] sm:$0xff] }
 0x256   :  { %3490 = vmatmul.msk.f32.gmra.mxu3 %vm53_vm0, %v448_v44 }
 0x257   :  { %v4243_v47 = vpop.f32.mrf.mxu3  ;;  %3422 = vmatmul.msk.f32.gmra.mxu2 %vm53_vm0, %v444_v36  ;;  %v1675_v36 = vld [vmem:[%s6191_s6 + $0x30] sm:$0xff] }
 0x25d   :  { %3471 = vmatmul.msk.f32.gmra.mxu1 %vm53_vm0, %v429_v33 }
 0x25e   :  { %3491 = vmatmul.msk.f32.gmra.mxu3 %vm53_vm0, %v449_v49 }
 0x25f   :  { %v4254_v50 = vpop.f32.mrf.mxu3  ;;  %3423 = vmatmul.msk.f32.gmra.mxu2 %vm53_vm0, %v445_v38 }
 0x265   :  { %3472 = vmatmul.msk.f32.gmra.mxu1 %vm53_vm0, %v430_v6  ;;  %v4340_v6 = vld [vmem:[%s6194_s9 + $0x108] sm:$0xff] }
 0x266   :  { %3492 = vmatmul.msk.f32.gmra.mxu3 %vm53_vm0, %v450_v51 }
 0x267   :  { %v4262_v52 = vpop.f32.mrf.mxu3  ;;  %3424 = vmatmul.msk.f32.gmra.mxu2 %vm53_vm0, %v446_v39 }
 0x269   :  { %v4271_v55 = vpop.f32.mrf.mxu0 }
 0x26a   :  { %v1733_v21 = vmul.f32 %v1669_v53, %v4271_v55  ;;  %v4274_v56 = vpop.f32.mrf.mxu1  ;;  %v4374_v53 = vld [vmem:[%s6194_s9 + $0x118] sm:$0xff] }
 0x26b   :  { %v1734_v57 = vmul.f32 %v1670_v54, %v4274_v56 }
 0x26c   :  { %v1797_v60 = vmul.f32 1.442695, %v1733_v21 }
 0x26d   :  { %v1799_v41 = vmul.f32 1.442695, %v1734_v57  ;;  %v1677_v57 = vld [vmem:[%s6191_s6 + $0x40] sm:$0xff] }
 0x26e   :  { %3683 = vpow2.f32 %v1797_v60  ;;  %3493 = vmatmul.msk.f32.gmra.mxu3 %vm53_vm0, %v451_v58 }
 0x26f   :  { %3685 = vpow2.f32 %v1799_v41  ;;  %3425 = vmatmul.msk.f32.gmra.mxu2 %vm53_vm0, %v447_v40 }
 0x271   :  { %v4288_v0 = vpop.f32.mrf.mxu3  ;;  %v944_v1 = vpop.f32.mrf.mxu0 }
 0x272   :  { %v4290_v2 = vpop.f32.mrf.mxu1  ;;  %v1200_v3 = vmul.f32 %v1136_v61, %v944_v1  ;;  %v4391_v61 = vld [vmem:[%s6194_s9 + $0x120] sm:$0xff] }
 0x273   :  { %v1735_v4 = vmul.f32 %v1671_v62, %v4290_v2 }
 0x274   :  { %v3684_v7 = vpop.eup %3683  ;;  %3528 = vmatmul.msk.f32.vlgmr.msrb.gmra.mxu0 %vm53_vm0, %v1200_v3  ;;  %v1137_v3 = vld [vmem:[%s6195_s10 + $0x8] sm:$0xff] }
 0x275   :  { %v3686_v9 = vpop.eup %3685  ;;  %1925 = vst.msk [vmem:[#allocation2] sm:$0xff] %vm312_vm10, %v3684_v7  ;;  %v1801_v10 = vmul.f32 1.442695, %v1735_v4 }
 0x276   :  { %1926 = vst.msk [vmem:[#allocation2 + $0x8] sm:$0xff] %vm312_vm10, %v3686_v9  ;;  %3494 = vmatmul.msk.f32.gmra.mxu3 %vm53_vm0, %v452_v5  ;;  %v4405_v9 = vld [vmem:[%s6194_s9 + $0x128] sm:$0xff] }
 0x277   :  { %3687 = vpow2.f32 %v1801_v10  ;;  %3426 = vmatmul.msk.f32.gmra.mxu2 %vm53_vm0, %v448_v44 }
 0x279   :  { %v4304_v17 = vpop.f32.mrf.mxu3 }
 0x27a   :  { %v4306_v18 = vpop.f32.mrf.mxu1 }
 0x27b   :  { %v1736_v20 = vmul.f32 %v1672_v11, %v4306_v18  ;;  %v1138_v11 = vld [vmem:[%s6195_s10 + $0x10] sm:$0xff] }
 0x27d   :  { %v3688_v23 = vpop.eup %3687  ;;  %v1803_v24 = vmul.f32 1.442695, %v1736_v20 }
 0x27e   :  { %1927 = vst.msk [vmem:[#allocation2 + $0x10] sm:$0xff] %vm312_vm10, %v3688_v23  ;;  %3495 = vmatmul.msk.f32.gmra.mxu3 %vm53_vm0, %v453_v22 }
 0x27f   :  { %3689 = vpow2.f32 %v1803_v24  ;;  %3427 = vmatmul.msk.f32.gmra.mxu2 %vm53_vm0, %v449_v49  ;;  %v4419_v24 = vld [vmem:[%s6194_s9 + $0x130] sm:$0xff] }
 0x281   :  { %v4318_v26 = vpop.f32.mrf.mxu3 }
 0x282   :  { %v4320_v27 = vpop.f32.mrf.mxu1 }
 0x283   :  { %v1737_v59 = vmul.f32 %v1673_v25, %v4320_v27  ;;  %v1139_v25 = vld [vmem:[%s6195_s10 + $0x18] sm:$0xff] }
 0x285   :  { %v3690_v30 = vpop.eup %3689  ;;  %v1805_v31 = vmul.f32 1.442695, %v1737_v59 }
 0x286   :  { %1928 = vst.msk [vmem:[#allocation2 + $0x18] sm:$0xff] %vm312_vm10, %v3690_v30  ;;  %3496 = vmatmul.msk.f32.gmra.mxu3 %vm53_vm0, %v454_v29 }
 0x287   :  { %3691 = vpow2.f32 %v1805_v31  ;;  %3428 = vmatmul.msk.f32.gmra.mxu2 %vm53_vm0, %v450_v51  ;;  %v4432_v31 = vld [vmem:[%s6194_s9 + $0x138] sm:$0xff] }
 0x289   :  { %v4332_v15 = vpop.f32.mrf.mxu3 }
 0x28a   :  { %v4334_v33 = vpop.f32.mrf.mxu1 }
 0x28b   :  { %v1738_v34 = vmul.f32 %v1674_v12, %v4334_v33  ;;  %v1140_v12 = vld [vmem:[%s6195_s10 + $0x20] sm:$0xff] }
 0x28d   :  { %v3692_v35 = vpop.eup %3691  ;;  %v1807_v14 = vmul.f32 1.442695, %v1738_v34 }
 0x28e   :  { %1929 = vst.msk [vmem:[#allocation2 + $0x20] sm:$0xff] %vm312_vm10, %v3692_v35  ;;  %3497 = vmatmul.msk.f32.gmra.mxu3 %vm53_vm0, %v4340_v6 }
 0x28f   :  { %3693 = vpow2.f32 %v1807_v14  ;;  %3429 = vmatmul.msk.f32.gmra.mxu2 %vm53_vm0, %v451_v58 }
 0x291   :  { %v4349_v38 = vpop.f32.mrf.mxu3 }
 0x292   :  { %v4351_v39 = vpop.f32.mrf.mxu1 }
 0x293   :  { %v1739_v40 = vmul.f32 %v1675_v36, %v4351_v39  ;;  %v4445_v36 = vld [vmem:[%s6194_s9 + $0x140] sm:$0xff] }
 0x295   :  { %v3694_v44 = vpop.eup %3693  ;;  %v1809_v46 = vmul.f32 1.442695, %v1739_v40  ;;  %v1141_v40 = vld [vmem:[%s6195_s10 + $0x28] sm:$0xff] }
 0x296   :  { %1930 = vst.msk [vmem:[#allocation2 + $0x28] sm:$0xff] %vm312_vm10, %v3694_v44  ;;  %3498 = vmatmul.msk.f32.gmra.mxu3 %vm53_vm0, %v4357_v43 }
 0x297   :  { %3695 = vpow2.f32 %v1809_v46  ;;  %3430 = vmatmul.msk.f32.gmra.mxu2 %vm53_vm0, %v452_v5 }
 0x299   :  { %v4366_v48 = vpop.f32.mrf.mxu3 }
 0x29a   :  { %v4368_v49 = vpop.f32.mrf.mxu1 }
 0x29b   :  { %v1740_v51 = vmul.f32 %v1676_v45, %v4368_v49 }
 0x29d   :  { %v3696_v54 = vpop.eup %3695  ;;  %v1811_v21 = vmul.f32 1.442695, %v1740_v51  ;;  %v4458_v51 = vld [vmem:[%s6194_s9 + $0x148] sm:$0xff] }
 0x29e   :  { %1931 = vst.msk [vmem:[#allocation2 + $0x30] sm:$0xff] %vm312_vm10, %v3696_v54  ;;  %3499 = vmatmul.msk.f32.gmra.mxu3 %vm53_vm0, %v4374_v53  ;;  %v1142_v54 = vld [vmem:[%s6195_s10 + $0x30] sm:$0xff] }
 0x29f   :  { %3697 = vpow2.f32 %v1811_v21  ;;  %3431 = vmatmul.msk.f32.gmra.mxu2 %vm53_vm0, %v453_v22 }
 0x2a1   :  { %v4383_v58 = vpop.f32.mrf.mxu3 }
 0x2a2   :  { %v4385_v60 = vpop.f32.mrf.mxu1 }
 0x2a3   :  { %v1741_v41 = vmul.f32 %v1677_v57, %v4385_v60 }
 0x2a5   :  { %v3698_v62 = vpop.eup %3697  ;;  %v1813_v1 = vmul.f32 1.442695, %v1741_v41 }
 0x2a6   :  { %1932 = vst.msk [vmem:[#allocation2 + $0x38] sm:$0xff] %vm312_vm10, %v3698_v62  ;;  %3500 = vmatmul.msk.f32.gmra.mxu3 %vm53_vm0, %v4391_v61  ;;  %v4471_v62 = vld [vmem:[%s6194_s9 + $0x150] sm:$0xff] }
 0x2a7   :  { %3699 = vpow2.f32 %v1813_v1  ;;  %3432 = vmatmul.msk.f32.gmra.mxu2 %vm53_vm0, %v454_v29  ;;  %v1143_v1 = vld [vmem:[%s6195_s10 + $0x38] sm:$0xff] }
 0x2a9   :  { %v4400_v4 = vpop.f32.mrf.mxu3 }
 0x2aa   :  { %v947_v5 = vpop.f32.mrf.mxu1 }
 0x2ab   :  { %v1201_v7 = vmul.f32 %v1137_v3, %v947_v5 }
 0x2ad   :  { %v3700_v10 = vpop.eup %3699  ;;  %3529 = vmatmul.msk.f32.gmra.mxu0 %vm53_vm0, %v1201_v7 }
 0x2ae   :  { %1933 = vst.msk [vmem:[#allocation2 + $0x40] sm:$0xff] %vm312_vm10, %v3700_v10  ;;  %3501 = vmatmul.msk.f32.gmra.mxu3 %vm53_vm0, %v4405_v9  ;;  %v4484_v10 = vld [vmem:[%s6194_s9 + $0x158] sm:$0xff] }
 0x2b1   :  { %v4414_v20 = vpop.f32.mrf.mxu3 }
 0x2b2   :  { %v950_v22 = vpop.f32.mrf.mxu1 }
 0x2b3   :  { %v1202_v23 = vmul.f32 %v1138_v11, %v950_v22  ;;  %v1144_v11 = vld [vmem:[%s6195_s10 + $0x40] sm:$0xff] }
 0x2b5   :  { %3530 = vmatmul.msk.f32.gmra.mxu0 %vm53_vm0, %v1202_v23 }
 0x2b6   :  { %3502 = vmatmul.msk.f32.gmra.mxu3 %vm53_vm0, %v4419_v24 }
 0x2b9   :  { %v4427_v59 = vpop.f32.mrf.mxu3 }
 0x2ba   :  { %v953_v29 = vpop.f32.mrf.mxu1 }
 0x2bb   :  { %v1203_v30 = vmul.f32 %v1139_v25, %v953_v29  ;;  %v4497_v29 = vld [vmem:[%s6194_s9 + $0x160] sm:$0xff] }
 0x2bd   :  { %3531 = vmatmul.msk.f32.gmra.mxu0 %vm53_vm0, %v1203_v30  ;;  %v1145_v30 = vld [vmem:[%s6195_s10 + $0x48] sm:$0xff] }
 0x2be   :  { %3503 = vmatmul.msk.f32.gmra.mxu3 %vm53_vm0, %v4432_v31 }
 0x2c1   :  { %v4440_v34 = vpop.f32.mrf.mxu3 }
 0x2c2   :  { %v956_v35 = vpop.f32.mrf.mxu1 }
 0x2c3   :  { %v1204_v14 = vmul.f32 %v1140_v12, %v956_v35  ;;  %v1209_v35 = vmul.f32 %v1145_v30, %v4226_v19 }
 0x2c5   :  { %3532 = vmatmul.msk.f32.gmra.mxu0 %vm53_vm0, %v1204_v14  ;;  %v4511_v14 = vld [vmem:[%s6194_s9 + $0x168] sm:$0xff] }
 0x2c6   :  { %3504 = vmatmul.msk.f32.gmra.mxu3 %vm53_vm0, %v4445_v36 }
 0x2c9   :  { %v4453_v44 = vpop.f32.mrf.mxu3 }
 0x2ca   :  { %v959_v46 = vpop.f32.mrf.mxu1 }
 0x2cb   :  { %v1205_v45 = vmul.f32 %v1141_v40, %v959_v46  ;;  %v1146_v40 = vld [vmem:[%s6195_s10 + $0x50] sm:$0xff] }
 0x2cc   :  { %v1210_v19 = vmul.f32 %v1146_v40, %v4243_v47  ;;  %v4540_v47 = vld [vmem:[%s6194_s9 + $0x178] sm:$0xff] }
 0x2cd   :  { %3533 = vmatmul.msk.f32.gmra.mxu0 %vm53_vm0, %v1205_v45 }
 0x2ce   :  { %3505 = vmatmul.msk.f32.gmra.mxu3 %vm53_vm0, %v4458_v51 }
 0x2d1   :  { %v4466_v21 = vpop.f32.mrf.mxu3 }
 0x2d2   :  { %v962_v57 = vpop.f32.mrf.mxu1 }
 0x2d3   :  { %v1206_v41 = vmul.f32 %v1142_v54, %v962_v57  ;;  %v4526_v54 = vld [vmem:[%s6194_s9 + $0x170] sm:$0xff]  ;;  %v1147_v57 = vld [vmem:[%s6195_s10 + $0x58] sm:$0xff] }
 0x2d5   :  { %3534 = vmatmul.msk.f32.gmra.mxu0 %vm53_vm0, %v1206_v41 }
 0x2d6   :  { %3506 = vmatmul.msk.f32.gmra.mxu3 %vm53_vm0, %v4471_v62 }
 0x2d9   :  { %v4479_v3 = vpop.f32.mrf.mxu3 }
 0x2da   :  { %v965_v5 = vpop.f32.mrf.mxu1 }
 0x2db   :  { %v1207_v7 = vmul.f32 %v1143_v1, %v965_v5  ;;  %v1211_v1 = vmul.f32 %v1147_v57, %v4254_v50  ;;  %v1148_v5 = vld [vmem:[%s6195_s10 + $0x60] sm:$0xff] }
 0x2dc   :  { %v4554_v50 = vld [vmem:[%s6194_s9 + $0x180] sm:$0xff] }
 0x2dd   :  { %3535 = vmatmul.msk.f32.gmra.mxu0 %vm53_vm0, %v1207_v7 }
 0x2de   :  { %3507 = vmatmul.msk.f32.gmra.mxu3 %vm53_vm0, %v4484_v10 }
 0x2e1   :  { %v4492_v22 = vpop.f32.mrf.mxu3 }
 0x2e2   :  { %v968_v23 = vpop.f32.mrf.mxu1 }
 0x2e3   :  { %v1208_v25 = vmul.f32 %v1144_v11, %v968_v23  ;;  %v1212_v11 = vmul.f32 %v1148_v5, %v4262_v52  ;;  %v1149_v23 = vld [vmem:[%s6195_s10 + $0x68] sm:$0xff]  ;;  %v1152_v5 = vld [vmem:[%s6195_s10 + $0x80] sm:$0xff] }
 0x2e4   :  { %v1213_v30 = vmul.f32 %v1149_v23, %v4288_v0  ;;  %v4568_v52 = vld [vmem:[%s6194_s9 + $0x188] sm:$0xff]  ;;  %v4582_v0 = vld [vmem:[%s6194_s9 + $0x190] sm:$0xff]  ;;  %v1216_v23 = vmul.f32 %v1152_v5, %v4332_v15 }
 0x2e5   :  { %3536 = vmatmul.msk.f32.gmra.mxu0 %vm53_vm0, %v1208_v25  ;;  %v4625_v15 = vld [vmem:[%s6194_s9 + $0x1a8] sm:$0xff] }
 0x2e6   :  { %3508 = vmatmul.msk.f32.gmra.mxu3 %vm53_vm0, %v4497_v29 }
 0x2e9   :  { %v4505_v12 = vpop.f32.mrf.mxu3 }
 0x2ed   :  { %3537 = vmatmul.msk.f32.gmra.mxu0 %vm53_vm0, %v1209_v35  ;;  %v1150_v35 = vld [vmem:[%s6195_s10 + $0x70] sm:$0xff] }
 0x2ee   :  { %3509 = vmatmul.msk.f32.gmra.mxu3 %vm53_vm0, %v4511_v14 }
 0x2f1   :  { %v4519_v46 = vpop.f32.mrf.mxu3  ;;  %v1477_v45 = vpop.f32.mrf.mxu0 }
 0x2f2   :  { %2053 = vrot.lane.b32.xlu2 %v1477_v45, %s3853_s5  ;;  %v1214_v45 = vmul.f32 %v1150_v35, %v4304_v17  ;;  %v4596_v17 = vld [vmem:[%s6194_s9 + $0x198] sm:$0xff] }
 0x2f5   :  { %3538 = vmatmul.msk.f32.gmra.mxu0 %vm53_vm0, %v1210_v19  ;;  %v1151_v19 = vld [vmem:[%s6195_s10 + $0x78] sm:$0xff] }
 0x2f6   :  { %3510 = vmatmul.msk.f32.gmra.mxu3 %vm53_vm0, %v4526_v54 }
 0x2f9   :  { %v4534_v41 = vpop.f32.mrf.mxu3 }
 0x2fd   :  { %3539 = vmatmul.msk.f32.gmra.mxu0 %vm53_vm0, %v1211_v1  ;;  %v1215_v1 = vmul.f32 %v1151_v19, %v4318_v26  ;;  %v4610_v26 = vld [vmem:[%s6194_s9 + $0x1a0] sm:$0xff] }
 0x2fe   :  { %3511 = vmatmul.msk.f32.gmra.mxu3 %vm53_vm0, %v4540_v47 }
 0x301   :  { %v4548_v7 = vpop.f32.mrf.mxu3 }
 0x305   :  { %3540 = vmatmul.msk.f32.gmra.mxu0 %vm53_vm0, %v1212_v11 }
 0x306   :  { %3512 = vmatmul.msk.f32.gmra.mxu3 %vm53_vm0, %v4554_v50 }
 0x309   :  { %v4562_v25 = vpop.f32.mrf.mxu3 }
 0x30d   :  { %3541 = vmatmul.msk.f32.gmra.mxu0 %vm53_vm0, %v1213_v30  ;;  %v1153_v30 = vld [vmem:[%s6195_s10 + $0x88] sm:$0xff] }
 0x30e   :  { %3513 = vmatmul.msk.f32.gmra.mxu3 %vm53_vm0, %v4568_v52  ;;  %v1217_v19 = vmul.f32 %v1153_v30, %v4349_v38  ;;  %v1154_v38 = vld [vmem:[%s6195_s10 + $0x90] sm:$0xff] }
 0x30f   :  { %v1218_v30 = vmul.f32 %v1154_v38, %v4366_v48  ;;  %v1155_v48 = vld [vmem:[%s6195_s10 + $0x98] sm:$0xff] }
 0x311   :  { %v4576_v40 = vpop.f32.mrf.mxu3 }
 0x315   :  { %3542 = vmatmul.msk.f32.gmra.mxu0 %vm53_vm0, %v1214_v45 }
 0x316   :  { %3514 = vmatmul.msk.f32.gmra.mxu3 %vm53_vm0, %v4582_v0 }
 0x319   :  { %v4590_v57 = vpop.f32.mrf.mxu3 }
 0x31d   :  { %3543 = vmatmul.msk.f32.gmra.mxu0 %vm53_vm0, %v1215_v1  ;;  %v4630_v1 = vpop.f32.mrf.mxu2  ;;  %3433 = vmatmul.msk.f32.gmra.mxu2 %vm53_vm0, %v4340_v6 }
 0x31e   :  { %3515 = vmatmul.msk.f32.gmra.mxu3 %vm53_vm0, %v4596_v17 }
 0x321   :  { %v4604_v11 = vpop.f32.mrf.mxu3 }
 0x325   :  { %3544 = vmatmul.msk.f32.gmra.mxu0 %vm53_vm0, %v1216_v23  ;;  %v4649_v6 = vpop.f32.mrf.mxu2  ;;  %3434 = vmatmul.msk.f32.gmra.mxu2 %vm53_vm0, %v4357_v43 }
 0x326   :  { %3516 = vmatmul.msk.f32.gmra.mxu3 %vm53_vm0, %v4610_v26 }
 0x329   :  { %v4618_v35 = vpop.f32.mrf.mxu3 }
 0x32a   :  { %v1480_v45 = vpop.f32.mrf.mxu0 }
 0x32b   :  { %2055 = vrot.lane.b32.xlu2 %v1480_v45, %s3853_s5  ;;  %v4644_v45 = vld [vmem:[%s6194_s9 + $0x1b0] sm:$0xff] }
 0x32d   :  { %3545 = vmatmul.msk.f32.gmra.mxu0 %vm53_vm0, %v1217_v19  ;;  %v4672_v28 = vpop.f32.mrf.mxu2  ;;  %3435 = vmatmul.msk.f32.gmra.mxu2 %vm53_vm0, %v4374_v53 }
 0x32e   :  { %3517 = vmatmul.msk.f32.gmra.mxu3 %vm53_vm0, %v4625_v15 }
 0x331   :  { %v4637_v5 = vpop.f32.mrf.mxu3 }
 0x332   :  { %v1483_v23 = vpop.f32.mrf.mxu0 }
 0x333   :  { %2057 = vrot.lane.b32.xlu1 %v1483_v23, %s3853_s5  ;;  %v1678_v23 = vld [vmem:[%s6191_s6 + $0x48] sm:$0xff] }
 0x334   :  { %v1742_v43 = vmul.f32 %v1678_v23, %v4630_v1  ;;  %v1679_v23 = vld [vmem:[%s6191_s6 + $0x50] sm:$0xff] }
 0x335   :  { %3546 = vmatmul.msk.f32.gmra.mxu0 %vm53_vm0, %v1218_v30  ;;  %v1219_v30 = vmul.f32 %v1155_v48, %v4383_v58  ;;  %v1156_v58 = vld [vmem:[%s6195_s10 + $0xa0] sm:$0xff]  ;;  %v1743_v53 = vmul.f32 %v1679_v23, %v4649_v6 }
 0x336   :  { %3518 = vmatmul.msk.f32.gmra.mxu3 %vm53_vm0, %v4644_v45  ;;  %v1815_v32 = vmul.f32 1.442695, %v1742_v43 }
 0x337   :  { %v1817_v8 = vmul.f32 1.442695, %v1743_v53 }
 0x338   :  { %3701 = vpow2.f32 %v1815_v32  ;;  %v4689_v32 = vld [vmem:[%s6194_s9 + $0x1c0] sm:$0xff] }
 0x339   :  { %v4656_v19 = vpop.f32.mrf.mxu3  ;;  %3703 = vpow2.f32 %v1817_v8  ;;  %v4713_v8 = vld [vmem:[%s6194_s9 + $0x1c8] sm:$0xff] }
 0x33a   :  { %v1486_v38 = vpop.f32.mrf.mxu0 }
 0x33b   :  { %2059 = vrot.lane.b32.xlu0 %v1486_v38, %s3853_s5 }
 0x33d   :  { %3547 = vmatmul.msk.f32.gmra.mxu0 %vm53_vm0, %v1219_v30  ;;  %v1220_v30 = vmul.f32 %v1156_v58, %v4400_v4  ;;  %v4696_v4 = vpop.f32.mrf.mxu2  ;;  %3436 = vmatmul.msk.f32.gmra.mxu2 %vm53_vm0, %v4391_v61  ;;  %v1157_v58 = vld [vmem:[%s6195_s10 + $0xa8] sm:$0xff] }
 0x33e   :  { %3519 = vmatmul.msk.f32.gmra.mxu3 %vm53_vm0, %v4666_v37  ;;  %v3702_v43 = vpop.eup %3701  ;;  %v1221_v53 = vmul.f32 %v1157_v58, %v4414_v20  ;;  %v1158_v58 = vld [vmem:[%s6195_s10 + $0xb0] sm:$0xff] }
 0x33f   :  { %1934 = vst.msk [vmem:[#allocation2 + $0x48] sm:$0xff] %vm312_vm10, %v3702_v43  ;;  %v3704_v16 = vpop.eup %3703 }
 0x340   :  { %1935 = vst.msk [vmem:[#allocation2 + $0x50] sm:$0xff] %vm312_vm10, %v3704_v16  ;;  %v1222_v16 = vmul.f32 %v1158_v58, %v4427_v59 }
 0x341   :  { %v4679_v48 = vpop.f32.mrf.mxu3 }
 0x342   :  { %v1489_v38 = vpop.f32.mrf.mxu0 }
 0x343   :  { %2061 = vrot.lane.b32.xlu0 %v1489_v38, %s3853_s5 }
 0x345   :  { %3548 = vmatmul.msk.f32.gmra.mxu0 %vm53_vm0, %v1220_v30  ;;  %v1680_v30 = vld [vmem:[%s6191_s6 + $0x58] sm:$0xff]  ;;  %v4725_v20 = vpop.f32.mrf.mxu2  ;;  %3437 = vmatmul.msk.f32.gmra.mxu2 %vm53_vm0, %v4405_v9 }
 0x346   :  { %3520 = vmatmul.msk.f32.gmra.mxu3 %vm53_vm0, %v4689_v32  ;;  %v1744_v61 = vmul.f32 %v1680_v30, %v4672_v28  ;;  %v1681_v30 = vld [vmem:[%s6191_s6 + $0x60] sm:$0xff] }
 0x348   :  { %v1819_v42 = vmul.f32 1.442695, %v1744_v61  ;;  %v1159_v61 = vld [vmem:[%s6195_s10 + $0xb8] sm:$0xff] }
 0x349   :  { %v4703_v38 = vpop.f32.mrf.mxu3 }
 0x34a   :  { %v1492_v23 = vpop.f32.mrf.mxu0  ;;  %3705 = vpow2.f32 %v1819_v42  ;;  %v4742_v42 = vld [vmem:[%s6194_s9 + $0x1d0] sm:$0xff] }
 0x34b   :  { %2063 = vrot.lane.b32.xlu2 %v1492_v23, %s3853_s5 }
 0x34c   :  { %v4716_v43 = vpop.permute.xlu2 %2053 }
 0x34d   :  { %6238 = vst [vmem:[#allocation16_spill] sm:$0xff] %v4716_v43  ;;  %3549 = vmatmul.msk.f32.gmra.mxu0 %vm53_vm0, %v1221_v53  ;;  %v2245_v63 = vmul.f32 %v4716_v43, %v4271_v55  ;;  %v4749_v59 = vpop.f32.mrf.mxu2  ;;  %3438 = vmatmul.msk.f32.gmra.mxu2 %vm53_vm0, %v4419_v24 }
 0x34e   :  { %3521 = vmatmul.msk.f32.gmra.mxu3 %vm53_vm0, %v4713_v8 }
 0x34f   :  { %2373 = vrot.lane.b32.xlu0 %v2245_v63, %s3853_s5  ;;  %v1745_v63 = vmul.f32 %v1681_v30, %v4696_v4  ;;  %v1682_v30 = vld [vmem:[%s6191_s6 + $0x68] sm:$0xff] }
 0x350   :  { %v3706_v9 = vpop.eup %3705  ;;  %v1746_v24 = vmul.f32 %v1682_v30, %v4725_v20 }
 0x351   :  { %v4732_v23 = vpop.f32.mrf.mxu3  ;;  %v1821_v53 = vmul.f32 1.442695, %v1745_v63  ;;  %1936 = vst.msk [vmem:[#allocation2 + $0x58] sm:$0xff] %vm312_vm10, %v3706_v9  ;;  %v4766_v63 = vld [vmem:[%s6194_s9 + $0x1d8] sm:$0xff] }
 0x352   :  { %v1495_v55 = vpop.f32.mrf.mxu0 }
 0x353   :  { %2065 = vrot.lane.b32.xlu2 %v1495_v55, %s3853_s5  ;;  %3707 = vpow2.f32 %v1821_v53  ;;  %v1823_v53 = vmul.f32 1.442695, %v1746_v24 }
 0x355   :  { %3550 = vmatmul.msk.f32.gmra.mxu0 %vm53_vm0, %v1222_v16  ;;  %v1223_v16 = vmul.f32 %v1159_v61, %v4440_v34  ;;  %3709 = vpow2.f32 %v1823_v53  ;;  %v4773_v34 = vpop.f32.mrf.mxu2  ;;  %3439 = vmatmul.msk.f32.gmra.mxu2 %vm53_vm0, %v4432_v31  ;;  %v1160_v61 = vld [vmem:[%s6195_s10 + $0xc0] sm:$0xff] }
 0x356   :  { %3522 = vmatmul.msk.f32.gmra.mxu3 %vm53_vm0, %v4742_v42  ;;  %v1224_v24 = vmul.f32 %v1160_v61, %v4453_v44  ;;  %v1161_v61 = vld [vmem:[%s6195_s10 + $0xc8] sm:$0xff] }
 0x359   :  { %v4756_v58 = vpop.f32.mrf.mxu3  ;;  %v3708_v9 = vpop.eup %3707 }
 0x35a   :  { %v1498_v55 = vpop.f32.mrf.mxu0  ;;  %1937 = vst.msk [vmem:[#allocation2 + $0x60] sm:$0xff] %vm312_vm10, %v3708_v9  ;;  %v4790_v9 = vld [vmem:[%s6194_s9 + $0x1e0] sm:$0xff] }
 0x35b   :  { %2067 = vrot.lane.b32.xlu1 %v1498_v55, %s3853_s5  ;;  %v3710_v53 = vpop.eup %3709 }
 0x35c   :  { %1938 = vst.msk [vmem:[#allocation2 + $0x68] sm:$0xff] %vm312_vm10, %v3710_v53 }
 0x35d   :  { %3551 = vmatmul.msk.f32.gmra.mxu0 %vm53_vm0, %v1223_v16  ;;  %v1683_v16 = vld [vmem:[%s6191_s6 + $0x70] sm:$0xff]  ;;  %v4797_v44 = vpop.f32.mrf.mxu2  ;;  %3440 = vmatmul.msk.f32.gmra.mxu2 %vm53_vm0, %v4445_v36 }
 0x35e   :  { %3523 = vmatmul.msk.f32.gmra.mxu3 %vm53_vm0, %v4766_v63  ;;  %v1747_v31 = vmul.f32 %v1683_v16, %v4749_v59 }
 0x360   :  { %v1825_v13 = vmul.f32 1.442695, %v1747_v31  ;;  %v1225_v31 = vmul.f32 %v1161_v61, %v4466_v21  ;;  %v1162_v61 = vld [vmem:[%s6195_s10 + $0xd0] sm:$0xff] }
 0x361   :  { %v4780_v55 = vpop.f32.mrf.mxu3 }
 0x362   :  { %v1501_v30 = vpop.f32.mrf.mxu0  ;;  %3711 = vpow2.f32 %v1825_v13  ;;  %v4814_v13 = vld [vmem:[%s6194_s9 + $0x1e8] sm:$0xff] }
 0x363   :  { %2069 = vrot.lane.b32.xlu1 %v1501_v30, %s3853_s5  ;;  %6239 = vst [vmem:[#allocation17_spill] sm:$0xff] %v4814_v13 }
 0x365   :  { %3552 = vmatmul.msk.f32.gmra.mxu0 %vm53_vm0, %v1224_v24  ;;  %v1684_v24 = vld [vmem:[%s6191_s6 + $0x78] sm:$0xff]  ;;  %v4821_v21 = vpop.f32.mrf.mxu2  ;;  %3441 = vmatmul.msk.f32.gmra.mxu2 %vm53_vm0, %v4458_v51 }
 0x366   :  { %3524 = vmatmul.msk.f32.gmra.mxu3 %vm53_vm0, %v4790_v9  ;;  %v1748_v36 = vmul.f32 %v1684_v24, %v4773_v34 }
 0x368   :  { %v3712_v53 = vpop.eup %3711  ;;  %v1827_v43 = vmul.f32 1.442695, %v1748_v36  ;;  %v1226_v36 = vmul.f32 %v1162_v61, %v4479_v3  ;;  %v1163_v61 = vld [vmem:[%s6195_s10 + $0xd8] sm:$0xff] }
 0x369   :  { %v4804_v30 = vpop.f32.mrf.mxu3  ;;  %1939 = vst.msk [vmem:[#allocation2 + $0x70] sm:$0xff] %vm312_vm10, %v3712_v53 }
 0x36a   :  { %v1504_v16 = vpop.f32.mrf.mxu0  ;;  %3713 = vpow2.f32 %v1827_v43  ;;  %v4838_v43 = vld [vmem:[%s6194_s9 + $0x1f0] sm:$0xff] }
 0x36b   :  { %2071 = vrot.lane.b32.xlu0 %v1504_v16, %s3853_s5  ;;  %6240 = vst [vmem:[#allocation18_spill] sm:$0xff] %v4838_v43 }
 0x36d   :  { %3553 = vmatmul.msk.f32.gmra.mxu0 %vm53_vm0, %v1225_v31  ;;  %v1685_v31 = vld [vmem:[%s6191_s6 + $0x80] sm:$0xff]  ;;  %v4845_v3 = vpop.f32.mrf.mxu2  ;;  %3442 = vmatmul.msk.f32.gmra.mxu2 %vm53_vm0, %v4471_v62 }
 0x36e   :  { %3525 = vmatmul.msk.f32.gmra.mxu3 %vm53_vm0, %v4814_v13  ;;  %v1749_v51 = vmul.f32 %v1685_v31, %v4797_v44 }
 0x370   :  { %v3714_v53 = vpop.eup %3713  ;;  %v1829_v13 = vmul.f32 1.442695, %v1749_v51  ;;  %v1227_v51 = vmul.f32 %v1163_v61, %v4492_v22  ;;  %v1164_v61 = vld [vmem:[%s6195_s10 + $0xe0] sm:$0xff] }
 0x371   :  { %v4828_v16 = vpop.f32.mrf.mxu3  ;;  %1940 = vst.msk [vmem:[#allocation2 + $0x78] sm:$0xff] %vm312_vm10, %v3714_v53 }
 0x372   :  { %v1507_v24 = vpop.f32.mrf.mxu0  ;;  %3715 = vpow2.f32 %v1829_v13  ;;  %v4862_v13 = vld [vmem:[%s6194_s9 + $0x1f8] sm:$0xff] }
 0x373   :  { %2073 = vrot.lane.b32.xlu0 %v1507_v24, %s3853_s5  ;;  %6241 = vst [vmem:[#allocation19_spill] sm:$0xff] %v4862_v13 }
 0x375   :  { %3554 = vmatmul.msk.f32.gmra.mxu0 %vm53_vm0, %v1226_v36  ;;  %v1686_v36 = vld [vmem:[%s6191_s6 + $0x88] sm:$0xff]  ;;  %v4869_v22 = vpop.f32.mrf.mxu2  ;;  %3443 = vmatmul.msk.f32.gmra.mxu2 %vm53_vm0, %v4484_v10 }
 0x376   :  { %3526 = vmatmul.msk.f32.gmra.mxu3 %vm53_vm0, %v4838_v43  ;;  %v1750_v62 = vmul.f32 %v1686_v36, %v4821_v21 }
 0x378   :  { %v3716_v53 = vpop.eup %3715  ;;  %v1831_v43 = vmul.f32 1.442695, %v1750_v62  ;;  %v1228_v62 = vmul.f32 %v1164_v61, %v4505_v12  ;;  %v1165_v12 = vld [vmem:[%s6195_s10 + $0xe8] sm:$0xff] }
 0x379   :  { %v4852_v24 = vpop.f32.mrf.mxu3  ;;  %1941 = vst.msk [vmem:[#allocation2 + $0x80] sm:$0xff] %vm312_vm10, %v3716_v53 }
 0x37a   :  { %v1510_v31 = vpop.f32.mrf.mxu0  ;;  %3717 = vpow2.f32 %v1831_v43 }
 0x37b   :  { %2075 = vrot.lane.b32.xlu2 %v1510_v31, %s3853_s5 }
 0x37d   :  { %3555 = vmatmul.msk.f32.gmra.mxu0 %vm53_vm0, %v1227_v51  ;;  %v1687_v51 = vld [vmem:[%s6191_s6 + $0x90] sm:$0xff] }
 0x37e   :  { %3527 = vmatmul.msk.f32.gmra.mxu3 %vm53_vm0, %v4862_v13  ;;  %v1751_v43 = vmul.f32 %v1687_v51, %v4845_v3  ;;  %v4886_v13 = vpop.f32.mrf.mxu2  ;;  %3444 = vmatmul.msk.f32.gmra.mxu2 %vm53_vm0, %v4497_v29  ;;  %v1688_v51 = vld [vmem:[%s6191_s6 + $0x98] sm:$0xff] }
 0x380   :  { %v3718_v53 = vpop.eup %3717  ;;  %v1833_v10 = vmul.f32 1.442695, %v1751_v43  ;;  %v1752_v43 = vmul.f32 %v1688_v51, %v4869_v22 }
 0x381   :  { %v4876_v31 = vpop.f32.mrf.mxu3  ;;  %1942 = vst.msk [vmem:[#allocation2 + $0x88] sm:$0xff] %vm312_vm10, %v3718_v53 }
 0x382   :  { %6242 = vst [vmem:[#allocation20_spill] sm:$0xff] %v4876_v31  ;;  %v1513_v36 = vpop.f32.mrf.mxu0  ;;  %3719 = vpow2.f32 %v1833_v10  ;;  %v1835_v29 = vmul.f32 1.442695, %v1752_v43  ;;  %v1689_v10 = vld [vmem:[%s6191_s6 + $0xa0] sm:$0xff] }
 0x383   :  { %2077 = vrot.lane.b32.xlu2 %v1513_v36, %s3853_s5 }
 0x384   :  { %3721 = vpow2.f32 %v1835_v29 }
 0x385   :  { %3556 = vmatmul.msk.f32.gmra.mxu0 %vm53_vm0, %v1228_v62  ;;  %v1229_v62 = vmul.f32 %v1165_v12, %v4519_v46  ;;  %v1166_v46 = vld [vmem:[%s6195_s10 + $0xf0] sm:$0xff] }
 0x386   :  { %v4907_v31 = vpop.f32.mrf.mxu2  ;;  %3445 = vmatmul.msk.f32.gmra.mxu2 %vm53_vm0, %v4511_v14  ;;  %v1690_v14 = vld [vmem:[%s6191_s6 + $0xa8] sm:$0xff] }
 0x387   :  { %v1754_v29 = vmul.f32 %v1690_v14, %v4907_v31 }
 0x388   :  { %v3720_v53 = vpop.eup %3719 }
 0x389   :  { %v4893_v61 = vpop.f32.mrf.mxu3  ;;  %1943 = vst.msk [vmem:[#allocation2 + $0x90] sm:$0xff] %vm312_vm10, %v3720_v53  ;;  %v4919_v53 = vpop.permute.xlu2 %2055 }
 0x38a   :  { %6243 = vst [vmem:[#allocation21_spill] sm:$0xff] %v4893_v61  ;;  %v1516_v36 = vpop.f32.mrf.mxu0  ;;  %v1753_v61 = vmul.f32 %v1689_v10, %v4886_v13  ;;  %v3722_v43 = vpop.eup %3721 }
 0x38b   :  { %2079 = vrot.lane.b32.xlu1 %v1516_v36, %s3853_s5  ;;  %6244 = vst [vmem:[#allocation22_spill] sm:$0xff] %v4919_v53 }
 0x38c   :  { %v1837_v36 = vmul.f32 1.442695, %v1753_v61  ;;  %1944 = vst.msk [vmem:[#allocation2 + $0x98] sm:$0xff] %vm312_vm10, %v3722_v43 }
 0x38d   :  { %3557 = vmatmul.msk.f32.gmra.mxu0 %vm53_vm0, %v1229_v62  ;;  %v1230_v62 = vmul.f32 %v1166_v46, %v4534_v41  ;;  %v1167_v41 = vld [vmem:[%s6195_s10 + $0xf8] sm:$0xff]  ;;  %v2246_v46 = vmul.f32 %v4919_v53, %v4274_v56 }
 0x38e   :  { %3723 = vpow2.f32 %v1837_v36  ;;  %v4926_v61 = vpop.f32.mrf.mxu2  ;;  %3446 = vmatmul.msk.f32.gmra.mxu2 %vm53_vm0, %v4526_v54  ;;  %v1231_v43 = vmul.f32 %v1167_v41, %v4548_v7  ;;  %v1691_v54 = vld [vmem:[%s6191_s6 + $0xb0] sm:$0xff]  ;;  %v1168_v7 = vld [vmem:[%s6195_s10 + $0x100] sm:$0xff] }
 0x38f   :  { %v1755_v56 = vmul.f32 %v1691_v54, %v4926_v61  ;;  %v1188_v54 = vld [vmem:[%s6195_s10 + $0x1a0] sm:$0xff] }
 0x391   :  { %v4914_v12 = vpop.f32.mrf.mxu3 }
 0x392   :  { %v1519_v51 = vpop.f32.mrf.mxu0 }
 0x393   :  { %2081 = vrot.lane.b32.xlu1 %v1519_v51, %s3853_s5  ;;  %v1839_v51 = vmul.f32 1.442695, %v1754_v29  ;;  %v1841_v29 = vmul.f32 1.442695, %v1755_v56 }
 0x394   :  { %v3724_v10 = vpop.eup %3723 }
 0x395   :  { %3558 = vmatmul.msk.f32.gmra.mxu0 %vm53_vm0, %v1230_v62  ;;  %1945 = vst.msk [vmem:[#allocation2 + $0xa0] sm:$0xff] %vm312_vm10, %v3724_v10  ;;  %3725 = vpow2.f32 %v1839_v51  ;;  %v1232_v51 = vmul.f32 %v1168_v7, %v4562_v25  ;;  %v1169_v7 = vld [vmem:[%s6195_s10 + $0x108] sm:$0xff] }
 0x396   :  { %v4946_v14 = vpop.f32.mrf.mxu2  ;;  %3447 = vmatmul.msk.f32.gmra.mxu2 %vm53_vm0, %v4540_v47  ;;  %3727 = vpow2.f32 %v1841_v29 }
 0x399   :  { %v4935_v36 = vpop.f32.mrf.mxu3 }
 0x39a   :  { %v1522_v62 = vpop.f32.mrf.mxu0 }
 0x39b   :  { %2375 = vrot.lane.b32.xlu1 %v2246_v46, %s3853_s5  ;;  %2083 = vrot.lane.b32.xlu0 %v1522_v62, %s3853_s5  ;;  %v3726_v41 = vpop.eup %3725 }
 0x39c   :  { %1946 = vst.msk [vmem:[#allocation2 + $0xa8] sm:$0xff] %vm312_vm10, %v3726_v41  ;;  %v3728_v25 = vpop.eup %3727 }
 0x39d   :  { %3559 = vmatmul.msk.f32.gmra.mxu0 %vm53_vm0, %v1231_v43  ;;  %1947 = vst.msk [vmem:[#allocation2 + $0xb0] sm:$0xff] %vm312_vm10, %v3728_v25 }
 0x39e   :  { %v4968_v56 = vpop.f32.mrf.mxu2  ;;  %3448 = vmatmul.msk.f32.gmra.mxu2 %vm53_vm0, %v4554_v50  ;;  %v1692_v50 = vld [vmem:[%s6191_s6 + $0xb8] sm:$0xff] }
 0x3a1   :  { %v4953_v10 = vpop.f32.mrf.mxu3 }
 0x3a2   :  { %v1525_v46 = vpop.f32.mrf.mxu0 }
 0x3a3   :  { %2085 = vrot.lane.b32.xlu0 %v1525_v46, %s3853_s5 }
 0x3a5   :  { %v4958_v62 = vpop.permute.xlu1 %2057  ;;  %v4960_v43 = vpop.permute.xlu2 %2063  ;;  %3560 = vmatmul.msk.f32.gmra.mxu0 %vm53_vm0, %v1232_v51  ;;  %v1233_v51 = vmul.f32 %v1169_v7, %v4576_v40  ;;  %v1189_v40 = vld [vmem:[%s6195_s10 + $0x1a8] sm:$0xff] }
 0x3a6   :  { %6245 = vst [vmem:[#allocation23_spill] sm:$0xff] %v4958_v62  ;;  %v2247_v47 = vmul.f32 %v4958_v62, %v4290_v2  ;;  %v2250_v29 = vmul.f32 %v4960_v43, %v4334_v33  ;;  %v1756_v33 = vmul.f32 %v1692_v50, %v4946_v14  ;;  %v4995_v7 = vpop.f32.mrf.mxu2  ;;  %3449 = vmatmul.msk.f32.gmra.mxu2 %vm53_vm0, %v4568_v52 }
 0x3a8   :  { %2377 = vrot.lane.b32.xlu1 %v2247_v47, %s3853_s5  ;;  %v1843_v25 = vmul.f32 1.442695, %v1756_v33 }
 0x3a9   :  { %v1100_v2 = vpop.f32.mrf.mxu3 }
 0x3aa   :  { %v1252_v41 = vmul.f32 %v1188_v54, %v1100_v2  ;;  %v1528_v46 = vpop.f32.mrf.mxu0  ;;  %v1693_v2 = vld [vmem:[%s6191_s6 + $0xc0] sm:$0xff]  ;;  %3729 = vpow2.f32 %v1843_v25 }
 0x3ab   :  { %2383 = vrot.lane.b32.xlu0 %v2250_v29, %s3853_s5  ;;  %2087 = vrot.lane.b32.xlu2 %v1528_v46, %s3853_s5  ;;  %v1170_v29 = vld [vmem:[%s6195_s10 + $0x110] sm:$0xff]  ;;  %v1757_v50 = vmul.f32 %v1693_v2, %v4968_v56 }
 0x3ac   :  { %3580 = vmatmul.msk.f32.vlgmr.msra.gmra.mxu1 %vm53_vm0, %v1252_v41  ;;  %v1234_v53 = vmul.f32 %v1170_v29, %v4590_v57  ;;  %v1171_v57 = vld [vmem:[%s6195_s10 + $0x118] sm:$0xff] }
 0x3ad   :  { %3561 = vmatmul.msk.f32.gmra.mxu0 %vm53_vm0, %v1233_v51  ;;  %v4988_v47 = vpop.permute.xlu0 %2059  ;;  %v4990_v54 = vpop.permute.xlu2 %2065  ;;  %v1845_v62 = vmul.f32 1.442695, %v1757_v50  ;;  %v1191_v50 = vld [vmem:[%s6195_s10 + $0x1b8] sm:$0xff] }
 0x3ae   :  { %v2248_v41 = vmul.f32 %v4988_v47, %v4306_v18  ;;  %v2251_v46 = vmul.f32 %v4990_v54, %v4351_v39  ;;  %v1190_v39 = vld [vmem:[%s6195_s10 + $0x1b0] sm:$0xff]  ;;  %v5018_v25 = vpop.f32.mrf.mxu2  ;;  %3450 = vmatmul.msk.f32.gmra.mxu2 %vm53_vm0, %v4582_v0  ;;  %v1235_v0 = vmul.f32 %v1171_v57, %v4604_v11  ;;  %v1172_v11 = vld [vmem:[%s6195_s10 + $0x120] sm:$0xff] }
 0x3af   :  { %3731 = vpow2.f32 %v1845_v62 }
 0x3b0   :  { %v3730_v18 = vpop.eup %3729 }
 0x3b1   :  { %v1103_v51 = vpop.f32.mrf.mxu3  ;;  %1948 = vst.msk [vmem:[#allocation2 + $0xb8] sm:$0xff] %vm312_vm10, %v3730_v18 }
 0x3b2   :  { %v1531_v33 = vpop.f32.mrf.mxu0  ;;  %v1253_v52 = vmul.f32 %v1189_v40, %v1103_v51 }
 0x3b3   :  { %2385 = vrot.lane.b32.xlu0 %v2251_v46, %s3853_s5  ;;  %2379 = vrot.lane.b32.xlu2 %v2248_v41, %s3853_s5 }
 0x3b4   :  { %3581 = vmatmul.msk.f32.gmra.mxu1 %vm53_vm0, %v1253_v52 }
 0x3b5   :  { %3562 = vmatmul.msk.f32.gmra.mxu0 %vm53_vm0, %v1234_v53  ;;  %v1694_v53 = vld [vmem:[%s6191_s6 + $0xc8] sm:$0xff]  ;;  %v5029_v62 = vpop.permute.xlu0 %2061  ;;  %v3732_v46 = vpop.eup %3731 }
 0x3b6   :  { %v1758_v29 = vmul.f32 %v1694_v53, %v4995_v7  ;;  %1949 = vst.msk [vmem:[#allocation2 + $0xc0] sm:$0xff] %vm312_vm10, %v3732_v46  ;;  %v5041_v52 = vpop.f32.mrf.mxu2  ;;  %3451 = vmatmul.msk.f32.gmra.mxu2 %vm53_vm0, %v4596_v17  ;;  %v2249_v18 = vmul.f32 %v5029_v62, %v4320_v27  ;;  %v2629_v46 = vld [vmem:[#allocation2] sm:$0xff] }
 0x3b7   :  { %v1192_v27 = vld [vmem:[%s6195_s10 + $0x1c0] sm:$0xff] }
 0x3b8   :  { %v1847_v51 = vmul.f32 1.442695, %v1758_v29 }
 0x3b9   :  { %v1106_v40 = vpop.f32.mrf.mxu3 }
 0x3ba   :  { %v1534_v2 = vpop.f32.mrf.mxu0  ;;  %v1254_v41 = vmul.f32 %v1190_v39, %v1106_v40  ;;  %3733 = vpow2.f32 %v1847_v51  ;;  %v2631_v51 = vmul.f32 0.0, %v2629_v46  ;;  %v1174_v46 = vld [vmem:[%s6195_s10 + $0x130] sm:$0xff] }
 0x3bb   :  { %2089 = vrot.lane.b32.xlu2 %v1531_v33, %s3853_s5  ;;  %2091 = vrot.lane.b32.xlu1 %v1534_v2, %s3853_s5  ;;  %v1695_v33 = vld [vmem:[%s6191_s6 + $0xd0] sm:$0xff]  ;;  %v1236_v2 = vmul.f32 %v1172_v11, %v4618_v35  ;;  %v1173_v35 = vld [vmem:[%s6195_s10 + $0x128] sm:$0xff] }
 0x3bc   :  { %3582 = vmatmul.msk.f32.gmra.mxu1 %vm53_vm0, %v1254_v41  ;;  %v1759_v53 = vmul.f32 %v1695_v33, %v5018_v25 }
 0x3bd   :  { %3563 = vmatmul.msk.f32.gmra.mxu0 %vm53_vm0, %v1235_v0 }
 0x3be   :  { %v1849_v41 = vmul.f32 1.442695, %v1759_v53  ;;  %v5063_v0 = vpop.f32.mrf.mxu2  ;;  %3452 = vmatmul.msk.f32.gmra.mxu2 %vm53_vm0, %v4610_v26  ;;  %v1237_v26 = vmul.f32 %v1173_v35, %v4637_v5 }
 0x3c0   :  { %v3734_v17 = vpop.eup %3733  ;;  %3735 = vpow2.f32 %v1849_v41 }
 0x3c1   :  { %v2374_v39 = vpop.permute.xlu0 %2373  ;;  %v1109_v57 = vpop.f32.mrf.mxu3  ;;  %1950 = vst.msk [vmem:[#allocation2 + $0xc8] sm:$0xff] %vm312_vm10, %v3734_v17 }
 0x3c2   :  { %2565 = vst.msk [vmem:[#allocation3] sm:$0xff] %vm312_vm10, %v2374_v39  ;;  %v1537_v40 = vpop.f32.mrf.mxu0  ;;  %v1255_v29 = vmul.f32 %v1191_v50, %v1109_v57  ;;  %v1696_v50 = vld [vmem:[%s6191_s6 + $0xd8] sm:$0xff] }
 0x3c3   :  { %2381 = vrot.lane.b32.xlu2 %v2249_v18, %s3853_s5  ;;  %v1760_v18 = vmul.f32 %v1696_v50, %v5041_v52 }
 0x3c4   :  { %3583 = vmatmul.msk.f32.gmra.mxu1 %vm53_vm0, %v1255_v29 }
 0x3c5   :  { %3564 = vmatmul.msk.f32.gmra.mxu0 %vm53_vm0, %v1236_v2  ;;  %v1851_v17 = vmul.f32 1.442695, %v1760_v18 }
 0x3c6   :  { %v3736_v29 = vpop.eup %3735  ;;  %v5091_v41 = vpop.f32.mrf.mxu2  ;;  %3453 = vmatmul.msk.f32.gmra.mxu2 %vm53_vm0, %v4625_v15 }
 0x3c7   :  { %1951 = vst.msk [vmem:[#allocation2 + $0xd0] sm:$0xff] %vm312_vm10, %v3736_v29  ;;  %3737 = vpow2.f32 %v1851_v17  ;;  %v1698_v17 = vld [vmem:[%s6191_s6 + $0xe8] sm:$0xff] }
 0x3c9   :  { %v2633_v11 = vld [vmem:[#allocation3] sm:$0xff]  ;;  %v1112_v33 = vpop.f32.mrf.mxu3 }
 0x3ca   :  { %v5074_v39 = vadd.f32 %v2633_v11, %v2631_v51  ;;  %v1540_v57 = vpop.f32.mrf.mxu0  ;;  %v1256_v53 = vmul.f32 %v1192_v27, %v1112_v33  ;;  %v1697_v27 = vld [vmem:[%s6191_s6 + $0xe0] sm:$0xff]  ;;  %v1238_v33 = vmul.f32 %v1174_v46, %v4656_v19  ;;  %v1194_v19 = vld [vmem:[%s6195_s10 + $0x1d0] sm:$0xff] }
 0x3cb   :  { %2093 = vrot.lane.b32.xlu2 %v1537_v40, %s3853_s5  ;;  %2095 = vrot.lane.b32.xlu0 %v1540_v57, %s3853_s5  ;;  %v1193_v40 = vld [vmem:[%s6195_s10 + $0x1c8] sm:$0xff]  ;;  %v1761_v35 = vmul.f32 %v1697_v27, %v5063_v0 }
 0x3cc   :  { %2637 = vst.msk [vmem:[#allocation4] sm:$0xff] %vm312_vm10, %v5074_v39  ;;  %3584 = vmatmul.msk.f32.gmra.mxu1 %vm53_vm0, %v1256_v53 }
 0x3cd   :  { %v5082_v2 = vpop.permute.xlu1 %2067  ;;  %3565 = vmatmul.msk.f32.gmra.mxu0 %vm53_vm0, %v1237_v26  ;;  %v3738_v11 = vpop.eup %3737  ;;  %v1853_v15 = vmul.f32 1.442695, %v1761_v35  ;;  %v1175_v26 = vld [vmem:[%s6195_s10 + $0x138] sm:$0xff] }
 0x3ce   :  { %v2252_v5 = vmul.f32 %v5082_v2, %v4368_v49  ;;  %1952 = vst.msk [vmem:[#allocation2 + $0xd8] sm:$0xff] %vm312_vm10, %v3738_v11  ;;  %v5117_v29 = vpop.f32.mrf.mxu2  ;;  %3454 = vmatmul.msk.f32.gmra.mxu2 %vm53_vm0, %v4644_v45  ;;  %v1239_v45 = vmul.f32 %v1175_v26, %v4679_v48  ;;  %v1195_v48 = vld [vmem:[%s6195_s10 + $0x1d8] sm:$0xff] }
 0x3cf   :  { %3739 = vpow2.f32 %v1853_v15 }
 0x3d0   :  { %2387 = vrot.lane.b32.xlu1 %v2252_v5, %s3853_s5 }
 0x3d1   :  { %v1115_v49 = vpop.f32.mrf.mxu3 }
 0x3d2   :  { %v1543_v51 = vpop.f32.mrf.mxu0  ;;  %v1257_v50 = vmul.f32 %v1193_v40, %v1115_v49  ;;  %v1762_v40 = vmul.f32 %v1698_v17, %v5091_v41 }
 0x3d3   :  { %2097 = vrot.lane.b32.xlu0 %v1543_v51, %s3853_s5 }
 0x3d4   :  { %3585 = vmatmul.msk.f32.gmra.mxu1 %vm53_vm0, %v1257_v50  ;;  %v1855_v35 = vmul.f32 1.442695, %v1762_v40 }
 0x3d5   :  { %v5107_v18 = vpop.permute.xlu1 %2069  ;;  %v5109_v57 = vpop.permute.xlu2 %2075  ;;  %3566 = vmatmul.msk.f32.gmra.mxu0 %vm53_vm0, %v1238_v33  ;;  %v1176_v33 = vld [vmem:[%s6195_s10 + $0x140] sm:$0xff] }
 0x3d6   :  { %v2253_v53 = vmul.f32 %v5107_v18, %v4385_v60  ;;  %v2256_v60 = vmul.f32 %v5109_v57, %v4672_v28  ;;  %v3740_v49 = vpop.eup %3739  ;;  %3741 = vpow2.f32 %v1855_v35  ;;  %v5145_v11 = vpop.f32.mrf.mxu2  ;;  %3455 = vmatmul.msk.f32.gmra.mxu2 %vm53_vm0, %v4666_v37 }
 0x3d7   :  { %1953 = vst.msk [vmem:[#allocation2 + $0xe0] sm:$0xff] %vm312_vm10, %v3740_v49 }
 0x3d8   :  { %2389 = vrot.lane.b32.xlu1 %v2253_v53, %s3853_s5 }
 0x3d9   :  { %v1118_v5 = vpop.f32.mrf.mxu3 }
 0x3da   :  { %v1546_v46 = vpop.f32.mrf.mxu0  ;;  %v1258_v27 = vmul.f32 %v1194_v19, %v1118_v5 }
 0x3db   :  { %2395 = vrot.lane.b32.xlu0 %v2256_v60, %s3853_s5  ;;  %v1240_v60 = vmul.f32 %v1176_v33, %v4703_v38 }
 0x3dc   :  { %3586 = vmatmul.msk.f32.gmra.mxu1 %vm53_vm0, %v1258_v27  ;;  %v3742_v17 = vpop.eup %3741  ;;  %v1177_v27 = vld [vmem:[%s6195_s10 + $0x148] sm:$0xff] }
 0x3dd   :  { %v5135_v51 = vpop.permute.xlu0 %2071  ;;  %3567 = vmatmul.msk.f32.gmra.mxu0 %vm53_vm0, %v1239_v45  ;;  %v5140_v50 = vpop.permute.xlu2 %2077  ;;  %1954 = vst.msk [vmem:[#allocation2 + $0xe8] sm:$0xff] %vm312_vm10, %v3742_v17 }
 0x3de   :  { %v2254_v28 = vmul.f32 %v5135_v51, %v4630_v1  ;;  %v1699_v1 = vld [vmem:[%s6191_s6 + $0xf0] sm:$0xff]  ;;  %v2257_v15 = vmul.f32 %v5140_v50, %v4696_v4  ;;  %v5172_v38 = vpop.f32.mrf.mxu2  ;;  %3456 = vmatmul.msk.f32.gmra.mxu2 %vm53_vm0, %v4689_v32  ;;  %v1241_v32 = vmul.f32 %v1177_v27, %v4732_v23 }
 0x3df   :  { %v1763_v19 = vmul.f32 %v1699_v1, %v5117_v29  ;;  %v1197_v1 = vld [vmem:[%s6195_s10 + $0x1e8] sm:$0xff]  ;;  %v1178_v23 = vld [vmem:[%s6195_s10 + $0x150] sm:$0xff] }
 0x3e0   :  { %2391 = vrot.lane.b32.xlu2 %v2254_v28, %s3853_s5  ;;  %2099 = vrot.lane.b32.xlu1 %v1546_v46, %s3853_s5  ;;  %v1196_v46 = vld [vmem:[%s6195_s10 + $0x1e0] sm:$0xff]  ;;  %v1242_v17 = vmul.f32 %v1178_v23, %v4756_v58 }
 0x3e1   :  { %v1121_v53 = vpop.f32.mrf.mxu3  ;;  %v1857_v5 = vmul.f32 1.442695, %v1763_v19 }
 0x3e2   :  { %v1549_v26 = vpop.f32.mrf.mxu0  ;;  %v1259_v37 = vmul.f32 %v1195_v48, %v1121_v53 }
 0x3e3   :  { %2397 = vrot.lane.b32.xlu0 %v2257_v15, %s3853_s5  ;;  %3743 = vpow2.f32 %v1857_v5  ;;  %v1179_v5 = vld [vmem:[%s6195_s10 + $0x158] sm:$0xff] }
 0x3e4   :  { %3587 = vmatmul.msk.f32.gmra.mxu1 %vm53_vm0, %v1259_v37  ;;  %v1243_v27 = vmul.f32 %v1179_v5, %v4780_v55  ;;  %v1181_v5 = vld [vmem:[%s6195_s10 + $0x168] sm:$0xff] }
 0x3e5   :  { %v5164_v40 = vpop.permute.xlu0 %2073  ;;  %3568 = vmatmul.msk.f32.gmra.mxu0 %vm53_vm0, %v1240_v60 }
 0x3e6   :  { %v2255_v4 = vmul.f32 %v5164_v40, %v4649_v6  ;;  %v1700_v6 = vld [vmem:[%s6191_s6 + $0xf8] sm:$0xff]  ;;  %v5192_v15 = vpop.f32.mrf.mxu2  ;;  %3457 = vmatmul.msk.f32.gmra.mxu2 %vm53_vm0, %v4713_v8  ;;  %v1198_v8 = vld [vmem:[%s6195_s10 + $0x1f0] sm:$0xff] }
 0x3e7   :  { %v1764_v45 = vmul.f32 %v1700_v6, %v5145_v11  ;;  %v1701_v6 = vld [vmem:[%s6191_s6 + $0x100] sm:$0xff] }
 0x3e8   :  { %2393 = vrot.lane.b32.xlu2 %v2255_v4, %s3853_s5  ;;  %2101 = vrot.lane.b32.xlu1 %v1549_v26, %s3853_s5 }
 0x3e9   :  { %v1124_v49 = vpop.f32.mrf.mxu3  ;;  %v3744_v48 = vpop.eup %3743  ;;  %v1859_v33 = vmul.f32 1.442695, %v1764_v45  ;;  %v1765_v45 = vmul.f32 %v1701_v6, %v5172_v38 }
 0x3ea   :  { %v1552_v35 = vpop.f32.mrf.mxu0  ;;  %v1260_v28 = vmul.f32 %v1196_v46, %v1124_v49  ;;  %1955 = vst.msk [vmem:[#allocation2 + $0xf0] sm:$0xff] %vm312_vm10, %v3744_v48 }
 0x3eb   :  { %3745 = vpow2.f32 %v1859_v33  ;;  %v1861_v48 = vmul.f32 1.442695, %v1765_v45 }
 0x3ec   :  { %3588 = vmatmul.msk.f32.gmra.mxu1 %vm53_vm0, %v1260_v28  ;;  %v1199_v28 = vld [vmem:[%s6195_s10 + $0x1f8] sm:$0xff] }
 0x3ed   :  { %3569 = vmatmul.msk.f32.gmra.mxu0 %vm53_vm0, %v1241_v32  ;;  %3747 = vpow2.f32 %v1861_v48 }
 0x3ee   :  { %v5207_v60 = vpop.f32.mrf.mxu2  ;;  %3458 = vmatmul.msk.f32.gmra.mxu2 %vm53_vm0, %v4742_v42  ;;  %v1702_v42 = vld [vmem:[%s6191_s6 + $0x108] sm:$0xff] }
 0x3ef   :  { %v1766_v55 = vmul.f32 %v1702_v42, %v5192_v15 }
 0x3f0   :  { %2103 = vrot.lane.b32.xlu2 %v1552_v35, %s3853_s5 }
 0x3f1   :  { %v1127_v53 = vpop.f32.mrf.mxu3  ;;  %v3746_v37 = vpop.eup %3745  ;;  %v1863_v32 = vmul.f32 1.442695, %v1766_v55 }
 0x3f2   :  { %v1555_v19 = vpop.f32.mrf.mxu0  ;;  %v1261_v26 = vmul.f32 %v1197_v1, %v1127_v53  ;;  %1956 = vst.msk [vmem:[#allocation2 + $0xf8] sm:$0xff] %vm312_vm10, %v3746_v37  ;;  %v1180_v1 = vld [vmem:[%s6195_s10 + $0x160] sm:$0xff] }
 0x3f3   :  { %3749 = vpow2.f32 %v1863_v32 }
 0x3f4   :  { %3589 = vmatmul.msk.f32.gmra.mxu1 %vm53_vm0, %v1261_v26 }
 0x3f5   :  { %3570 = vmatmul.msk.f32.gmra.mxu0 %vm53_vm0, %v1242_v17  ;;  %v3748_v17 = vpop.eup %3747 }
 0x3f6   :  { %v5234_v33 = vpop.f32.mrf.mxu2  ;;  %3459 = vmatmul.msk.f32.gmra.mxu2 %vm53_vm0, %v4766_v63  ;;  %1957 = vst.msk [vmem:[#allocation2 + $0x100] sm:$0xff] %vm312_vm10, %v3748_v17 }
 0x3f8   :  { %2105 = vrot.lane.b32.xlu2 %v1555_v19, %s3853_s5  ;;  %v1244_v19 = vmul.f32 %v1180_v1, %v4804_v30  ;;  %v1705_v1 = vld [vmem:[%s6191_s6 + $0x120] sm:$0xff] }
 0x3f9   :  { %v1130_v58 = vpop.f32.mrf.mxu3  ;;  %v3750_v30 = vpop.eup %3749 }
 0x3fa   :  { %v1558_v4 = vpop.f32.mrf.mxu0  ;;  %v1262_v46 = vmul.f32 %v1198_v8, %v1130_v58  ;;  %1958 = vst.msk [vmem:[#allocation2 + $0x108] sm:$0xff] %vm312_vm10, %v3750_v30 }
 0x3fb   :  { %2107 = vrot.lane.b32.xlu0 %v1558_v4, %s3853_s5 }
 0x3fc   :  { %3590 = vmatmul.msk.f32.gmra.mxu1 %vm53_vm0, %v1262_v46  ;;  %v1245_v46 = vmul.f32 %v1181_v5, %v4828_v16  ;;  %v6247_v16 = vld [vmem:[#allocation17_spill] sm:$0xff] }
 0x3fd   :  { %v5224_v49 = vpop.permute.xlu1 %2079  ;;  %3571 = vmatmul.msk.f32.gmra.mxu0 %vm53_vm0, %v1243_v27 }
 0x3fe   :  { %v2258_v35 = vmul.f32 %v5224_v49, %v4725_v20  ;;  %v5252_v8 = vpop.f32.mrf.mxu2  ;;  %3460 = vmatmul.msk.f32.gmra.mxu2 %vm53_vm0, %v4790_v9 }
 0x400   :  { %2399 = vrot.lane.b32.xlu1 %v2258_v35, %s3853_s5  ;;  %v1182_v35 = vld [vmem:[%s6195_s10 + $0x170] sm:$0xff] }
 0x401   :  { %v1133_v23 = vpop.f32.mrf.mxu3 }
 0x402   :  { %v1561_v20 = vpop.f32.mrf.mxu0  ;;  %v1263_v53 = vmul.f32 %v1199_v28, %v1133_v23  ;;  %v2630_v28 = vld [vmem:[#allocation2 + $0x8] sm:$0xff]  ;;  %v1246_v23 = vmul.f32 %v1182_v35, %v4852_v24  ;;  %v2650_v24 = vld [vmem:[#allocation2 + $0x18] sm:$0xff] }
 0x403   :  { %2109 = vrot.lane.b32.xlu0 %v1561_v20, %s3853_s5  ;;  %v1706_v35 = vld [vmem:[%s6191_s6 + $0x128] sm:$0xff] }
 0x404   :  { %3591 = vmatmul.msk.f32.gmra.mxu1 %vm53_vm0, %v1263_v53  ;;  %v1769_v53 = vmul.f32 %v1705_v1, %v5252_v8 }
 0x405   :  { %v5245_v26 = vpop.permute.xlu1 %2081  ;;  %v5247_v63 = vpop.permute.xlu2 %2087  ;;  %3572 = vmatmul.msk.f32.gmra.mxu0 %vm53_vm0, %v1244_v19 }
 0x406   :  { %6246 = vst [vmem:[#allocation24_spill] sm:$0xff] %v5247_v63  ;;  %v2259_v37 = vmul.f32 %v5245_v26, %v4749_v59  ;;  %v2262_v58 = vmul.f32 %v5247_v63, %v4821_v21  ;;  %v1703_v59 = vld [vmem:[%s6191_s6 + $0x110] sm:$0xff]  ;;  %v5277_v55 = vpop.f32.mrf.mxu2  ;;  %3461 = vmatmul.msk.f32.gmra.mxu2 %vm53_vm0, %v6247_v16  ;;  %v1869_v5 = vmul.f32 1.442695, %v1769_v53 }
 0x407   :  { %v1767_v9 = vmul.f32 %v1703_v59, %v5207_v60  ;;  %v1770_v1 = vmul.f32 %v1706_v35, %v5277_v55 }
 0x408   :  { %2401 = vrot.lane.b32.xlu1 %v2259_v37, %s3853_s5  ;;  %v2632_v37 = vmul.f32 0.0, %v2630_v28  ;;  %v6251_v28 = vld [vmem:[#allocation20_spill] sm:$0xff] }
 0x409   :  { %v1865_v27 = vmul.f32 1.442695, %v1767_v9 }
 0x40a   :  { %v1564_v4 = vpop.f32.mrf.mxu0 }
 0x40b   :  { %2407 = vrot.lane.b32.xlu0 %v2262_v58, %s3853_s5  ;;  %3751 = vpow2.f32 %v1865_v27  ;;  %v6250_v27 = vld [vmem:[#allocation18_spill] sm:$0xff] }
 0x40d   :  { %v2376_v6 = vpop.permute.xlu1 %2375  ;;  %v5270_v42 = vpop.permute.xlu0 %2083  ;;  %3573 = vmatmul.msk.f32.gmra.mxu0 %vm53_vm0, %v1245_v46 }
 0x40e   :  { %2566 = vst.msk [vmem:[#allocation3 + $0x8] sm:$0xff] %vm312_vm10, %v2376_v6  ;;  %v2260_v21 = vmul.f32 %v5270_v42, %v4773_v34  ;;  %v2380_v45 = vpop.permute.xlu2 %2379  ;;  %v1704_v34 = vld [vmem:[%s6191_s6 + $0x118] sm:$0xff]  ;;  %v5305_v46 = vpop.f32.mrf.mxu2  ;;  %3462 = vmatmul.msk.f32.gmra.mxu2 %vm53_vm0, %v6250_v27  ;;  %v6253_v27 = vld [vmem:[#allocation21_spill] sm:$0xff] }
 0x40f   :  { %2568 = vst.msk [vmem:[#allocation3 + $0x18] sm:$0xff] %vm312_vm10, %v2380_v45  ;;  %v1768_v48 = vmul.f32 %v1704_v34, %v5234_v33  ;;  %v1183_v6 = vld [vmem:[%s6195_s10 + $0x178] sm:$0xff] }
 0x410   :  { %2403 = vrot.lane.b32.xlu2 %v2260_v21, %s3853_s5  ;;  %2111 = vrot.lane.b32.xlu1 %v1564_v4, %s3853_s5 }
 0x411   :  { %v1867_v20 = vmul.f32 1.442695, %v1768_v48  ;;  %v3752_v19 = vpop.eup %3751  ;;  %v1247_v48 = vmul.f32 %v1183_v6, %v6251_v28 }
 0x412   :  { %v1567_v32 = vpop.f32.mrf.mxu0  ;;  %1959 = vst.msk [vmem:[#allocation2 + $0x110] sm:$0xff] %vm312_vm10, %v3752_v19 }
 0x413   :  { %3753 = vpow2.f32 %v1867_v20  ;;  %v1871_v20 = vmul.f32 1.442695, %v1770_v1 }
 0x414   :  { %3755 = vpow2.f32 %v1869_v5  ;;  %v2649_v5 = vld [vmem:[#allocation2 + $0x10] sm:$0xff] }
 0x415   :  { %v2634_v17 = vld [vmem:[#allocation3 + $0x8] sm:$0xff]  ;;  %v5295_v30 = vpop.permute.xlu0 %2085  ;;  %3574 = vmatmul.msk.f32.gmra.mxu0 %vm53_vm0, %v1246_v23  ;;  %3757 = vpow2.f32 %v1871_v20 }
 0x416   :  { %6248 = vst [vmem:[#allocation17_spill] sm:$0xff] %v5295_v30  ;;  %v2636_v58 = vadd.f32 %v2634_v17, %v2632_v37  ;;  %v2261_v59 = vmul.f32 %v5295_v30, %v4797_v44  ;;  %v5301_v4 = vpop.permute.xlu2 %2089  ;;  %v2654_v44 = vld [vmem:[#allocation3 + $0x18] sm:$0xff]  ;;  %v5327_v19 = vpop.f32.mrf.mxu2  ;;  %v1184_v17 = vld [vmem:[%s6195_s10 + $0x180] sm:$0xff] }
 0x417   :  { %6249 = vst [vmem:[#allocation25_spill] sm:$0xff] %v5301_v4  ;;  %v2263_v9 = vmul.f32 %v5301_v4, %v4845_v3  ;;  %v6252_v37 = vld [vmem:[#allocation19_spill] sm:$0xff]  ;;  %v1248_v6 = vmul.f32 %v1184_v17, %v6253_v27 }
 0x418   :  { %2638 = vst.msk [vmem:[#allocation4 + $0x8] sm:$0xff] %vm312_vm10, %v2636_v58  ;;  %v2652_v21 = vmul.f32 %v2650_v24, %v2636_v58  ;;  %2405 = vrot.lane.b32.xlu2 %v2261_v59, %s3853_s5  ;;  %2113 = vrot.lane.b32.xlu1 %v1567_v32, %s3853_s5  ;;  %v2651_v58 = vmul.f32 %v2649_v5, %v5074_v39 }
 0x419   :  { %2409 = vrot.lane.b32.xlu0 %v2263_v9, %s3853_s5  ;;  %v3754_v34 = vpop.eup %3753  ;;  %3463 = vmatmul.msk.f32.gmra.mxu2 %vm53_vm0, %v6252_v37  ;;  %v1707_v9 = vld [vmem:[%s6191_s6 + $0x130] sm:$0xff] }
 0x41a   :  { %v2656_v3 = vadd.f32 %v2654_v44, %v2652_v21  ;;  %v2378_v45 = vpop.permute.xlu1 %2377  ;;  %v1570_v16 = vpop.f32.mrf.mxu0  ;;  %1960 = vst.msk [vmem:[#allocation2 + $0x118] sm:$0xff] %vm312_vm10, %v3754_v34  ;;  %v2670_v44 = vld [vmem:[#allocation2 + $0x28] sm:$0xff]  ;;  %v2669_v34 = vld [vmem:[#allocation2 + $0x20] sm:$0xff] }
 0x41b   :  { %2567 = vst.msk [vmem:[#allocation3 + $0x10] sm:$0xff] %vm312_vm10, %v2378_v45  ;;  %v3756_v32 = vpop.eup %3755  ;;  %v1771_v45 = vmul.f32 %v1707_v9, %v5305_v46 }
 0x41c   :  { %2658 = vst.msk [vmem:[#allocation4 + $0x18] sm:$0xff] %vm312_vm10, %v2656_v3  ;;  %v2672_v35 = vmul.f32 %v2670_v44, %v2656_v3  ;;  %v3758_v28 = vpop.eup %3757 }
 0x41d   :  { %v2384_v23 = vpop.permute.xlu0 %2383  ;;  %3575 = vmatmul.msk.f32.gmra.mxu0 %vm53_vm0, %v1247_v48  ;;  %1961 = vst.msk [vmem:[#allocation2 + $0x120] sm:$0xff] %vm312_vm10, %v3756_v32  ;;  %v1873_v1 = vmul.f32 1.442695, %v1771_v45 }
 0x41e   :  { %2570 = vst.msk [vmem:[#allocation3 + $0x28] sm:$0xff] %vm312_vm10, %v2384_v23  ;;  %v2382_v53 = vpop.permute.xlu2 %2381  ;;  %v5348_v3 = vpop.f32.mrf.mxu2 }
 0x41f   :  { %2569 = vst.msk [vmem:[#allocation3 + $0x20] sm:$0xff] %vm312_vm10, %v2382_v53  ;;  %3759 = vpow2.f32 %v1873_v1  ;;  %v1185_v53 = vld [vmem:[%s6195_s10 + $0x188] sm:$0xff] }
 0x420   :  { %2115 = vrot.lane.b32.xlu2 %v1570_v16, %s3853_s5  ;;  %1962 = vst.msk [vmem:[#allocation2 + $0x128] sm:$0xff] %vm312_vm10, %v3758_v28  ;;  %v1249_v5 = vmul.f32 %v1185_v53, %v4914_v12 }
 0x422   :  { %v2653_v59 = vld [vmem:[#allocation3 + $0x10] sm:$0xff]  ;;  %v1573_v24 = vpop.f32.mrf.mxu0 }
 0x423   :  { %v2655_v21 = vadd.f32 %v2653_v59, %v2651_v58  ;;  %v2689_v58 = vld [vmem:[#allocation2 + $0x30] sm:$0xff] }
 0x425   :  { %2657 = vst.msk [vmem:[#allocation4 + $0x10] sm:$0xff] %vm312_vm10, %v2655_v21  ;;  %v2674_v16 = vld [vmem:[#allocation3 + $0x28] sm:$0xff]  ;;  %v2671_v48 = vmul.f32 %v2669_v34, %v2655_v21  ;;  %v2386_v39 = vpop.permute.xlu0 %2385  ;;  %3576 = vmatmul.msk.f32.gmra.mxu0 %vm53_vm0, %v1248_v6  ;;  %v3760_v9 = vpop.eup %3759 }
 0x426   :  { %v5344_v32 = vadd.f32 %v2674_v16, %v2672_v35  ;;  %v2673_v23 = vld [vmem:[#allocation3 + $0x20] sm:$0xff]  ;;  %2571 = vst.msk [vmem:[#allocation3 + $0x30] sm:$0xff] %vm312_vm10, %v2386_v39  ;;  %v5371_v45 = vpop.f32.mrf.mxu2  ;;  %v1186_v35 = vld [vmem:[%s6195_s10 + $0x190] sm:$0xff]  ;;  %v5379_v16 = vpop.permute.xlu2 %2093 }
 0x427   :  { %v2675_v20 = vadd.f32 %v2673_v23, %v2671_v48  ;;  %1963 = vst.msk [vmem:[#allocation2 + $0x130] sm:$0xff] %vm312_vm10, %v3760_v9  ;;  %v1250_v48 = vmul.f32 %v1186_v35, %v4935_v36  ;;  %v1187_v23 = vld [vmem:[%s6195_s10 + $0x198] sm:$0xff]  ;;  %v2265_v9 = vmul.f32 %v5379_v16, %v4886_v13 }
 0x428   :  { %2678 = vst.msk [vmem:[#allocation4 + $0x28] sm:$0xff] %vm312_vm10, %v5344_v32  ;;  %2117 = vrot.lane.b32.xlu2 %v1573_v24, %s3853_s5  ;;  %v1708_v24 = vld [vmem:[%s6191_s6 + $0x138] sm:$0xff] }
 0x429   :  { %2677 = vst.msk [vmem:[#allocation4 + $0x20] sm:$0xff] %vm312_vm10, %v2675_v20  ;;  %v1633_v37 = vpop.f32.mrf.mxu1  ;;  %v2691_v59 = vmul.f32 %v2689_v58, %v2675_v20  ;;  %v1772_v12 = vmul.f32 %v1708_v24, %v5327_v19  ;;  %v1709_v20 = vld [vmem:[%s6191_s6 + $0x140] sm:$0xff] }
 0x42a   :  { %2157 = vrot.lane.b32.xlu0 %v1633_v37, %s3853_s5  ;;  %v1576_v17 = vpop.f32.mrf.mxu0  ;;  %v1773_v36 = vmul.f32 %v1709_v20, %v5348_v3 }
 0x42b   :  { %v1875_v34 = vmul.f32 1.442695, %v1772_v12 }
 0x42c   :  { %v1877_v58 = vmul.f32 1.442695, %v1773_v36  ;;  %v2690_v36 = vld [vmem:[#allocation2 + $0x38] sm:$0xff] }
 0x42d   :  { %v2693_v27 = vld [vmem:[#allocation3 + $0x30] sm:$0xff]  ;;  %v5359_v6 = vpop.permute.xlu1 %2091  ;;  %3577 = vmatmul.msk.f32.gmra.mxu0 %vm53_vm0, %v1249_v5  ;;  %3761 = vpow2.f32 %v1875_v34  ;;  %v1251_v5 = vmul.f32 %v1187_v23, %v4953_v10  ;;  %v1710_v10 = vld [vmem:[%s6191_s6 + $0x148] sm:$0xff] }
 0x42e   :  { %6254 = vst [vmem:[#allocation18_spill] sm:$0xff] %v5359_v6  ;;  %v5365_v21 = vadd.f32 %v2693_v27, %v2691_v59  ;;  %v2264_v44 = vmul.f32 %v5359_v6, %v4869_v22  ;;  %v5384_v39 = vpop.f32.mrf.mxu2  ;;  %3763 = vpow2.f32 %v1877_v58  ;;  %v1774_v13 = vmul.f32 %v1710_v10, %v5371_v45 }
 0x430   :  { %2697 = vst.msk [vmem:[#allocation4 + $0x30] sm:$0xff] %vm312_vm10, %v5365_v21  ;;  %2411 = vrot.lane.b32.xlu1 %v2264_v44, %s3853_s5  ;;  %v1711_v44 = vld [vmem:[%s6191_s6 + $0x150] sm:$0xff] }
 0x431   :  { %v1636_v28 = vpop.f32.mrf.mxu1  ;;  %v1775_v35 = vmul.f32 %v1711_v44, %v5384_v39 }
 0x432   :  { %2119 = vrot.lane.b32.xlu0 %v1576_v17, %s3853_s5  ;;  %v1579_v22 = vpop.f32.mrf.mxu0 }
 0x433   :  { %v3762_v1 = vpop.eup %3761 }
 0x434   :  { %1964 = vst.msk [vmem:[#allocation2 + $0x138] sm:$0xff] %vm312_vm10, %v3762_v1  ;;  %v1881_v1 = vmul.f32 1.442695, %v1775_v35 }
 0x435   :  { %3578 = vmatmul.msk.f32.gmra.mxu0 %vm53_vm0, %v1250_v48  ;;  %v1879_v48 = vmul.f32 1.442695, %v1774_v13 }
 0x436   :  { %v5405_v24 = vpop.f32.mrf.mxu2 }
 0x437   :  { %3765 = vpow2.f32 %v1879_v48 }
 0x438   :  { %2159 = vrot.lane.b32.xlu1 %v1636_v28, %s3853_s5  ;;  %v3764_v28 = vpop.eup %3763  ;;  %3767 = vpow2.f32 %v1881_v1 }
 0x439   :  { %v1639_v53 = vpop.f32.mrf.mxu1  ;;  %1965 = vst.msk [vmem:[#allocation2 + $0x140] sm:$0xff] %vm312_vm10, %v3764_v28 }
 0x43a   :  { %2121 = vrot.lane.b32.xlu0 %v1579_v22, %s3853_s5  ;;  %v2392_v37 = vpop.permute.xlu2 %2391  ;;  %v1582_v17 = vpop.f32.mrf.mxu0 }
 0x43b   :  { %2574 = vst.msk [vmem:[#allocation3 + $0x48] sm:$0xff] %vm312_vm10, %v2392_v37  ;;  %v1712_v37 = vld [vmem:[%s6191_s6 + $0x158] sm:$0xff] }
 0x43d   :  { %v5398_v59 = vpop.permute.xlu0 %2095  ;;  %3579 = vmatmul.msk.f32.gmra.mxu0 %vm53_vm0, %v1251_v5  ;;  %v2692_v5 = vmul.f32 %v2690_v36, %v5344_v32  ;;  %v3766_v44 = vpop.eup %3765 }
 0x43e   :  { %v2266_v27 = vmul.f32 %v5398_v59, %v4907_v31  ;;  %v5424_v20 = vpop.f32.mrf.mxu2  ;;  %1966 = vst.msk [vmem:[#allocation2 + $0x148] sm:$0xff] %vm312_vm10, %v3766_v44 }
 0x440   :  { %2413 = vrot.lane.b32.xlu1 %v2265_v9, %s3853_s5  ;;  %2415 = vrot.lane.b32.xlu2 %v2266_v27, %s3853_s5  ;;  %v1776_v9 = vmul.f32 %v1712_v37, %v5405_v24  ;;  %v2709_v37 = vld [vmem:[#allocation2 + $0x40] sm:$0xff] }
 0x441   :  { %v1642_v12 = vpop.f32.mrf.mxu1 }
 0x442   :  { %v2388_v31 = vpop.permute.xlu1 %2387  ;;  %v2394_v34 = vpop.permute.xlu2 %2393  ;;  %v2714_v28 = vld [vmem:[#allocation3 + $0x48] sm:$0xff] }
 0x443   :  { %2572 = vst.msk [vmem:[#allocation3 + $0x38] sm:$0xff] %vm312_vm10, %v2388_v31  ;;  %v5418_v22 = vpop.f32.mrf.mxu0  ;;  %v3768_v31 = vpop.eup %3767 }
 0x444   :  { %2575 = vst.msk [vmem:[#allocation3 + $0x50] sm:$0xff] %vm312_vm10, %v2394_v34 }
 0x445   :  { %v5421_v23 = vpop.permute.xlu0 %2097  ;;  %1967 = vst.msk [vmem:[#allocation2 + $0x150] sm:$0xff] %vm312_vm10, %v3768_v31 }
 0x446   :  { %v2267_v48 = vmul.f32 %v5421_v23, %v4926_v61  ;;  %v5442_v36 = vpop.f32.mrf.mxu2  ;;  %v1713_v61 = vld [vmem:[%s6191_s6 + $0x160] sm:$0xff] }
 0x448   :  { %2161 = vrot.lane.b32.xlu1 %v1639_v53, %s3853_s5  ;;  %2163 = vrot.lane.b32.xlu2 %v1642_v12, %s3853_s5  ;;  %v1883_v53 = vmul.f32 1.442695, %v1776_v9  ;;  %v2710_v12 = vld [vmem:[#allocation2 + $0x48] sm:$0xff] }
 0x449   :  { %v1645_v58 = vpop.f32.mrf.mxu1 }
 0x44a   :  { %v2694_v27 = vld [vmem:[#allocation3 + $0x38] sm:$0xff]  ;;  %v2390_v10 = vpop.permute.xlu1 %2389  ;;  %3769 = vpow2.f32 %v1883_v53 }
 0x44b   :  { %v2696_v13 = vadd.f32 %v2694_v27, %v2692_v5  ;;  %2573 = vst.msk [vmem:[#allocation3 + $0x40] sm:$0xff] %vm312_vm10, %v2390_v10  ;;  %v5434_v35 = vpop.f32.mrf.mxu0  ;;  %v2711_v5 = vmul.f32 %v2709_v37, %v5365_v21  ;;  %v2730_v53 = vld [vmem:[#allocation2 + $0x58] sm:$0xff]  ;;  %v2729_v21 = vld [vmem:[#allocation2 + $0x50] sm:$0xff] }
 0x44d   :  { %2698 = vst.msk [vmem:[#allocation4 + $0x38] sm:$0xff] %vm312_vm10, %v2696_v13  ;;  %v2712_v34 = vmul.f32 %v2710_v12, %v2696_v13  ;;  %v2396_v32 = vpop.permute.xlu0 %2395 }
 0x44e   :  { %2576 = vst.msk [vmem:[#allocation3 + $0x58] sm:$0xff] %vm312_vm10, %v2396_v32 }
 0x44f   :  { %v2716_v1 = vadd.f32 %v2714_v28, %v2712_v34 }
 0x450   :  { %2417 = vrot.lane.b32.xlu2 %v2267_v48, %s3853_s5  ;;  %2123 = vrot.lane.b32.xlu1 %v1582_v17, %s3853_s5  ;;  %v3770_v44 = vpop.eup %3769  ;;  %v1777_v17 = vmul.f32 %v1713_v61, %v5424_v20  ;;  %v5462_v61 = vpop.f32.mrf.mxu2 }
 0x451   :  { %2718 = vst.msk [vmem:[#allocation4 + $0x48] sm:$0xff] %vm312_vm10, %v2716_v1  ;;  %v1648_v9 = vpop.f32.mrf.mxu1  ;;  %v2732_v34 = vmul.f32 %v2730_v53, %v2716_v1  ;;  %v5464_v1 = vpop.permute.xlu2 %2103 }
 0x452   :  { %v2713_v27 = vld [vmem:[#allocation3 + $0x40] sm:$0xff]  ;;  %v5448_v10 = vpop.permute.xlu1 %2099  ;;  %1968 = vst.msk [vmem:[#allocation2 + $0x158] sm:$0xff] %vm312_vm10, %v3770_v44  ;;  %v1885_v37 = vmul.f32 1.442695, %v1777_v17 }
 0x453   :  { %v2715_v13 = vadd.f32 %v2713_v27, %v2711_v5  ;;  %v2268_v31 = vmul.f32 %v5448_v10, %v4946_v14  ;;  %v1591_v12 = vpop.f32.mrf.mxu0  ;;  %v2733_v5 = vld [vmem:[#allocation3 + $0x50] sm:$0xff] }
 0x454   :  { %3771 = vpow2.f32 %v1885_v37 }
 0x455   :  { %2717 = vst.msk [vmem:[#allocation4 + $0x40] sm:$0xff] %vm312_vm10, %v2715_v13  ;;  %v2731_v32 = vmul.f32 %v2729_v21, %v2715_v13  ;;  %v2734_v28 = vld [vmem:[#allocation3 + $0x58] sm:$0xff]  ;;  %v2398_v48 = vpop.permute.xlu0 %2397  ;;  %2419 = vrot.lane.b32.xlu0 %v2268_v31, %s3853_s5  ;;  %v2749_v13 = vld [vmem:[#allocation2 + $0x60] sm:$0xff] }
 0x456   :  { %v5459_v27 = vadd.f32 %v2734_v28, %v2732_v34  ;;  %2577 = vst.msk [vmem:[#allocation3 + $0x60] sm:$0xff] %vm312_vm10, %v2398_v48  ;;  %v1714_v34 = vld [vmem:[%s6191_s6 + $0x168] sm:$0xff] }
 0x457   :  { %v2735_v14 = vadd.f32 %v2733_v5, %v2731_v32 }
 0x458   :  { %2738 = vst.msk [vmem:[#allocation4 + $0x58] sm:$0xff] %vm312_vm10, %v5459_v27  ;;  %2165 = vrot.lane.b32.xlu2 %v1645_v58, %s3853_s5  ;;  %2125 = vrot.lane.b32.xlu1 %v5418_v22, %s3853_s5  ;;  %v2270_v58 = vmul.f32 %v5464_v1, %v4995_v7  ;;  %v1778_v22 = vmul.f32 %v1714_v34, %v5442_v36  ;;  %v5482_v28 = vpop.f32.mrf.mxu2 }
 0x459   :  { %2737 = vst.msk [vmem:[#allocation4 + $0x50] sm:$0xff] %vm312_vm10, %v2735_v14  ;;  %v1651_v44 = vpop.f32.mrf.mxu1  ;;  %v2751_v31 = vmul.f32 %v2749_v13, %v2735_v14  ;;  %v5491_v37 = vpop.permute.xlu2 %2105 }
 0x45a   :  { %v3772_v17 = vpop.eup %3771  ;;  %v5486_v48 = vpop.permute.xlu1 %2101 }
 0x45b   :  { %v1594_v53 = vpop.f32.mrf.mxu0  ;;  %1969 = vst.msk [vmem:[#allocation2 + $0x160] sm:$0xff] %vm312_vm10, %v3772_v17  ;;  %v2269_v5 = vmul.f32 %v5486_v48, %v4968_v56  ;;  %v1716_v17 = vld [vmem:[%s6191_s6 + $0x178] sm:$0xff] }
 0x45d   :  { %v2753_v21 = vld [vmem:[#allocation3 + $0x60] sm:$0xff]  ;;  %2167 = vrot.lane.b32.xlu0 %v1648_v9, %s3853_s5  ;;  %v1887_v9 = vmul.f32 1.442695, %v1778_v22 }
 0x45e   :  { %v5478_v32 = vadd.f32 %v2753_v21, %v2751_v31  ;;  %v1780_v21 = vmul.f32 %v1716_v17, %v5482_v28 }
 0x45f   :  { %3773 = vpow2.f32 %v1887_v9 }
 0x460   :  { %2757 = vst.msk [vmem:[#allocation4 + $0x60] sm:$0xff] %vm312_vm10, %v5478_v32  ;;  %2423 = vrot.lane.b32.xlu1 %v2270_v58, %s3853_s5  ;;  %2127 = vrot.lane.b32.xlu2 %v5434_v35, %s3853_s5  ;;  %v5496_v13 = vpop.f32.mrf.mxu2  ;;  %v1715_v35 = vld [vmem:[%s6191_s6 + $0x170] sm:$0xff]  ;;  %v1891_v9 = vmul.f32 1.442695, %v1780_v21 }
 0x461   :  { %v1654_v7 = vpop.f32.mrf.mxu1  ;;  %v1779_v56 = vmul.f32 %v1715_v35, %v5462_v61 }
 0x463   :  { %v1597_v14 = vpop.f32.mrf.mxu0 }
 0x465   :  { %2421 = vrot.lane.b32.xlu0 %v2269_v5, %s3853_s5  ;;  %v3774_v31 = vpop.eup %3773  ;;  %v2271_v5 = vmul.f32 %v5491_v37, %v5018_v25 }
 0x466   :  { %1970 = vst.msk [vmem:[#allocation2 + $0x168] sm:$0xff] %vm312_vm10, %v3774_v31 }
 0x468   :  { %2171 = vrot.lane.b32.xlu1 %v1654_v7, %s3853_s5  ;;  %2129 = vrot.lane.b32.xlu2 %v1591_v12, %s3853_s5  ;;  %v1889_v12 = vmul.f32 1.442695, %v1779_v56  ;;  %v5519_v35 = vpop.f32.mrf.mxu2 }
 0x469   :  { %v1657_v22 = vpop.f32.mrf.mxu1 }
 0x46a   :  { %v2404_v34 = vpop.permute.xlu2 %2403  ;;  %3775 = vpow2.f32 %v1889_v12  ;;  %v1717_v12 = vld [vmem:[%s6191_s6 + $0x180] sm:$0xff] }
 0x46b   :  { %2580 = vst.msk [vmem:[#allocation3 + $0x78] sm:$0xff] %vm312_vm10, %v2404_v34  ;;  %v1600_v58 = vpop.f32.mrf.mxu0  ;;  %3777 = vpow2.f32 %v1891_v9  ;;  %v1781_v9 = vmul.f32 %v1717_v12, %v5496_v13 }
 0x46d   :  { %v5510_v7 = vpop.permute.xlu0 %2107  ;;  %2169 = vrot.lane.b32.xlu0 %v1651_v44, %s3853_s5 }
 0x46e   :  { %v2272_v31 = vmul.f32 %v5510_v7, %v5041_v52 }
 0x470   :  { %2425 = vrot.lane.b32.xlu1 %v2271_v5, %s3853_s5  ;;  %2427 = vrot.lane.b32.xlu2 %v2272_v31, %s3853_s5  ;;  %v3776_v21 = vpop.eup %3775  ;;  %v2750_v5 = vld [vmem:[#allocation2 + $0x68] sm:$0xff] }
 0x471   :  { %v3778_v34 = vpop.eup %3777  ;;  %v1660_v52 = vpop.f32.mrf.mxu1  ;;  %1971 = vst.msk [vmem:[#allocation2 + $0x170] sm:$0xff] %vm312_vm10, %v3776_v21  ;;  %v2752_v31 = vmul.f32 %v2750_v5, %v5459_v27 }
 0x472   :  { %v2400_v17 = vpop.permute.xlu1 %2399  ;;  %v2406_v56 = vpop.permute.xlu2 %2405  ;;  %1972 = vst.msk [vmem:[#allocation2 + $0x178] sm:$0xff] %vm312_vm10, %v3778_v34  ;;  %v2774_v5 = vld [vmem:[#allocation3 + $0x78] sm:$0xff] }
 0x473   :  { %2578 = vst.msk [vmem:[#allocation3 + $0x68] sm:$0xff] %vm312_vm10, %v2400_v17  ;;  %v5522_v44 = vpop.f32.mrf.mxu0  ;;  %v1893_v17 = vmul.f32 1.442695, %v1781_v9 }
 0x474   :  { %2581 = vst.msk [vmem:[#allocation3 + $0x80] sm:$0xff] %vm312_vm10, %v2406_v56 }
 0x475   :  { %v5525_v25 = vpop.permute.xlu0 %2109  ;;  %2131 = vrot.lane.b32.xlu0 %v1594_v53, %s3853_s5  ;;  %v1718_v53 = vld [vmem:[%s6191_s6 + $0x188] sm:$0xff]  ;;  %3779 = vpow2.f32 %v1893_v17 }
 0x476   :  { %v1782_v34 = vmul.f32 %v1718_v53, %v5519_v35  ;;  %v2273_v53 = vmul.f32 %v5525_v25, %v5063_v0  ;;  %v1719_v0 = vld [vmem:[%s6191_s6 + $0x190] sm:$0xff] }
 0x478   :  { %2173 = vrot.lane.b32.xlu1 %v1657_v22, %s3853_s5  ;;  %2175 = vrot.lane.b32.xlu2 %v1660_v52, %s3853_s5  ;;  %v5544_v22 = vpop.f32.mrf.mxu2  ;;  %v2770_v52 = vld [vmem:[#allocation2 + $0x78] sm:$0xff]  ;;  %v1895_v63 = vmul.f32 1.442695, %v1782_v34 }
 0x479   :  { %v1663_v17 = vpop.f32.mrf.mxu1 }
 0x47a   :  { %v2754_v56 = vld [vmem:[#allocation3 + $0x68] sm:$0xff]  ;;  %v2402_v21 = vpop.permute.xlu1 %2401  ;;  %3781 = vpow2.f32 %v1895_v63 }
 0x47b   :  { %v2756_v30 = vadd.f32 %v2754_v56, %v2752_v31  ;;  %2579 = vst.msk [vmem:[#allocation3 + $0x70] sm:$0xff] %vm312_vm10, %v2402_v21  ;;  %v5542_v12 = vpop.f32.mrf.mxu0  ;;  %v2769_v56 = vld [vmem:[#allocation2 + $0x70] sm:$0xff]  ;;  %v3780_v21 = vpop.eup %3779 }
 0x47c   :  { %1973 = vst.msk [vmem:[#allocation2 + $0x180] sm:$0xff] %vm312_vm10, %v3780_v21 }
 0x47d   :  { %2758 = vst.msk [vmem:[#allocation4 + $0x68] sm:$0xff] %vm312_vm10, %v2756_v30  ;;  %v2772_v27 = vmul.f32 %v2770_v52, %v2756_v30  ;;  %v2408_v9 = vpop.permute.xlu0 %2407  ;;  %2133 = vrot.lane.b32.xlu0 %v1597_v14, %s3853_s5  ;;  %v2771_v30 = vmul.f32 %v2769_v56, %v5478_v32  ;;  %v2790_v52 = vld [vmem:[#allocation2 + $0x88] sm:$0xff]  ;;  %v1783_v32 = vmul.f32 %v1719_v0, %v5544_v22  ;;  %v5573_v0 = vpop.permute.xlu2 %2115 }
 0x47e   :  { %2582 = vst.msk [vmem:[#allocation3 + $0x88] sm:$0xff] %vm312_vm10, %v2408_v9 }
 0x47f   :  { %v2776_v31 = vadd.f32 %v2774_v5, %v2772_v27  ;;  %v2789_v5 = vld [vmem:[#allocation2 + $0x80] sm:$0xff]  ;;  %v1897_v4 = vmul.f32 1.442695, %v1783_v32 }
 0x480   :  { %2429 = vrot.lane.b32.xlu2 %v2273_v53, %s3853_s5  ;;  %2135 = vrot.lane.b32.xlu1 %v1600_v58, %s3853_s5  ;;  %v3782_v9 = vpop.eup %3781  ;;  %v5568_v6 = vpop.f32.mrf.mxu2 }
 0x481   :  { %2778 = vst.msk [vmem:[#allocation4 + $0x78] sm:$0xff] %vm312_vm10, %v2776_v31  ;;  %v2792_v53 = vmul.f32 %v2790_v52, %v2776_v31  ;;  %3783 = vpow2.f32 %v1897_v4  ;;  %v1666_v52 = vpop.f32.mrf.mxu1 }
 0x482   :  { %v2773_v14 = vld [vmem:[#allocation3 + $0x70] sm:$0xff]  ;;  %v5555_v34 = vpop.permute.xlu1 %2111  ;;  %1974 = vst.msk [vmem:[#allocation2 + $0x188] sm:$0xff] %vm312_vm10, %v3782_v9 }
 0x483   :  { %v2775_v63 = vadd.f32 %v2773_v14, %v2771_v30  ;;  %v2274_v58 = vmul.f32 %v5555_v34, %v5091_v41  ;;  %v5563_v27 = vpop.f32.mrf.mxu0  ;;  %v2793_v30 = vld [vmem:[#allocation3 + $0x80] sm:$0xff] }
 0x484   :  { %v2978_v9 = vld [vmem:[#allocation4 + $0x68] sm:$0xff] }
 0x485   :  { %2777 = vst.msk [vmem:[#allocation4 + $0x70] sm:$0xff] %vm312_vm10, %v2775_v63  ;;  %v2791_v56 = vmul.f32 %v2789_v5, %v2775_v63  ;;  %v2794_v21 = vld [vmem:[#allocation3 + $0x88] sm:$0xff]  ;;  %2431 = vrot.lane.b32.xlu0 %v2274_v58, %s3853_s5 }
 0x486   :  { %v5570_v14 = vadd.f32 %v2794_v21, %v2792_v53  ;;  %v2977_v53 = vld [vmem:[#allocation4 + $0x60] sm:$0xff]  ;;  %v3042_v21 = vmul.f32 %v2978_v9, %v5224_v49 }
 0x487   :  { %v2795_v41 = vadd.f32 %v2793_v30, %v2791_v56  ;;  %v3784_v5 = vpop.eup %3783  ;;  %v1721_v49 = vld [vmem:[%s6191_s6 + $0x1a0] sm:$0xff] }
 0x488   :  { %2798 = vst.msk [vmem:[#allocation4 + $0x88] sm:$0xff] %vm312_vm10, %v5570_v14  ;;  %2177 = vrot.lane.b32.xlu2 %v1663_v17, %s3853_s5  ;;  %2137 = vrot.lane.b32.xlu1 %v5522_v44, %s3853_s5  ;;  %v2980_v31 = vld [vmem:[#allocation4 + $0x78] sm:$0xff]  ;;  %v5595_v30 = vpop.f32.mrf.mxu2 }
 0x489   :  { %2797 = vst.msk [vmem:[#allocation4 + $0x80] sm:$0xff] %vm312_vm10, %v2795_v41  ;;  %v3044_v63 = vmul.f32 %v2980_v31, %v5270_v42  ;;  %v1720_v44 = vld [vmem:[%s6191_s6 + $0x198] sm:$0xff]  ;;  %v2276_v42 = vmul.f32 %v5573_v0, %v5145_v11  ;;  %v2809_v11 = vld [vmem:[#allocation2 + $0x90] sm:$0xff] }
 0x48a   :  { %1975 = vst.msk [vmem:[#allocation2 + $0x190] sm:$0xff] %vm312_vm10, %v3784_v5  ;;  %v1784_v56 = vmul.f32 %v1720_v44, %v5568_v6  ;;  %v5597_v31 = vpop.permute.xlu1 %2113  ;;  %v2975_v5 = vld [vmem:[#allocation4 + $0x50] sm:$0xff] }
 0x48b   :  { %v2410_v58 = vpop.permute.xlu0 %2409  ;;  %v5582_v32 = vpop.f32.mrf.mxu0  ;;  %3101 = vmatpush.msrb.mxu1 %v3044_v63 }
 0x48c   :  { %2583 = vst.msk [vmem:[#allocation3 + $0x90] sm:$0xff] %vm312_vm10, %v2410_v58  ;;  %v2979_v4 = vld [vmem:[#allocation4 + $0x70] sm:$0xff]  ;;  %v1899_v63 = vmul.f32 1.442695, %v1784_v56  ;;  %v5603_v58 = vpop.permute.xlu2 %2117 }
 0x48d   :  { %2179 = vrot.lane.b32.xlu0 %v1666_v52, %s3853_s5  ;;  %v3043_v17 = vmul.f32 %v2979_v4, %v5245_v26  ;;  %v2976_v26 = vld [vmem:[#allocation4 + $0x58] sm:$0xff]  ;;  %v3041_v52 = vmul.f32 %v2977_v53, %v5140_v50  ;;  %6255 = vst [vmem:[#allocation20_spill] sm:$0xff] %v5603_v58  ;;  %v2811_v4 = vmul.f32 %v2809_v11, %v2795_v41  ;;  %v2974_v53 = vld [vmem:[#allocation4 + $0x48] sm:$0xff] }
 0x48e   :  { %3785 = vpow2.f32 %v1899_v63  ;;  %v3040_v44 = vmul.f32 %v2976_v26, %v5109_v57  ;;  %v3039_v41 = vmul.f32 %v2975_v5, %v5164_v40  ;;  %v3038_v57 = vmul.f32 %v2974_v53, %v5135_v51  ;;  %v2972_v63 = vld [vmem:[#allocation4 + $0x38] sm:$0xff]  ;;  %v2970_v5 = vld [vmem:[#allocation4 + $0x28] sm:$0xff] }
 0x48f   :  { %3102 = vmatpush.msrb.mxu1 %v3043_v17  ;;  %v2275_v17 = vmul.f32 %v5597_v31, %v5117_v29  ;;  %v2973_v29 = vld [vmem:[#allocation4 + $0x40] sm:$0xff]  ;;  %v3036_v51 = vmul.f32 %v2972_v63, %v5082_v2 }
 0x490   :  { %2435 = vrot.lane.b32.xlu1 %v2276_v42, %s3853_s5  ;;  %2139 = vrot.lane.b32.xlu2 %v5542_v12, %s3853_s5  ;;  %v1785_v42 = vmul.f32 %v1721_v49, %v5595_v30  ;;  %v3037_v40 = vmul.f32 %v2973_v29, %v5107_v18 }
 0x491   :  { %3103 = vmatpush.msrb.mxu1 %v3042_v21  ;;  %v2277_v21 = vmul.f32 %v5603_v58, %v5172_v38  ;;  %v5626_v38 = vpop.f32.mrf.mxu2 }
 0x492   :  { %v1901_v56 = vmul.f32 1.442695, %v1785_v42  ;;  %v2968_v42 = vld [vmem:[#allocation4 + $0x18] sm:$0xff] }
 0x493   :  { %v2813_v9 = vld [vmem:[#allocation3 + $0x90] sm:$0xff]  ;;  %v1615_v12 = vpop.f32.mrf.mxu0  ;;  %3104 = vmatpush.msrb.mxu1 %v3041_v52  ;;  %v3032_v29 = vmul.f32 %v2968_v42, %v4988_v47  ;;  %v2810_v47 = vld [vmem:[#allocation2 + $0x98] sm:$0xff]  ;;  %v2830_v42 = vld [vmem:[#allocation2 + $0xa8] sm:$0xff] }
 0x494   :  { %v5612_v50 = vadd.f32 %v2813_v9, %v2811_v4  ;;  %3787 = vpow2.f32 %v1901_v56  ;;  %v3786_v26 = vpop.eup %3785  ;;  %v2971_v52 = vld [vmem:[#allocation4 + $0x30] sm:$0xff]  ;;  %v1722_v9 = vld [vmem:[%s6191_s6 + $0x1a8] sm:$0xff] }
 0x495   :  { %3105 = vmatpush.msrb.mxu1 %v3040_v44  ;;  %2433 = vrot.lane.b32.xlu0 %v2275_v17, %s3853_s5  ;;  %1976 = vst.msk [vmem:[#allocation2 + $0x198] sm:$0xff] %vm312_vm10, %v3786_v26  ;;  %v3035_v18 = vmul.f32 %v2971_v52, %v4990_v54  ;;  %v2969_v17 = vld [vmem:[#allocation4 + $0x20] sm:$0xff]  ;;  %v1786_v2 = vmul.f32 %v1722_v9, %v5626_v38  ;;  %v6260_v52 = vld [vmem:[#allocation22_spill] sm:$0xff] }
 0x496   :  { %2817 = vst.msk [vmem:[#allocation4 + $0x90] sm:$0xff] %vm312_vm10, %v5612_v50  ;;  %v3034_v44 = vmul.f32 %v2970_v5, %v4960_v43 }
 0x497   :  { %3106 = vmatpush.msrb.mxu1 %v3039_v41  ;;  %v1903_v53 = vmul.f32 1.442695, %v1786_v2 }
 0x498   :  { %2437 = vrot.lane.b32.xlu1 %v2277_v21, %s3853_s5  ;;  %2141 = vrot.lane.b32.xlu2 %v5563_v27, %s3853_s5  ;;  %v2967_v21 = vld [vmem:[#allocation4 + $0x10] sm:$0xff] }
 0x499   :  { %3107 = vmatpush.msrb.mxu1 %v3038_v57  ;;  %v5643_v54 = vpop.f32.mrf.mxu2  ;;  %3789 = vpow2.f32 %v1903_v53  ;;  %v2966_v57 = vld [vmem:[#allocation4 + $0x8] sm:$0xff] }
 0x49a   :  { %v2416_v11 = vpop.permute.xlu2 %2415  ;;  %v3788_v49 = vpop.eup %3787 }
 0x49b   :  { %2586 = vst.msk [vmem:[#allocation3 + $0xa8] sm:$0xff] %vm312_vm10, %v2416_v11  ;;  %3108 = vmatpush.msrb.mxu1 %v3037_v40  ;;  %v1618_v27 = vpop.f32.mrf.mxu0  ;;  %v2965_v40 = vld [vmem:[#allocation4] sm:$0xff] }
 0x49c   :  { %v5630_v4 = vpop.permute.xlu0 %2157  ;;  %1977 = vst.msk [vmem:[#allocation2 + $0x1a0] sm:$0xff] %vm312_vm10, %v3788_v49  ;;  %v2812_v49 = vmul.f32 %v2810_v47, %v5570_v14 }
 0x49d   :  { %6256 = vst [vmem:[#allocation19_spill] sm:$0xff] %v5630_v4  ;;  %3109 = vmatpush.msrb.mxu1 %v3036_v51  ;;  %2143 = vrot.lane.b32.xlu0 %v5582_v32, %s3853_s5  ;;  %v3033_v32 = vmul.f32 %v2969_v17, %v5029_v62  ;;  %v6259_v62 = vld [vmem:[#allocation23_spill] sm:$0xff]  ;;  %v3030_v51 = vmul.f32 %v2966_v57, %v6260_v52  ;;  %v2953_v57 = vld [vmem:[%s6196_s11 + $0x20] sm:$0xff] }
 0x49e   :  { %v3031_v63 = vmul.f32 %v2967_v21, %v6259_v62  ;;  %v2297_v21 = vmul.f32 %v5630_v4, %v5595_v30  ;;  %v2829_v52 = vld [vmem:[#allocation2 + $0xa0] sm:$0xff] }
 0x49f   :  { %3110 = vmatpush.msrb.mxu1 %v3035_v18  ;;  %v3790_v5 = vpop.eup %3789 }
 0x4a0   :  { %2147 = vrot.lane.b32.xlu1 %v1618_v27, %s3853_s5  ;;  %1978 = vst.msk [vmem:[#allocation2 + $0x1a8] sm:$0xff] %vm312_vm10, %v3790_v5  ;;  %v2957_v5 = vld [vmem:[%s6196_s11 + $0x40] sm:$0xff] }
 0x4a1   :  { %3111 = vmatpush.msrb.mxu1 %v3034_v44  ;;  %v884_v44 = vpop.f32.mrf.mxu2 }
 0x4a2   :  { %v2412_v41 = vpop.permute.xlu1 %2411  ;;  %v5645_v56 = vpop.permute.xlu2 %2163 }
 0x4a3   :  { %6257 = vst [vmem:[#allocation21_spill] sm:$0xff] %v5645_v56  ;;  %3112 = vmatpush.msrb.mxu1 %v3033_v32  ;;  %v1621_v11 = vpop.f32.mrf.mxu0 }
 0x4a4   :  { %2584 = vst.msk [vmem:[#allocation3 + $0x98] sm:$0xff] %vm312_vm10, %v2412_v41  ;;  %v5649_v43 = vpop.permute.xlu0 %2119  ;;  %v2834_v41 = vld [vmem:[#allocation3 + $0xa8] sm:$0xff] }
 0x4a5   :  { %6258 = vst [vmem:[#allocation26_spill] sm:$0xff] %v5649_v43  ;;  %v2278_v26 = vmul.f32 %v5649_v43, %v5192_v15  ;;  %3113 = vmatpush.msrb.mxu1 %v3032_v29  ;;  %2145 = vrot.lane.b32.xlu0 %v1615_v12, %s3853_s5  ;;  %v6261_v15 = vld [vmem:[#allocation16_spill] sm:$0xff] }
 0x4a6   :  { %v3029_v27 = vmul.f32 %v2965_v40, %v6261_v15  ;;  %v2949_v12 = vld [vmem:[%s6196_s11] sm:$0xff] }
 0x4a7   :  { %2439 = vrot.lane.b32.xlu2 %v2278_v26, %s3853_s5  ;;  %3114 = vmatpush.msrb.mxu1 %v3031_v63 }
 0x4a8   :  { %2149 = vrot.lane.b32.xlu1 %v1621_v11, %s3853_s5 }
 0x4a9   :  { %3115 = vmatpush.msrb.mxu1 %v3030_v51  ;;  %v5690_v11 = vpop.f32.mrf.mxu2  ;;  %v2831_v51 = vmul.f32 %v2829_v52, %v5612_v50  ;;  %v1724_v50 = vld [vmem:[%s6191_s6 + $0x1b8] sm:$0xff] }
 0x4aa   :  { %v5664_v9 = vpop.permute.xlu1 %2159  ;;  %v2418_v17 = vpop.permute.xlu2 %2417 }
 0x4ab   :  { %v2814_v18 = vld [vmem:[#allocation3 + $0x98] sm:$0xff]  ;;  %6262 = vst [vmem:[#allocation23_spill] sm:$0xff] %v5664_v9  ;;  %3116 = vmatpush.msrb.mxu1 %v3029_v27  ;;  %v1624_v63 = vpop.f32.mrf.mxu0 }
 0x4ac   :  { %v2816_v2 = vadd.f32 %v2814_v18, %v2812_v49  ;;  %2587 = vst.msk [vmem:[#allocation3 + $0xb0] sm:$0xff] %vm312_vm10, %v2418_v17  ;;  %v5667_v14 = vpop.permute.xlu0 %2121  ;;  %3117 = vmatmul.f32.vlgmr.msrb.gmra.mxu1 %v2949_v12  ;;  %v2849_v18 = vld [vmem:[#allocation2 + $0xb0] sm:$0xff] }
 0x4ad   :  { %6263 = vst [vmem:[#allocation22_spill] sm:$0xff] %v5667_v14  ;;  %v2279_v32 = vmul.f32 %v5667_v14, %v5207_v60  ;;  %v1723_v60 = vld [vmem:[%s6191_s6 + $0x1b0] sm:$0xff] }
 0x4ae   :  { %2818 = vst.msk [vmem:[#allocation4 + $0x98] sm:$0xff] %vm312_vm10, %v2816_v2  ;;  %v2832_v53 = vmul.f32 %v2830_v42, %v2816_v2  ;;  %v1787_v30 = vmul.f32 %v1723_v60, %v5643_v54 }
 0x4af   :  { %2441 = vrot.lane.b32.xlu2 %v2279_v32, %s3853_s5  ;;  %v1788_v32 = vmul.f32 %v1724_v50, %v884_v44  ;;  %v1727_v50 = vld [vmem:[%s6191_s6 + $0x1d0] sm:$0xff] }
 0x4b0   :  { %v5675_v29 = vadd.f32 %v2834_v41, %v2832_v53  ;;  %2477 = vrot.lane.b32.xlu1 %v2297_v21, %s3853_s5  ;;  %v1905_v40 = vmul.f32 1.442695, %v1787_v30  ;;  %v1725_v30 = vld [vmem:[%s6191_s6 + $0x1c0] sm:$0xff] }
 0x4b1   :  { %v5712_v41 = vpop.f32.mrf.mxu2  ;;  %v1907_v21 = vmul.f32 1.442695, %v1788_v32  ;;  %v1789_v52 = vmul.f32 %v1725_v30, %v5690_v11 }
 0x4b2   :  { %2838 = vst.msk [vmem:[#allocation4 + $0xa8] sm:$0xff] %vm312_vm10, %v5675_v29  ;;  %v2414_v26 = vpop.permute.xlu1 %2413  ;;  %v5683_v62 = vpop.permute.xlu2 %2165  ;;  %3791 = vpow2.f32 %v1905_v40 }
 0x4b3   :  { %2585 = vst.msk [vmem:[#allocation3 + $0xa0] sm:$0xff] %vm312_vm10, %v2414_v26  ;;  %v2853_v42 = vld [vmem:[#allocation3 + $0xb0] sm:$0xff]  ;;  %v1627_v53 = vpop.f32.mrf.mxu0  ;;  %3793 = vpow2.f32 %v1907_v21 }
 0x4b4   :  { %3120 = vmatmul.f32.gmra.mxu1 %v2953_v57  ;;  %v2961_v57 = vld [vmem:[%s6196_s11 + $0x60] sm:$0xff] }
 0x4b7   :  { %2151 = vrot.lane.b32.xlu2 %v1624_v63, %s3853_s5 }
 0x4b8   :  { %v3792_v17 = vpop.eup %3791 }
 0x4b9   :  { %1979 = vst.msk [vmem:[#allocation2 + $0x1b0] sm:$0xff] %vm312_vm10, %v3792_v17  ;;  %v2850_v17 = vld [vmem:[#allocation2 + $0xb8] sm:$0xff] }
 0x4ba   :  { %v2833_v47 = vld [vmem:[#allocation3 + $0xa0] sm:$0xff]  ;;  %v5697_v49 = vpop.permute.xlu1 %2161  ;;  %v5699_v15 = vpop.permute.xlu2 %2127 }
 0x4bb   :  { %v2835_v27 = vadd.f32 %v2833_v47, %v2831_v51  ;;  %v2282_v12 = vmul.f32 %v5699_v15, %v5277_v55  ;;  %v2300_v51 = vmul.f32 %v5645_v56, %v884_v44 }
 0x4bc   :  { %3123 = vmatmul.f32.gmra.mxu1 %v2957_v5  ;;  %v1909_v5 = vmul.f32 1.442695, %v1789_v52 }
 0x4bd   :  { %2837 = vst.msk [vmem:[#allocation4 + $0xa0] sm:$0xff] %vm312_vm10, %v2835_v27  ;;  %v2851_v2 = vmul.f32 %v2849_v18, %v2835_v27  ;;  %2447 = vrot.lane.b32.xlu1 %v2282_v12, %s3853_s5  ;;  %v3794_v27 = vpop.eup %3793 }
 0x4be   :  { %3795 = vpow2.f32 %v1909_v5  ;;  %1980 = vst.msk [vmem:[#allocation2 + $0x1b8] sm:$0xff] %vm312_vm10, %v3794_v27  ;;  %v1630_v5 = vpop.f32.mrf.mxu0 }
 0x4bf   :  { %2153 = vrot.lane.b32.xlu2 %v1627_v53, %s3853_s5  ;;  %v5710_v55 = vadd.f32 %v2853_v42, %v2851_v2  ;;  %v1726_v2 = vld [vmem:[%s6191_s6 + $0x1c8] sm:$0xff]  ;;  %v2852_v42 = vmul.f32 %v2850_v17, %v5675_v29 }
 0x4c1   :  { %2857 = vst.msk [vmem:[#allocation4 + $0xb0] sm:$0xff] %vm312_vm10, %v5710_v55 }
 0x4c2   :  { %v5719_v26 = vpop.permute.xlu1 %2123  ;;  %v5721_v60 = vpop.permute.xlu2 %2129 }
 0x4c3   :  { %6264 = vst [vmem:[#allocation16_spill] sm:$0xff] %v5719_v26  ;;  %v2280_v63 = vmul.f32 %v5719_v26, %v5234_v33  ;;  %v2283_v40 = vmul.f32 %v5721_v60, %v5305_v46  ;;  %v5737_v33 = vpop.f32.mrf.mxu2  ;;  %v2639_v26 = vld [vmem:[#allocation2 + $0x100] sm:$0xff] }
 0x4c4   :  { %3126 = vmatmul.f32.gmra.mxu1 %v2961_v57  ;;  %v3796_v44 = vpop.eup %3795  ;;  %v1791_v53 = vmul.f32 %v1727_v50, %v5737_v33 }
 0x4c5   :  { %2443 = vrot.lane.b32.xlu0 %v2280_v63, %s3853_s5  ;;  %2449 = vrot.lane.b32.xlu1 %v2283_v40, %s3853_s5  ;;  %1981 = vst.msk [vmem:[#allocation2 + $0x1c0] sm:$0xff] %vm312_vm10, %v3796_v44  ;;  %v2870_v44 = vld [vmem:[#allocation2 + $0xc8] sm:$0xff] }
 0x4c6   :  { %v1913_v63 = vmul.f32 1.442695, %v1791_v53  ;;  %v2298_v53 = vmul.f32 %v5664_v9, %v5626_v38 }
 0x4c7   :  { %v2420_v47 = vpop.permute.xlu0 %2419  ;;  %2483 = vrot.lane.b32.xlu2 %v2300_v51, %s3853_s5  ;;  %v1728_v51 = vld [vmem:[%s6191_s6 + $0x1d8] sm:$0xff] }
 0x4c8   :  { %2588 = vst.msk [vmem:[#allocation3 + $0xb8] sm:$0xff] %vm312_vm10, %v2420_v47 }
 0x4ca   :  { %v5739_v46 = vpop.permute.xlu1 %2125  ;;  %v2428_v12 = vpop.permute.xlu2 %2427 }
 0x4cb   :  { %6265 = vst [vmem:[#allocation27_spill] sm:$0xff] %v5739_v46  ;;  %v2281_v18 = vmul.f32 %v5739_v46, %v5252_v8  ;;  %v1790_v8 = vmul.f32 %v1726_v2, %v5712_v41  ;;  %v5761_v29 = vpop.f32.mrf.mxu2 }
 0x4cc   :  { %2592 = vst.msk [vmem:[#allocation3 + $0xd8] sm:$0xff] %vm312_vm10, %v2428_v12  ;;  %v1792_v47 = vmul.f32 %v1728_v51, %v5761_v29 }
 0x4cd   :  { %2445 = vrot.lane.b32.xlu0 %v2281_v18, %s3853_s5  ;;  %v1911_v30 = vmul.f32 1.442695, %v1790_v8 }
 0x4ce   :  { %v1915_v27 = vmul.f32 1.442695, %v1792_v47 }
 0x4cf   :  { %v2854_v32 = vld [vmem:[#allocation3 + $0xb8] sm:$0xff]  ;;  %v5755_v21 = vpop.permute.xlu0 %2167  ;;  %3797 = vpow2.f32 %v1911_v30 }
 0x4d0   :  { %v2856_v57 = vadd.f32 %v2854_v32, %v2852_v42  ;;  %3799 = vpow2.f32 %v1913_v63  ;;  %v2890_v30 = vld [vmem:[#allocation2 + $0xd8] sm:$0xff] }
 0x4d1   :  { %3801 = vpow2.f32 %v1915_v27 }
 0x4d2   :  { %2858 = vst.msk [vmem:[#allocation4 + $0xb8] sm:$0xff] %vm312_vm10, %v2856_v57  ;;  %v2424_v40 = vpop.permute.xlu1 %2423  ;;  %v5758_v52 = vpop.permute.xlu2 %2175  ;;  %v2872_v2 = vmul.f32 %v2870_v44, %v2856_v57 }
 0x4d3   :  { %2590 = vst.msk [vmem:[#allocation3 + $0xc8] sm:$0xff] %vm312_vm10, %v2424_v40  ;;  %v2869_v40 = vld [vmem:[#allocation2 + $0xc0] sm:$0xff]  ;;  %v2894_v51 = vld [vmem:[#allocation3 + $0xd8] sm:$0xff] }
 0x4d5   :  { %2155 = vrot.lane.b32.xlu0 %v1630_v5, %s3853_s5  ;;  %v3798_v18 = vpop.eup %3797  ;;  %v2871_v5 = vmul.f32 %v2869_v40, %v5710_v55  ;;  %v1729_v55 = vld [vmem:[%s6191_s6 + $0x1e0] sm:$0xff] }
 0x4d6   :  { %v3800_v17 = vpop.eup %3799  ;;  %1982 = vst.msk [vmem:[#allocation2 + $0x1c8] sm:$0xff] %vm312_vm10, %v3798_v18  ;;  %v5783_v18 = vpop.f32.mrf.mxu2 }
 0x4d7   :  { %v2422_v12 = vpop.permute.xlu0 %2421  ;;  %1983 = vst.msk [vmem:[#allocation2 + $0x1d0] sm:$0xff] %vm312_vm10, %v3800_v17  ;;  %v3802_v57 = vpop.eup %3801 }
 0x4d8   :  { %2589 = vst.msk [vmem:[#allocation3 + $0xc0] sm:$0xff] %vm312_vm10, %v2422_v12 }
 0x4d9   :  { %1984 = vst.msk [vmem:[#allocation2 + $0x1d8] sm:$0xff] %vm312_vm10, %v3802_v57 }
 0x4da   :  { %v2874_v50 = vld [vmem:[#allocation3 + $0xc8] sm:$0xff]  ;;  %v5770_v42 = vpop.permute.xlu1 %2171  ;;  %v2430_v8 = vpop.permute.xlu2 %2429 }
 0x4db   :  { %v2876_v32 = vadd.f32 %v2874_v50, %v2872_v2  ;;  %2593 = vst.msk [vmem:[#allocation3 + $0xe0] sm:$0xff] %vm312_vm10, %v2430_v8  ;;  %v1793_v2 = vmul.f32 %v1729_v55, %v5783_v18 }
 0x4dd   :  { %2878 = vst.msk [vmem:[#allocation4 + $0xc8] sm:$0xff] %vm312_vm10, %v2876_v32  ;;  %v2892_v63 = vmul.f32 %v2890_v30, %v2876_v32  ;;  %2479 = vrot.lane.b32.xlu0 %v2298_v53, %s3853_s5  ;;  %v1917_v50 = vmul.f32 1.442695, %v1793_v2  ;;  %v2889_v53 = vld [vmem:[#allocation2 + $0xd0] sm:$0xff] }
 0x4df   :  { %v2873_v47 = vld [vmem:[#allocation3 + $0xc0] sm:$0xff]  ;;  %v5779_v27 = vpop.permute.xlu0 %2169  ;;  %v2896_v38 = vadd.f32 %v2894_v51, %v2892_v63  ;;  %3803 = vpow2.f32 %v1917_v50 }
 0x4e0   :  { %v2875_v12 = vadd.f32 %v2873_v47, %v2871_v5  ;;  %v5804_v47 = vpop.f32.mrf.mxu2 }
 0x4e1   :  { %2898 = vst.msk [vmem:[#allocation4 + $0xd8] sm:$0xff] %vm312_vm10, %v2896_v38 }
 0x4e2   :  { %2877 = vst.msk [vmem:[#allocation4 + $0xc0] sm:$0xff] %vm312_vm10, %v2875_v12  ;;  %v2426_v44 = vpop.permute.xlu1 %2425  ;;  %v5786_v17 = vpop.permute.xlu2 %2177  ;;  %v2891_v30 = vmul.f32 %v2889_v53, %v2875_v12  ;;  %v1730_v12 = vld [vmem:[%s6191_s6 + $0x1e8] sm:$0xff] }
 0x4e3   :  { %2591 = vst.msk [vmem:[#allocation3 + $0xd0] sm:$0xff] %vm312_vm10, %v2426_v44  ;;  %v2909_v44 = vld [vmem:[#allocation2 + $0xe0] sm:$0xff] }
 0x4e5   :  { %v3804_v55 = vpop.eup %3803 }
 0x4e6   :  { %1985 = vst.msk [vmem:[#allocation2 + $0x1e0] sm:$0xff] %vm312_vm10, %v3804_v55 }
 0x4e7   :  { %v5793_v8 = vpop.permute.xlu0 %2131 }
 0x4e8   :  { %v2284_v32 = vmul.f32 %v5793_v8, %v5327_v19  ;;  %v2913_v19 = vld [vmem:[#allocation3 + $0xe0] sm:$0xff] }
 0x4ea   :  { %v2893_v63 = vld [vmem:[#allocation3 + $0xd0] sm:$0xff]  ;;  %v5797_v40 = vpop.permute.xlu1 %2173  ;;  %v5799_v57 = vpop.permute.xlu2 %2139  ;;  %2451 = vrot.lane.b32.xlu2 %v2284_v32, %s3853_s5 }
 0x4eb   :  { %v2895_v51 = vadd.f32 %v2893_v63, %v2891_v30  ;;  %v2288_v5 = vmul.f32 %v5799_v57, %v5405_v24  ;;  %v1794_v24 = vmul.f32 %v1730_v12, %v5804_v47 }
 0x4ed   :  { %2897 = vst.msk [vmem:[#allocation4 + $0xd0] sm:$0xff] %vm312_vm10, %v2895_v51  ;;  %v2911_v2 = vmul.f32 %v2909_v44, %v2895_v51  ;;  %2459 = vrot.lane.b32.xlu1 %v2288_v5, %s3853_s5  ;;  %v1919_v30 = vmul.f32 1.442695, %v1794_v24  ;;  %v5826_v44 = vpop.f32.mrf.mxu2 }
 0x4ef   :  { %v5812_v50 = vpop.permute.xlu0 %2133  ;;  %v2915_v53 = vadd.f32 %v2913_v19, %v2911_v2  ;;  %3805 = vpow2.f32 %v1919_v30  ;;  %v2910_v30 = vld [vmem:[#allocation2 + $0xe8] sm:$0xff] }
 0x4f0   :  { %v2285_v32 = vmul.f32 %v5812_v50, %v5348_v3  ;;  %v1731_v3 = vld [vmem:[%s6191_s6 + $0x1f0] sm:$0xff] }
 0x4f1   :  { %2917 = vst.msk [vmem:[#allocation4 + $0xe0] sm:$0xff] %vm312_vm10, %v2915_v53  ;;  %v1795_v55 = vmul.f32 %v1731_v3, %v5826_v44 }
 0x4f2   :  { %v5818_v63 = vpop.permute.xlu1 %2135  ;;  %2453 = vrot.lane.b32.xlu2 %v2285_v32, %s3853_s5  ;;  %v5823_v5 = vpop.permute.xlu2 %2141 }
 0x4f3   :  { %v2286_v51 = vmul.f32 %v5818_v63, %v5371_v45  ;;  %v2289_v19 = vmul.f32 %v5823_v5, %v5424_v20  ;;  %v1921_v45 = vmul.f32 1.442695, %v1795_v55 }
 0x4f5   :  { %2455 = vrot.lane.b32.xlu0 %v2286_v51, %s3853_s5  ;;  %v3806_v12 = vpop.eup %3805  ;;  %3807 = vpow2.f32 %v1921_v45  ;;  %v2912_v51 = vmul.f32 %v2910_v30, %v2896_v38  ;;  %v6266_v38 = vld [vmem:[#allocation8_spill] sm:$0xff]  ;;  %v2930_v30 = vld [vmem:[#allocation2 + $0xf8] sm:$0xff]  ;;  %v5852_v43 = vpop.f32.mrf.mxu2 }
 0x4f6   :  { %1986 = vst.msk [vmem:[#allocation2 + $0x1e8] sm:$0xff] %vm312_vm10, %v3806_v12  ;;  %v3592_v12 = vmul.f32 -1.442695, %v6266_v38 }
 0x4f7   :  { %v2432_v2 = vpop.permute.xlu0 %2431 }
 0x4f8   :  { %2594 = vst.msk [vmem:[#allocation3 + $0xe8] sm:$0xff] %vm312_vm10, %v2432_v2  ;;  %3809 = vpow2.f32 %v3592_v12 }
 0x4fa   :  { %v5835_v24 = vpop.permute.xlu1 %2137  ;;  %2461 = vrot.lane.b32.xlu2 %v2289_v19, %s3853_s5 }
 0x4fb   :  { %v2287_v32 = vmul.f32 %v5835_v24, %v5384_v39  ;;  %v3808_v2 = vpop.eup %3807  ;;  %v2640_v39 = vld [vmem:[#allocation2 + $0x108] sm:$0xff] }
 0x4fc   :  { %1987 = vst.msk [vmem:[#allocation2 + $0x1f0] sm:$0xff] %vm312_vm10, %v3808_v2 }
 0x4fd   :  { %2457 = vrot.lane.b32.xlu0 %v2287_v32, %s3853_s5  ;;  %v2642_v32 = vmul.f32 0.0, %v2640_v39 }
 0x4ff   :  { %v2914_v3 = vld [vmem:[#allocation3 + $0xe8] sm:$0xff]  ;;  %v5842_v20 = vpop.permute.xlu0 %2179 }
 0x500   :  { %v2916_v55 = vadd.f32 %v2914_v3, %v2912_v51  ;;  %v6267_v51 = vld [vmem:[#allocation10_spill] sm:$0xff] }
 0x501   :  { %v2440_v4 = vpop.permute.xlu2 %2439  ;;  %v3594_v3 = vmul.f32 -1.442695, %v6267_v51 }
 0x502   :  { %2918 = vst.msk [vmem:[#allocation4 + $0xe8] sm:$0xff] %vm312_vm10, %v2916_v55  ;;  %v2436_v19 = vpop.permute.xlu1 %2435  ;;  %v2932_v2 = vmul.f32 %v2930_v30, %v2916_v55 }
 0x503   :  { %2598 = vst.msk [vmem:[#allocation3 + $0x108] sm:$0xff] %vm312_vm10, %v2440_v4  ;;  %v1732_v4 = vld [vmem:[%s6191_s6 + $0x1f8] sm:$0xff]  ;;  %3811 = vpow2.f32 %v3594_v3 }
 0x504   :  { %2596 = vst.msk [vmem:[#allocation3 + $0xf8] sm:$0xff] %vm312_vm10, %v2436_v19  ;;  %v1796_v39 = vmul.f32 %v1732_v4, %v5852_v43 }
 0x506   :  { %v1923_v55 = vmul.f32 1.442695, %v1796_v39 }
 0x507   :  { %v2434_v45 = vpop.permute.xlu0 %2433 }
 0x508   :  { %2595 = vst.msk [vmem:[#allocation3 + $0xf0] sm:$0xff] %vm312_vm10, %v2434_v45  ;;  %3813 = vpow2.f32 %v1923_v55 }
 0x509   :  { %v2442_v9 = vpop.permute.xlu2 %2441 }
 0x50a   :  { %v2644_v56 = vld [vmem:[#allocation3 + $0x108] sm:$0xff]  ;;  %2599 = vst.msk [vmem:[#allocation3 + $0x110] sm:$0xff] %vm312_vm10, %v2442_v9  ;;  %v2438_v58 = vpop.permute.xlu1 %2437  ;;  %v2929_v9 = vld [vmem:[#allocation2 + $0xf0] sm:$0xff] }
 0x50b   :  { %v5857_v19 = vadd.f32 %v2644_v56, %v2642_v32  ;;  %v2934_v45 = vld [vmem:[#allocation3 + $0xf8] sm:$0xff]  ;;  %2597 = vst.msk [vmem:[#allocation3 + $0x100] sm:$0xff] %vm312_vm10, %v2438_v58  ;;  %v2931_v30 = vmul.f32 %v2929_v9, %v2915_v53  ;;  %v3810_v53 = vpop.eup %3809  ;;  %v2659_v9 = vld [vmem:[#allocation2 + $0x110] sm:$0xff] }
 0x50c   :  { %v2936_v14 = vadd.f32 %v2934_v45, %v2932_v2  ;;  %v2641_v2 = vmul.f32 0.0, %v2639_v26  ;;  %v6269_v45 = vld [vmem:[#allocation11_spill] sm:$0xff]  ;;  %v3812_v26 = vpop.eup %3811 }
 0x50d   :  { %2648 = vst.msk [vmem:[#allocation4 + $0x108] sm:$0xff] %vm312_vm10, %v5857_v19  ;;  %v3595_v39 = vmul.f32 -1.442695, %v6269_v45 }
 0x50e   :  { %2938 = vst.msk [vmem:[#allocation4 + $0xf8] sm:$0xff] %vm312_vm10, %v2936_v14  ;;  %v3814_v55 = vpop.eup %3813 }
 0x50f   :  { %v2933_v46 = vld [vmem:[#allocation3 + $0xf0] sm:$0xff]  ;;  %v5864_v56 = vpop.permute.xlu0 %2143  ;;  %1988 = vst.msk [vmem:[#allocation2 + $0x1f8] sm:$0xff] %vm312_vm10, %v3814_v55  ;;  %3815 = vpow2.f32 %v3595_v39 }
 0x510   :  { %v2935_v32 = vadd.f32 %v2933_v46, %v2931_v30  ;;  %v2290_v58 = vmul.f32 %v5864_v56, %v5442_v36 }
 0x511   :  { %v5868_v12 = vpop.permute.xlu2 %2151 }
 0x512   :  { %6268 = vst [vmem:[#allocation8_spill] sm:$0xff] %v5868_v12  ;;  %v2643_v4 = vld [vmem:[#allocation3 + $0x100] sm:$0xff]  ;;  %v2294_v3 = vmul.f32 %v5868_v12, %v5519_v35  ;;  %v5873_v14 = vpop.permute.xlu1 %2147  ;;  %2463 = vrot.lane.b32.xlu1 %v2290_v58, %s3853_s5  ;;  %v2994_v12 = vld [vmem:[#allocation4 + $0xe8] sm:$0xff] }
 0x513   :  { %2937 = vst.msk [vmem:[#allocation4 + $0xf0] sm:$0xff] %vm312_vm10, %v2935_v32  ;;  %v2645_v46 = vadd.f32 %v2643_v4, %v2641_v2  ;;  %v2292_v36 = vmul.f32 %v5873_v14, %v5482_v28  ;;  %v2663_v32 = vld [vmem:[#allocation3 + $0x110] sm:$0xff]  ;;  %v5884_v2 = vadd.f32 1.0, %v3812_v26  ;;  %v2993_v26 = vld [vmem:[#allocation4 + $0xe0] sm:$0xff]  ;;  %v3058_v55 = vmul.f32 %v2994_v12, %v5555_v34 }
 0x514   :  { %2471 = vrot.lane.b32.xlu2 %v2294_v3, %s3853_s5  ;;  %v5890_v3 = vadd.f32 1.0, %v3810_v53  ;;  %v2301_v34 = vmul.f32 %v5683_v62, %v5690_v11 }
 0x515   :  { %2647 = vst.msk [vmem:[#allocation4 + $0x100] sm:$0xff] %vm312_vm10, %v2645_v46  ;;  %v2661_v30 = vmul.f32 %v2659_v9, %v2645_v46  ;;  %2467 = vrot.lane.b32.xlu0 %v2292_v36, %s3853_s5  ;;  %v2996_v35 = vld [vmem:[#allocation4 + $0xf8] sm:$0xff]  ;;  %3817 = vrcp.f32 %v5884_v2  ;;  %vm3268_vm13 = vweird.f32 %v5884_v2 }
 0x516   :  { %v3060_v58 = vmul.f32 %v2996_v35, %v5573_v0  ;;  %3819 = vrcp.f32 %v5890_v3  ;;  %v2991_v35 = vld [vmem:[#allocation4 + $0xd0] sm:$0xff]  ;;  %vm3238_vm15 = vweird.f32 %v5890_v3 }
 0x517   :  { %v5886_v28 = vpop.permute.xlu0 %2145  ;;  %v5888_v4 = vadd.f32 %v2663_v32, %v2661_v30  ;;  %v2992_v30 = vld [vmem:[#allocation4 + $0xd8] sm:$0xff]  ;;  %v3055_v12 = vmul.f32 %v2991_v35, %v5491_v37 }
 0x518   :  { %3130 = vmatpush.msra.mxu1 %v3060_v58  ;;  %v2291_v46 = vmul.f32 %v5886_v28, %v5462_v61  ;;  %v2988_v37 = vld [vmem:[#allocation4 + $0xb8] sm:$0xff] }
 0x519   :  { %v5894_v36 = vpop.permute.xlu2 %2153  ;;  %2667 = vst.msk [vmem:[#allocation4 + $0x110] sm:$0xff] %vm312_vm10, %v5888_v4 }
 0x51a   :  { %v2995_v9 = vld [vmem:[#allocation4 + $0xf0] sm:$0xff]  ;;  %v2295_v0 = vmul.f32 %v5894_v36, %v5544_v22  ;;  %2465 = vrot.lane.b32.xlu1 %v2291_v46, %s3853_s5  ;;  %v5901_v39 = vpop.permute.xlu1 %2149  ;;  %v3816_v22 = vpop.eup %3815  ;;  %v2990_v46 = vld [vmem:[#allocation4 + $0xc8] sm:$0xff] }
 0x51b   :  { %v3059_v53 = vmul.f32 %v2995_v9, %v5597_v31  ;;  %v2293_v61 = vmul.f32 %v5901_v39, %v5496_v13  ;;  %v3057_v31 = vmul.f32 %v2993_v26, %v5525_v25  ;;  %v5912_v32 = vadd.f32 1.0, %v3816_v22  ;;  %v5915_v58 = vpop.eup %3817 }
 0x51c   :  { %2473 = vrot.lane.b32.xlu2 %v2295_v0, %s3853_s5  ;;  %v3056_v13 = vmul.f32 %v2992_v30, %v5510_v7  ;;  %v5917_v0 = vpop.eup %3819  ;;  %v2299_v25 = vmul.f32 %v5697_v49, %v5643_v54  ;;  %v2989_v7 = vld [vmem:[#allocation4 + $0xc0] sm:$0xff]  ;;  %v3264_v11 = vmul.f32 %v5915_v58, %v5884_v2  ;;  %v3052_v22 = vmul.f32 %v2988_v37, %v5448_v10  ;;  %v2982_v37 = vld [vmem:[#allocation4 + $0x88] sm:$0xff] }
 0x51d   :  { %3131 = vmatpush.msra.mxu1 %v3059_v53  ;;  %2469 = vrot.lane.b32.xlu0 %v2293_v61, %s3853_s5  ;;  %3821 = vrcp.f32 %v5912_v32  ;;  %v3054_v61 = vmul.f32 %v2990_v46, %v5464_v1  ;;  %v3234_v26 = vmul.f32 %v5917_v0, %v5890_v3  ;;  %v3053_v54 = vmul.f32 %v2989_v7, %v5486_v48  ;;  %v6270_v7 = vld [vmem:[#allocation18_spill] sm:$0xff] }
 0x51e   :  { %v3265_v30 = vsub.f32 1.0, %v3264_v11  ;;  %vm3269_vm0 = vweird.f32 %v5915_v58  ;;  %v3244_v11 = vand.u32 2147483648, %v5890_v3  ;;  %vm3239_vm12 = vweird.f32 %v5917_v0 }
 0x51f   :  { %3132 = vmatpush.msra.mxu1 %v3058_v55  ;;  %v2987_v55 = vld [vmem:[#allocation4 + $0xb0] sm:$0xff]  ;;  %v3235_v35 = vsub.f32 1.0, %v3234_v26  ;;  %v3274_v26 = vand.u32 2147483648, %v5884_v2  ;;  %vm5966_vm14 = vmor %vm3268_vm13, %vm3269_vm0  ;;  %vm3283_vm5 = vweird.f32 %v5912_v32 }
 0x520   :  { %v3051_v46 = vmul.f32 %v2987_v55, %v5421_v23  ;;  %v3266_v48 = vmul.f32 %v5915_v58, %v3265_v30  ;;  %v2307_v55 = vmul.f32 %v5786_v17, %v5826_v44  ;;  %v6274_v44 = vld [vmem:[#allocation24_spill] sm:$0xff]  ;;  %vm5979_vm1 = vmor %vm3238_vm15, %vm3239_vm12 }
 0x521   :  { %3133 = vmatpush.msra.mxu1 %v3057_v31  ;;  %v2484_v9 = vpop.permute.xlu2 %2483  ;;  %v2986_v31 = vld [vmem:[#allocation4 + $0xa8] sm:$0xff] }
 0x522   :  { %v2478_v53 = vpop.permute.xlu1 %2477  ;;  %2620 = vst.msk [vmem:[#allocation3 + $0x1b8] sm:$0xff] %vm312_vm10, %v2484_v9  ;;  %v2304_v9 = vmul.f32 %v5770_v42, %v5761_v29  ;;  %v3050_v10 = vmul.f32 %v2986_v31, %v5398_v59  ;;  %v3272_v31 = vand.u32 2147483647, %v5884_v2 }
 0x523   :  { %3134 = vmatpush.msra.mxu1 %v3056_v13  ;;  %2617 = vst.msk [vmem:[#allocation3 + $0x1a0] sm:$0xff] %vm312_vm10, %v2478_v53  ;;  %v5936_v1 = vpop.eup %3821  ;;  %v2306_v13 = vmul.f32 %v5758_v52, %v5804_v47  ;;  %v3236_v53 = vmul.f32 %v5917_v0, %v3235_v35  ;;  %v2305_v35 = vmul.f32 %v5797_v40, %v5783_v18  ;;  %v2679_v18 = vld [vmem:[#allocation2 + $0x120] sm:$0xff] }
 0x524   :  { %2485 = vrot.lane.b32.xlu2 %v2301_v34, %s3853_s5  ;;  %v2985_v34 = vld [vmem:[#allocation4 + $0xa0] sm:$0xff]  ;;  %v3279_v47 = vmul.f32 %v5936_v1, %v5912_v32  ;;  %vm3273_vm2 = vcmp.eq.f32.partialorder %v3272_v31, 8.507059e+37  ;;  %vm3284_vm4 = vweird.f32 %v5936_v1 }
 0x525   :  { %3135 = vmatpush.msra.mxu1 %v3055_v12  ;;  %2481 = vrot.lane.b32.xlu0 %v2299_v25, %s3853_s5  ;;  %v2984_v12 = vld [vmem:[#allocation4 + $0x98] sm:$0xff]  ;;  %v3049_v23 = vmul.f32 %v2985_v34, %v5379_v16  ;;  %v2983_v25 = vld [vmem:[#allocation4 + $0x90] sm:$0xff]  ;;  %v3046_v34 = vmul.f32 %v2982_v37, %v6274_v44  ;;  %vm3285_vm6 = vmor %vm3283_vm5, %vm3284_vm4 }
 0x526   :  { %v3048_v59 = vmul.f32 %v2984_v12, %v6270_v7  ;;  %v3280_v16 = vsub.f32 1.0, %v3279_v47  ;;  %v6277_v12 = vld [vmem:[#allocation17_spill] sm:$0xff]  ;;  %v3245_v47 = vor.u32 1.1754944e-38, %v3244_v11  ;;  %v3289_v11 = vand.u32 2147483648, %v5912_v32 }
 0x527   :  { %3136 = vmatpush.msra.mxu1 %v3054_v61  ;;  %v3267_v61 = vadd.f32 %v5915_v58, %v3266_v48  ;;  %v6278_v7 = vld [vmem:[#allocation9_spill] sm:$0xff] }
 0x528   :  { %v3281_v48 = vmul.f32 %v5936_v1, %v3280_v16  ;;  %v2660_v16 = vld [vmem:[#allocation2 + $0x118] sm:$0xff] }
 0x529   :  { %3137 = vmatpush.msra.mxu1 %v3053_v54  ;;  %v3237_v54 = vadd.f32 %v5917_v0, %v3236_v53  ;;  %v3271_v2 = vsel %vm5966_vm14, %v5915_v58, %v3267_v61  ;;  %v2950_v58 = vld [vmem:[%s6196_s11 + $0x8] sm:$0xff] }
 0x52a   :  { %v3282_v61 = vadd.f32 %v5936_v1, %v3281_v48 }
 0x52b   :  { %3138 = vmatpush.msra.mxu1 %v3052_v22  ;;  %v6271_v22 = vld [vmem:[#allocation25_spill] sm:$0xff] }
 0x52c   :  { %2495 = vrot.lane.b32.xlu2 %v2306_v13, %s3853_s5  ;;  %v3047_v30 = vmul.f32 %v2983_v25, %v6271_v22  ;;  %v2981_v13 = vld [vmem:[#allocation4 + $0x80] sm:$0xff]  ;;  %v2662_v22 = vmul.f32 %v2660_v16, %v5857_v19 }
 0x52d   :  { %3139 = vmatpush.msra.mxu1 %v3051_v46  ;;  %2491 = vrot.lane.b32.xlu0 %v2304_v9, %s3853_s5  ;;  %v3242_v9 = vand.u32 2147483647, %v5890_v3  ;;  %v3241_v3 = vsel %vm5979_vm1, %v5917_v0, %v3237_v54  ;;  %v3045_v53 = vmul.f32 %v2981_v13, %v6277_v12  ;;  %v3287_v54 = vand.u32 2147483647, %v5912_v32  ;;  %v2680_v13 = vld [vmem:[#allocation2 + $0x128] sm:$0xff] }
 0x52f   :  { %3140 = vmatpush.msra.mxu1 %v3050_v10  ;;  %v2448_v29 = vpop.permute.xlu1 %2447  ;;  %v3275_v10 = vor.u32 1.1754944e-38, %v3274_v26  ;;  %vm3243_vm3 = vcmp.eq.f32.partialorder %v3242_v9, 8.507059e+37  ;;  %vm3288_vm7 = vcmp.eq.f32.partialorder %v3287_v54, 8.507059e+37  ;;  %v2719_v54 = vld [vmem:[#allocation2 + $0x140] sm:$0xff] }
 0x530   :  { %2602 = vst.msk [vmem:[#allocation3 + $0x128] sm:$0xff] %vm312_vm10, %v2448_v29  ;;  %v3246_v0 = vsel %vm3243_vm3, %v3245_v47, %v3241_v3  ;;  %v2958_v3 = vld [vmem:[%s6196_s11 + $0x48] sm:$0xff] }
 0x531   :  { %3141 = vmatpush.msra.mxu1 %v3049_v23  ;;  %v3276_v25 = vsel %vm3273_vm2, %v3275_v10, %v3271_v2  ;;  %v3293_v26 = vmul.f32 %v3246_v0, %v6266_v38  ;;  %v3290_v38 = vor.u32 1.1754944e-38, %v3289_v11  ;;  %v2681_v10 = vmul.f32 %v2679_v18, %v5888_v4  ;;  %v2700_v4 = vld [vmem:[#allocation2 + $0x138] sm:$0xff]  ;;  %v2720_v18 = vld [vmem:[#allocation2 + $0x148] sm:$0xff] }
 0x532   :  { %v3295_v37 = vmul.f32 %v3276_v25, %v6267_v51  ;;  %v2954_v51 = vld [vmem:[%s6196_s11 + $0x28] sm:$0xff] }
 0x533   :  { %3142 = vmatpush.msra.mxu1 %v3048_v59  ;;  %v3593_v59 = vmul.f32 -1.442695, %v6278_v7 }
 0x534   :  { %2497 = vrot.lane.b32.xlu2 %v2307_v55, %s3853_s5  ;;  %v3286_v55 = vsel %vm3285_vm6, %v5936_v1, %v3282_v61 }
 0x535   :  { %3143 = vmatpush.msra.mxu1 %v3047_v30  ;;  %2493 = vrot.lane.b32.xlu0 %v2305_v35, %s3853_s5  ;;  %3823 = vpow2.f32 %v3593_v59  ;;  %v3291_v35 = vsel %vm3288_vm7, %v3290_v38, %v3286_v55 }
 0x536   :  { %v3296_v19 = vmul.f32 %v3291_v35, %v6269_v45 }
 0x537   :  { %3144 = vmatpush.msra.mxu1 %v3046_v34  ;;  %v2444_v23 = vpop.permute.xlu0 %2443  ;;  %v2450_v29 = vpop.permute.xlu1 %2449  ;;  %v2684_v9 = vld [vmem:[#allocation3 + $0x128] sm:$0xff] }
 0x538   :  { %2600 = vst.msk [vmem:[#allocation3 + $0x118] sm:$0xff] %vm312_vm10, %v2444_v23 }
 0x539   :  { %3145 = vmatpush.msra.mxu1 %v3045_v53  ;;  %2603 = vst.msk [vmem:[#allocation3 + $0x130] sm:$0xff] %vm312_vm10, %v2450_v29 }
 0x53a   :  { %3146 = vmatmul.f32.vlgmr.msra.gmra.mxu1 %v2950_v58  ;;  %v2699_v58 = vld [vmem:[#allocation2 + $0x130] sm:$0xff] }
 0x53b   :  { %v3824_v46 = vpop.eup %3823 }
 0x53c   :  { %3305 = vrot.lane.b32.xlu2 %v3295_v37, %s3853_s5  ;;  %v3230_v2 = vadd.f32 1.0, %v3824_v46  ;;  %v2308_v46 = vmul.f32 %v5842_v20, %v5852_v43 }
 0x53d   :  { %3301 = vrot.lane.b32.xlu0 %v3293_v26, %s3853_s5  ;;  %v2302_v26 = vmul.f32 %v5755_v21, %v5712_v41 }
 0x53e   :  { %3825 = vrcp.f32 %v3230_v2  ;;  %vm3253_vm9 = vweird.f32 %v3230_v2 }
 0x53f   :  { %v2664_v30 = vld [vmem:[#allocation3 + $0x118] sm:$0xff]  ;;  %v2446_v31 = vpop.permute.xlu0 %2445 }
 0x540   :  { %v2666_v32 = vadd.f32 %v2664_v30, %v2662_v22  ;;  %2601 = vst.msk [vmem:[#allocation3 + $0x120] sm:$0xff] %vm312_vm10, %v2446_v31  ;;  %v2703_v23 = vld [vmem:[#allocation3 + $0x130] sm:$0xff]  ;;  %v2303_v31 = vmul.f32 %v5779_v27, %v5737_v33 }
 0x542   :  { %3149 = vmatmul.f32.gmra.mxu1 %v2954_v51  ;;  %2668 = vst.msk [vmem:[#allocation4 + $0x118] sm:$0xff] %vm312_vm10, %v2666_v32  ;;  %v2682_v1 = vmul.f32 %v2680_v13, %v2666_v32  ;;  %v3259_v13 = vand.u32 2147483648, %v3230_v2 }
 0x544   :  { %v2686_v44 = vadd.f32 %v2684_v9, %v2682_v1  ;;  %v2452_v34 = vpop.permute.xlu2 %2451  ;;  %v3826_v37 = vpop.eup %3825  ;;  %v3257_v1 = vand.u32 2147483647, %v3230_v2 }
 0x545   :  { %2604 = vst.msk [vmem:[#allocation3 + $0x138] sm:$0xff] %vm312_vm10, %v2452_v34  ;;  %3307 = vrot.lane.b32.xlu0 %v3296_v19, %s3853_s5  ;;  %v3249_v16 = vmul.f32 %v3826_v37, %v3230_v2  ;;  %vm3254_vm8 = vweird.f32 %v3826_v37  ;;  %v3260_v19 = vor.u32 1.1754944e-38, %v3259_v13 }
 0x546   :  { %2688 = vst.msk [vmem:[#allocation4 + $0x128] sm:$0xff] %vm312_vm10, %v2686_v44  ;;  %v2702_v29 = vmul.f32 %v2700_v4, %v2686_v44  ;;  %vm3255_vm11 = vmor %vm3253_vm9, %vm3254_vm8  ;;  %vm3258_vm0 = vcmp.eq.f32.partialorder %v3257_v1, 8.507059e+37  ;;  %v2739_v4 = vld [vmem:[#allocation2 + $0x150] sm:$0xff] }
 0x547   :  { %v2683_v48 = vld [vmem:[#allocation3 + $0x120] sm:$0xff]  ;;  %v6019_v12 = vpop.permute.xlu0 %2155  ;;  %v3250_v30 = vsub.f32 1.0, %v3249_v16  ;;  %v2760_v16 = vld [vmem:[#allocation2 + $0x168] sm:$0xff]  ;;  %v2779_v1 = vld [vmem:[#allocation2 + $0x170] sm:$0xff] }
 0x548   :  { %v2685_v45 = vadd.f32 %v2683_v48, %v2681_v10  ;;  %v2296_v53 = vmul.f32 %v6019_v12, %v5568_v6  ;;  %v2962_v6 = vld [vmem:[%s6196_s11 + $0x68] sm:$0xff] }
 0x549   :  { %v3251_v41 = vmul.f32 %v3826_v37, %v3250_v30  ;;  %v2780_v30 = vld [vmem:[#allocation2 + $0x178] sm:$0xff] }
 0x54a   :  { %3152 = vmatmul.f32.gmra.mxu1 %v2958_v3  ;;  %2687 = vst.msk [vmem:[#allocation4 + $0x120] sm:$0xff] %vm312_vm10, %v2685_v45  ;;  %v2701_v47 = vmul.f32 %v2699_v58, %v2685_v45  ;;  %2475 = vrot.lane.b32.xlu1 %v2296_v53, %s3853_s5  ;;  %v2740_v45 = vld [vmem:[#allocation2 + $0x158] sm:$0xff] }
 0x54b   :  { %v3252_v32 = vadd.f32 %v3826_v37, %v3251_v41 }
 0x54c   :  { %v2704_v25 = vld [vmem:[#allocation3 + $0x138] sm:$0xff]  ;;  %v2705_v59 = vadd.f32 %v2703_v23, %v2701_v47  ;;  %v2454_v0 = vpop.permute.xlu2 %2453 }
 0x54d   :  { %v2706_v61 = vadd.f32 %v2704_v25, %v2702_v29  ;;  %2605 = vst.msk [vmem:[#allocation3 + $0x140] sm:$0xff] %vm312_vm10, %v2454_v0  ;;  %v3256_v9 = vsel %vm3255_vm11, %v3826_v37, %v3252_v32 }
 0x54e   :  { %2707 = vst.msk [vmem:[#allocation4 + $0x130] sm:$0xff] %vm312_vm10, %v2705_v59  ;;  %v2721_v55 = vmul.f32 %v2719_v54, %v2705_v59  ;;  %v3261_v33 = vsel %vm3258_vm0, %v3260_v19, %v3256_v9  ;;  %v2759_v59 = vld [vmem:[#allocation2 + $0x160] sm:$0xff] }
 0x54f   :  { %2708 = vst.msk [vmem:[#allocation4 + $0x138] sm:$0xff] %vm312_vm10, %v2706_v61  ;;  %v2480_v11 = vpop.permute.xlu0 %2479  ;;  %v3294_v34 = vmul.f32 %v3261_v33, %v6278_v7  ;;  %v2722_v43 = vmul.f32 %v2720_v18, %v2706_v61  ;;  %v2799_v18 = vld [vmem:[#allocation2 + $0x180] sm:$0xff] }
 0x550   :  { %2618 = vst.msk [vmem:[#allocation3 + $0x1a8] sm:$0xff] %vm312_vm10, %v2480_v11 }
 0x552   :  { %3155 = vmatmul.f32.gmra.mxu1 %v2962_v6  ;;  %2487 = vrot.lane.b32.xlu1 %v2302_v26, %s3853_s5 }
 0x554   :  { %v2723_v22 = vld [vmem:[#allocation3 + $0x140] sm:$0xff]  ;;  %v2462_v51 = vpop.permute.xlu2 %2461 }
 0x555   :  { %v2725_v38 = vadd.f32 %v2723_v22, %v2721_v55  ;;  %2609 = vst.msk [vmem:[#allocation3 + $0x160] sm:$0xff] %vm312_vm10, %v2462_v51 }
 0x557   :  { %2727 = vst.msk [vmem:[#allocation4 + $0x140] sm:$0xff] %vm312_vm10, %v2725_v38  ;;  %v2741_v7 = vmul.f32 %v2739_v4, %v2725_v38 }
 0x55a   :  { %2489 = vrot.lane.b32.xlu1 %v2303_v31, %s3853_s5 }
 0x55c   :  { %v2763_v61 = vld [vmem:[#allocation3 + $0x160] sm:$0xff] }
 0x55f   :  { %v2460_v35 = vpop.permute.xlu1 %2459 }
 0x560   :  { %2608 = vst.msk [vmem:[#allocation3 + $0x158] sm:$0xff] %vm312_vm10, %v2460_v35 }
 0x562   :  { %2499 = vrot.lane.b32.xlu1 %v2308_v46, %s3853_s5  ;;  %v2800_v46 = vld [vmem:[#allocation2 + $0x188] sm:$0xff] }
 0x567   :  { %v2456_v44 = vpop.permute.xlu0 %2455  ;;  %v2744_v58 = vld [vmem:[#allocation3 + $0x158] sm:$0xff] }
 0x568   :  { %2606 = vst.msk [vmem:[#allocation3 + $0x148] sm:$0xff] %vm312_vm10, %v2456_v44 }
 0x56a   :  { %3303 = vrot.lane.b32.xlu1 %v3294_v34, %s3853_s5 }
 0x56e   :  { %v2472_v10 = vpop.permute.xlu2 %2471 }
 0x56f   :  { %v2724_v3 = vld [vmem:[#allocation3 + $0x148] sm:$0xff]  ;;  %2614 = vst.msk [vmem:[#allocation3 + $0x188] sm:$0xff] %vm312_vm10, %v2472_v10  ;;  %v2458_v2 = vpop.permute.xlu0 %2457 }
 0x570   :  { %v2726_v48 = vadd.f32 %v2724_v3, %v2722_v43  ;;  %2607 = vst.msk [vmem:[#allocation3 + $0x150] sm:$0xff] %vm312_vm10, %v2458_v2 }
 0x572   :  { %2728 = vst.msk [vmem:[#allocation4 + $0x148] sm:$0xff] %vm312_vm10, %v2726_v48  ;;  %v2742_v53 = vmul.f32 %v2740_v45, %v2726_v48  ;;  %v2819_v45 = vld [vmem:[#allocation2 + $0x190] sm:$0xff] }
 0x574   :  { %v2746_v47 = vadd.f32 %v2744_v58, %v2742_v53 }
 0x576   :  { %v2474_v23 = vpop.permute.xlu2 %2473  ;;  %2748 = vst.msk [vmem:[#allocation4 + $0x158] sm:$0xff] %vm312_vm10, %v2746_v47  ;;  %v2762_v55 = vmul.f32 %v2760_v16, %v2746_v47  ;;  %v2804_v34 = vld [vmem:[#allocation3 + $0x188] sm:$0xff] }
 0x577   :  { %v2743_v29 = vld [vmem:[#allocation3 + $0x150] sm:$0xff]  ;;  %2615 = vst.msk [vmem:[#allocation3 + $0x190] sm:$0xff] %vm312_vm10, %v2474_v23  ;;  %v2839_v23 = vld [vmem:[#allocation2 + $0x1a0] sm:$0xff] }
 0x578   :  { %v2745_v25 = vadd.f32 %v2743_v29, %v2741_v7 }
 0x57a   :  { %2747 = vst.msk [vmem:[#allocation4 + $0x150] sm:$0xff] %vm312_vm10, %v2745_v25  ;;  %v2761_v0 = vmul.f32 %v2759_v59, %v2745_v25 }
 0x57c   :  { %v2765_v6 = vadd.f32 %v2763_v61, %v2761_v0 }
 0x57e   :  { %v2486_v37 = vpop.permute.xlu2 %2485  ;;  %2767 = vst.msk [vmem:[#allocation4 + $0x160] sm:$0xff] %vm312_vm10, %v2765_v6  ;;  %v2781_v19 = vmul.f32 %v2779_v1, %v2765_v6  ;;  %v2823_v4 = vld [vmem:[#allocation3 + $0x190] sm:$0xff]  ;;  %v2843_v6 = vld [vmem:[#allocation3 + $0x1a0] sm:$0xff] }
 0x57f   :  { %2621 = vst.msk [vmem:[#allocation3 + $0x1c0] sm:$0xff] %vm312_vm10, %v2486_v37 }
 0x584   :  { %v2464_v11 = vpop.permute.xlu1 %2463 }
 0x585   :  { %2610 = vst.msk [vmem:[#allocation3 + $0x168] sm:$0xff] %vm312_vm10, %v2464_v11  ;;  %v3009_v37 = vld [vmem:[#allocation4 + $0x160] sm:$0xff] }
 0x586   :  { %v2496_v26 = vpop.permute.xlu2 %2495 }
 0x587   :  { %2626 = vst.msk [vmem:[#allocation3 + $0x1e8] sm:$0xff] %vm312_vm10, %v2496_v26  ;;  %v2468_v54 = vpop.permute.xlu0 %2467  ;;  %v2859_v26 = vld [vmem:[#allocation2 + $0x1b0] sm:$0xff] }
 0x588   :  { %2612 = vst.msk [vmem:[#allocation3 + $0x178] sm:$0xff] %vm312_vm10, %v2468_v54  ;;  %v3008_v54 = vld [vmem:[#allocation4 + $0x158] sm:$0xff] }
 0x58c   :  { %v2764_v22 = vld [vmem:[#allocation3 + $0x168] sm:$0xff]  ;;  %v2466_v51 = vpop.permute.xlu1 %2465 }
 0x58d   :  { %v2766_v38 = vadd.f32 %v2764_v22, %v2762_v55  ;;  %2611 = vst.msk [vmem:[#allocation3 + $0x170] sm:$0xff] %vm312_vm10, %v2466_v51  ;;  %v3073_v55 = vmul.f32 %v3009_v37, %v5823_v5  ;;  %v3007_v51 = vld [vmem:[#allocation4 + $0x150] sm:$0xff] }
 0x58e   :  { %v2498_v31 = vpop.permute.xlu2 %2497 }
 0x58f   :  { %2768 = vst.msk [vmem:[#allocation4 + $0x168] sm:$0xff] %vm312_vm10, %v2766_v38  ;;  %v2782_v41 = vmul.f32 %v2780_v30, %v2766_v38  ;;  %v2784_v32 = vld [vmem:[#allocation3 + $0x178] sm:$0xff]  ;;  %v2470_v35 = vpop.permute.xlu0 %2469  ;;  %v2879_v30 = vld [vmem:[#allocation2 + $0x1c0] sm:$0xff] }
 0x590   :  { %2627 = vst.msk [vmem:[#allocation3 + $0x1f0] sm:$0xff] %vm312_vm10, %v2498_v31  ;;  %v3006_v31 = vld [vmem:[#allocation4 + $0x148] sm:$0xff] }
 0x591   :  { %v2786_v13 = vadd.f32 %v2784_v32, %v2782_v41  ;;  %2613 = vst.msk [vmem:[#allocation3 + $0x180] sm:$0xff] %vm312_vm10, %v2470_v35  ;;  %v3071_v32 = vmul.f32 %v3007_v51, %v5835_v24  ;;  %v3005_v35 = vld [vmem:[#allocation4 + $0x140] sm:$0xff]  ;;  %v3070_v5 = vmul.f32 %v3006_v31, %v5818_v63  ;;  %v2880_v51 = vld [vmem:[#allocation2 + $0x1c8] sm:$0xff]  ;;  %v2900_v31 = vld [vmem:[#allocation2 + $0x1d8] sm:$0xff] }
 0x593   :  { %2788 = vst.msk [vmem:[#allocation4 + $0x178] sm:$0xff] %vm312_vm10, %v2786_v13  ;;  %v2802_v9 = vmul.f32 %v2800_v46, %v2786_v13  ;;  %v2883_v13 = vld [vmem:[#allocation3 + $0x1c0] sm:$0xff]  ;;  %v3004_v46 = vld [vmem:[#allocation4 + $0x138] sm:$0xff] }
 0x594   :  { %v2783_v33 = vld [vmem:[#allocation3 + $0x170] sm:$0xff] }
 0x595   :  { %v2785_v44 = vadd.f32 %v2783_v33, %v2781_v19  ;;  %v6064_v3 = vadd.f32 %v2804_v34, %v2802_v9  ;;  %v3003_v9 = vld [vmem:[#allocation4 + $0x130] sm:$0xff]  ;;  %v3068_v19 = vmul.f32 %v3004_v46, %v5793_v8  ;;  %v3002_v33 = vld [vmem:[#allocation4 + $0x128] sm:$0xff]  ;;  %v3000_v34 = vld [vmem:[#allocation4 + $0x118] sm:$0xff] }
 0x596   :  { %v3010_v25 = vld [vmem:[#allocation4 + $0x168] sm:$0xff]  ;;  %v3067_v24 = vmul.f32 %v3003_v9, %v5721_v60  ;;  %v3066_v63 = vmul.f32 %v3002_v33, %v5699_v15  ;;  %v6281_v8 = vld [vmem:[#allocation22_spill] sm:$0xff] }
 0x597   :  { %2787 = vst.msk [vmem:[#allocation4 + $0x170] sm:$0xff] %vm312_vm10, %v2785_v44  ;;  %v2801_v43 = vmul.f32 %v2799_v18, %v2785_v44  ;;  %v2482_v10 = vpop.permute.xlu0 %2481  ;;  %v3001_v44 = vld [vmem:[#allocation4 + $0x120] sm:$0xff]  ;;  %v6279_v18 = vld [vmem:[#allocation27_spill] sm:$0xff]  ;;  %v2951_v15 = vld [vmem:[%s6196_s11 + $0x10] sm:$0xff] }
 0x598   :  { %v2803_v2 = vld [vmem:[#allocation3 + $0x180] sm:$0xff]  ;;  %2619 = vst.msk [vmem:[#allocation3 + $0x1b0] sm:$0xff] %vm312_vm10, %v2482_v10  ;;  %v2920_v33 = vld [vmem:[#allocation2 + $0x1e8] sm:$0xff] }
 0x599   :  { %v2805_v48 = vadd.f32 %v2803_v2, %v2801_v43  ;;  %2808 = vst.msk [vmem:[#allocation4 + $0x188] sm:$0xff] %vm312_vm10, %v6064_v3  ;;  %v3065_v43 = vmul.f32 %v3001_v44, %v6279_v18  ;;  %v6280_v10 = vld [vmem:[#allocation16_spill] sm:$0xff] }
 0x59a   :  { %v3012_v53 = vld [vmem:[#allocation4 + $0x178] sm:$0xff]  ;;  %v3064_v2 = vmul.f32 %v3000_v34, %v6280_v10 }
 0x59b   :  { %2807 = vst.msk [vmem:[#allocation4 + $0x180] sm:$0xff] %vm312_vm10, %v2805_v48  ;;  %v2821_v58 = vmul.f32 %v2819_v45, %v2805_v48  ;;  %v3076_v47 = vmul.f32 %v3012_v53, %v5873_v14  ;;  %v3074_v14 = vmul.f32 %v3010_v25, %v5864_v56  ;;  %v2998_v48 = vld [vmem:[#allocation4 + $0x108] sm:$0xff]  ;;  %v2997_v53 = vld [vmem:[#allocation4 + $0x100] sm:$0xff]  ;;  %v2955_v25 = vld [vmem:[%s6196_s11 + $0x30] sm:$0xff] }
 0x59d   :  { %v2825_v7 = vadd.f32 %v2823_v4, %v2821_v58  ;;  %3159 = vmatpush.msrb.mxu1 %v3076_v47  ;;  %v6282_v58 = vld [vmem:[#allocation26_spill] sm:$0xff]  ;;  %v6283_v47 = vld [vmem:[#allocation20_spill] sm:$0xff] }
 0x59e   :  { %v3011_v29 = vld [vmem:[#allocation4 + $0x170] sm:$0xff]  ;;  %v3062_v60 = vmul.f32 %v2998_v48, %v6282_v58  ;;  %v3061_v4 = vmul.f32 %v2997_v53, %v6283_v47 }
 0x59f   :  { %2827 = vst.msk [vmem:[#allocation4 + $0x190] sm:$0xff] %vm312_vm10, %v2825_v7  ;;  %v2841_v59 = vmul.f32 %v2839_v23, %v2825_v7  ;;  %v2492_v0 = vpop.permute.xlu0 %2491  ;;  %v3075_v61 = vmul.f32 %v3011_v29, %v5886_v28  ;;  %v2863_v22 = vld [vmem:[#allocation3 + $0x1b0] sm:$0xff]  ;;  %v3072_v28 = vmul.f32 %v3008_v54, %v5799_v57  ;;  %v3069_v57 = vmul.f32 %v3005_v35, %v5812_v50  ;;  %v2820_v23 = vld [vmem:[#allocation2 + $0x198] sm:$0xff] }
 0x5a0   :  { %2624 = vst.msk [vmem:[#allocation3 + $0x1d8] sm:$0xff] %vm312_vm10, %v2492_v0  ;;  %v2999_v50 = vld [vmem:[#allocation4 + $0x110] sm:$0xff]  ;;  %v2822_v29 = vmul.f32 %v2820_v23, %v6064_v3 }
 0x5a1   :  { %v2845_v11 = vadd.f32 %v2843_v6, %v2841_v59  ;;  %3160 = vmatpush.msrb.mxu1 %v3075_v61  ;;  %v3063_v45 = vmul.f32 %v2999_v50, %v6281_v8  ;;  %v2840_v6 = vld [vmem:[#allocation2 + $0x1a8] sm:$0xff]  ;;  %v2959_v54 = vld [vmem:[%s6196_s11 + $0x50] sm:$0xff]  ;;  %v2940_v50 = vld [vmem:[#allocation2 + $0x1f8] sm:$0xff] }
 0x5a2   :  { %v2963_v35 = vld [vmem:[%s6196_s11 + $0x70] sm:$0xff] }
 0x5a3   :  { %v2861_v16 = vmul.f32 %v2859_v26, %v2845_v11  ;;  %2847 = vst.msk [vmem:[#allocation4 + $0x1a0] sm:$0xff] %vm312_vm10, %v2845_v11  ;;  %3161 = vmatpush.msrb.mxu1 %v3074_v14  ;;  %v2844_v11 = vld [vmem:[#allocation3 + $0x1a8] sm:$0xff]  ;;  %v2860_v26 = vld [vmem:[#allocation2 + $0x1b8] sm:$0xff]  ;;  %v2943_v48 = vld [vmem:[#allocation3 + $0x1f0] sm:$0xff] }
 0x5a5   :  { %v2865_v38 = vadd.f32 %v2863_v22, %v2861_v16  ;;  %3162 = vmatpush.msrb.mxu1 %v3073_v55  ;;  %v2864_v16 = vld [vmem:[#allocation3 + $0x1b8] sm:$0xff] }
 0x5a7   :  { %2867 = vst.msk [vmem:[#allocation4 + $0x1b0] sm:$0xff] %vm312_vm10, %v2865_v38  ;;  %v2881_v41 = vmul.f32 %v2879_v30, %v2865_v38  ;;  %3163 = vmatpush.msrb.mxu1 %v3072_v28  ;;  %v2494_v56 = vpop.permute.xlu0 %2493 }
 0x5a8   :  { %2625 = vst.msk [vmem:[#allocation3 + $0x1e0] sm:$0xff] %vm312_vm10, %v2494_v56 }
 0x5a9   :  { %3164 = vmatpush.msrb.mxu1 %v3071_v32  ;;  %v2885_v1 = vadd.f32 %v2883_v13, %v2881_v41  ;;  %v2899_v41 = vld [vmem:[#allocation2 + $0x1d0] sm:$0xff] }
 0x5ab   :  { %3165 = vmatpush.msrb.mxu1 %v3070_v5  ;;  %2887 = vst.msk [vmem:[#allocation4 + $0x1c0] sm:$0xff] %vm312_vm10, %v2885_v1  ;;  %v2901_v32 = vmul.f32 %v2899_v41, %v2885_v1  ;;  %v2904_v5 = vld [vmem:[#allocation3 + $0x1d8] sm:$0xff] }
 0x5ac   :  { %v2952_v41 = vld [vmem:[%s6196_s11 + $0x18] sm:$0xff] }
 0x5ad   :  { %3166 = vmatpush.msrb.mxu1 %v3069_v57 }
 0x5af   :  { %3167 = vmatpush.msrb.mxu1 %v3068_v19  ;;  %v2919_v19 = vld [vmem:[#allocation2 + $0x1e0] sm:$0xff] }
 0x5b0   :  { %v2923_v1 = vld [vmem:[#allocation3 + $0x1e0] sm:$0xff] }
 0x5b1   :  { %3168 = vmatpush.msrb.mxu1 %v3067_v24 }
 0x5b3   :  { %3169 = vmatpush.msrb.mxu1 %v3066_v63  ;;  %v2924_v63 = vld [vmem:[#allocation3 + $0x1e8] sm:$0xff] }
 0x5b5   :  { %3170 = vmatpush.msrb.mxu1 %v3065_v43  ;;  %v2939_v43 = vld [vmem:[#allocation2 + $0x1f0] sm:$0xff] }
 0x5b7   :  { %3171 = vmatpush.msrb.mxu1 %v3064_v2 }
 0x5b9   :  { %3172 = vmatpush.msrb.mxu1 %v3063_v45 }
 0x5bb   :  { %3173 = vmatpush.msrb.mxu1 %v3062_v60 }
 0x5bc   :  { %v2476_v7 = vpop.permute.xlu1 %2475 }
 0x5bd   :  { %2616 = vst.msk [vmem:[#allocation3 + $0x198] sm:$0xff] %vm312_vm10, %v2476_v7  ;;  %3174 = vmatpush.msrb.mxu1 %v3061_v4 }
 0x5be   :  { %3175 = vmatmul.f32.vlgmr.msrb.gmra.mxu1 %v2951_v15 }
 0x5c4   :  { %v2824_v59 = vld [vmem:[#allocation3 + $0x198] sm:$0xff]  ;;  %v2488_v0 = vpop.permute.xlu1 %2487 }
 0x5c5   :  { %v2826_v61 = vadd.f32 %v2824_v59, %v2822_v29  ;;  %2622 = vst.msk [vmem:[#allocation3 + $0x1c8] sm:$0xff] %vm312_vm10, %v2488_v0 }
 0x5c6   :  { %3178 = vmatmul.f32.gmra.mxu1 %v2955_v25 }
 0x5c7   :  { %2828 = vst.msk [vmem:[#allocation4 + $0x198] sm:$0xff] %vm312_vm10, %v2826_v61  ;;  %v2842_v37 = vmul.f32 %v2840_v6, %v2826_v61  ;;  %v3021_v6 = vld [vmem:[#allocation4 + $0x1c0] sm:$0xff] }
 0x5c9   :  { %v2846_v14 = vadd.f32 %v2844_v11, %v2842_v37  ;;  %v3019_v11 = vld [vmem:[#allocation4 + $0x1b0] sm:$0xff] }
 0x5cb   :  { %2848 = vst.msk [vmem:[#allocation4 + $0x1a8] sm:$0xff] %vm312_vm10, %v2846_v14  ;;  %v2862_v3 = vmul.f32 %v2860_v26, %v2846_v14  ;;  %v6284_v14 = vld [vmem:[#allocation21_spill] sm:$0xff] }
 0x5cc   :  { %v2490_v55 = vpop.permute.xlu1 %2489  ;;  %v2884_v28 = vld [vmem:[#allocation3 + $0x1c8] sm:$0xff] }
 0x5cd   :  { %v2866_v22 = vadd.f32 %v2864_v16, %v2862_v3  ;;  %2623 = vst.msk [vmem:[#allocation3 + $0x1d0] sm:$0xff] %vm312_vm10, %v2490_v55  ;;  %v3017_v3 = vld [vmem:[#allocation4 + $0x1a0] sm:$0xff]  ;;  %v6286_v55 = vld [vmem:[#allocation19_spill] sm:$0xff] }
 0x5ce   :  { %3181 = vmatmul.f32.gmra.mxu1 %v2959_v54  ;;  %v6285_v54 = vld [vmem:[#allocation23_spill] sm:$0xff] }
 0x5cf   :  { %v2882_v38 = vmul.f32 %v2880_v51, %v2866_v22  ;;  %2868 = vst.msk [vmem:[#allocation4 + $0x1b8] sm:$0xff] %vm312_vm10, %v2866_v22  ;;  %v3016_v16 = vld [vmem:[#allocation4 + $0x198] sm:$0xff]  ;;  %v3015_v22 = vld [vmem:[#allocation4 + $0x190] sm:$0xff]  ;;  %v3014_v51 = vld [vmem:[#allocation4 + $0x188] sm:$0xff] }
 0x5d1   :  { %v2886_v30 = vadd.f32 %v2884_v28, %v2882_v38  ;;  %v3079_v38 = vmul.f32 %v3015_v22, %v5894_v36  ;;  %v3013_v28 = vld [vmem:[#allocation4 + $0x180] sm:$0xff]  ;;  %v2960_v36 = vld [vmem:[%s6196_s11 + $0x58] sm:$0xff] }
 0x5d2   :  { %v3018_v26 = vld [vmem:[#allocation4 + $0x1a8] sm:$0xff] }
 0x5d3   :  { %2888 = vst.msk [vmem:[#allocation4 + $0x1c8] sm:$0xff] %vm312_vm10, %v2886_v30  ;;  %v2902_v56 = vmul.f32 %v2900_v31, %v2886_v30  ;;  %v6287_v30 = vld [vmem:[#allocation8_spill] sm:$0xff]  ;;  %v3077_v31 = vmul.f32 %v3013_v28, %v5901_v39  ;;  %v2964_v39 = vld [vmem:[%s6196_s11 + $0x78] sm:$0xff] }
 0x5d4   :  { %v2903_v13 = vld [vmem:[#allocation3 + $0x1d0] sm:$0xff]  ;;  %v2500_v46 = vpop.permute.xlu1 %2499 }
 0x5d5   :  { %v2906_v57 = vadd.f32 %v2904_v5, %v2902_v56  ;;  %v2905_v9 = vadd.f32 %v2903_v13, %v2901_v32  ;;  %2628 = vst.msk [vmem:[#allocation3 + $0x1f8] sm:$0xff] %vm312_vm10, %v2500_v46  ;;  %v3118_v56 = vpop.f32.mrf.mxu1  ;;  %v3324_v13 = vld [vmem:[%s6193_s8 + $0x38] sm:$0xff]  ;;  %v3323_v46 = vld [vmem:[%s6193_s8 + $0x30] sm:$0xff] }
 0x5d6   :  { %3184 = vmatmul.f32.gmra.mxu1 %v2963_v35  ;;  %v3020_v37 = vld [vmem:[#allocation4 + $0x1b8] sm:$0xff] }
 0x5d7   :  { %2908 = vst.msk [vmem:[#allocation4 + $0x1d8] sm:$0xff] %vm312_vm10, %v2906_v57  ;;  %v2921_v24 = vmul.f32 %v2919_v19, %v2905_v9  ;;  %v2922_v44 = vmul.f32 %v2920_v33, %v2906_v57  ;;  %v3322_v57 = vld [vmem:[%s6193_s8 + $0x28] sm:$0xff]  ;;  %v3320_v33 = vld [vmem:[%s6193_s8 + $0x18] sm:$0xff] }
 0x5d8   :  { %2907 = vst.msk [vmem:[#allocation4 + $0x1d0] sm:$0xff] %vm312_vm10, %v2905_v9  ;;  %v3321_v9 = vld [vmem:[%s6193_s8 + $0x20] sm:$0xff] }
 0x5d9   :  { %v2925_v34 = vadd.f32 %v2923_v1, %v2921_v24  ;;  %v2926_v18 = vadd.f32 %v2924_v63, %v2922_v44 }
 0x5da   :  { %v3022_v61 = vld [vmem:[#allocation4 + $0x1c8] sm:$0xff] }
 0x5db   :  { %v2941_v10 = vmul.f32 %v2939_v43, %v2925_v34  ;;  %2927 = vst.msk [vmem:[#allocation4 + $0x1e0] sm:$0xff] %vm312_vm10, %v2925_v34  ;;  %v2942_v2 = vmul.f32 %v2940_v50, %v2926_v18  ;;  %v3319_v34 = vld [vmem:[%s6193_s8 + $0x10] sm:$0xff]  ;;  %v3317_v50 = vld [vmem:[%s6193_s8] sm:$0xff] }
 0x5dc   :  { %v2944_v8 = vld [vmem:[#allocation3 + $0x1f8] sm:$0xff]  ;;  %2928 = vst.msk [vmem:[#allocation4 + $0x1e8] sm:$0xff] %vm312_vm10, %v2926_v18  ;;  %v3318_v18 = vld [vmem:[%s6193_s8 + $0x8] sm:$0xff] }
 0x5dd   :  { %v2946_v45 = vadd.f32 %v2944_v8, %v2942_v2  ;;  %v2945_v53 = vadd.f32 %v2943_v48, %v2941_v10  ;;  %v3121_v32 = vpop.f32.mrf.mxu1  ;;  %v3650_v2 = vld [vmem:[%s6192_s7] ss:$0 sm:$0xff]  ;;  %s3854_s7 = smov [#allocation5]  }
 0x5de   :  { %v3024_v29 = vld [vmem:[#allocation4 + $0x1d8] sm:$0xff]  ;;  %v6288_v8 = vld [vmem:[#allocation12_spill] sm:$0xff]  ;;  %s3374_s8 = sshll.u32 %s3854_s7, 4  ;;  %s3375_s8 = int_to_ptr.vmem [resolvable:$true] %s3374_s8 }
 0x5df   :  { %2948 = vst.msk [vmem:[#allocation4 + $0x1f8] sm:$0xff] %vm312_vm10, %v2946_v45  ;;  %v3023_v59 = vld [vmem:[#allocation4 + $0x1d0] sm:$0xff]  ;;  %v3088_v0 = vmul.f32 %v3024_v29, %v5770_v42  ;;  %v3083_v42 = vmul.f32 %v3019_v11, %v5697_v49  ;;  %v3078_v49 = vmul.f32 %v3014_v51, %v6287_v30  ;;  %v3097_v45 = vmul.f32 %v3650_v2, %v6288_v8 }
 0x5e0   :  { %2947 = vst.msk [vmem:[#allocation4 + $0x1f0] sm:$0xff] %vm312_vm10, %v2945_v53 }
 0x5e1   :  { %v3119_v53 = vadd.f32 %v3118_v56, %v3097_v45 }
 0x5e2   :  { %v3025_v7 = vld [vmem:[#allocation4 + $0x1e0] sm:$0xff] }
 0x5e3   :  { %v3026_v4 = vld [vmem:[#allocation4 + $0x1e8] sm:$0xff]  ;;  %v3089_v25 = vmul.f32 %v3025_v7, %v5797_v40  ;;  %v3084_v40 = vmul.f32 %v3020_v37, %v6284_v14  ;;  %v3304_v37 = vpop.permute.xlu1 %3303 }
 0x5e4   :  { %v3090_v23 = vmul.f32 %v3026_v4, %v5758_v52  ;;  %v3085_v52 = vmul.f32 %v3021_v6, %v5683_v62  ;;  %v3080_v62 = vmul.f32 %v3016_v16, %v6019_v12  ;;  %v2956_v12 = vld [vmem:[%s6196_s11 + $0x38] sm:$0xff]  ;;  %v6289_v4 = vld [vmem:[#allocation13_spill] sm:$0xff] }
 0x5e5   :  { %v3124_v35 = vpop.f32.mrf.mxu1 }
 0x5e6   :  { %v3028_v58 = vld [vmem:[#allocation4 + $0x1f8] sm:$0xff] }
 0x5e7   :  { %v3092_v60 = vmul.f32 %v3028_v58, %v5842_v20  ;;  %v3027_v47 = vld [vmem:[#allocation4 + $0x1f0] sm:$0xff]  ;;  %v3087_v20 = vmul.f32 %v3023_v59, %v5779_v27  ;;  %v3082_v27 = vmul.f32 %v3018_v26, %v6285_v54 }
 0x5e8   :  { %v3091_v15 = vmul.f32 %v3027_v47, %v5786_v17  ;;  %v3086_v17 = vmul.f32 %v3022_v61, %v5755_v21  ;;  %v3081_v21 = vmul.f32 %v3017_v3, %v6286_v55 }
 0x5e9   :  { %3188 = vmatpush.msra.mxu1 %v3092_v60 }
 0x5eb   :  { %3189 = vmatpush.msra.mxu1 %v3091_v15  ;;  %v3098_v15 = vmul.f32 %v3650_v2, %v6289_v4 }
 0x5ed   :  { %3190 = vmatpush.msra.mxu1 %v3090_v23  ;;  %v3127_v5 = vpop.f32.mrf.mxu1  ;;  %v3302_v23 = vpop.permute.xlu0 %3301  ;;  %v3122_v29 = vadd.f32 %v3121_v32, %v3098_v15 }
 0x5ef   :  { %3191 = vmatpush.msra.mxu1 %v3089_v25 }
 0x5f1   :  { %3192 = vmatpush.msra.mxu1 %v3088_v0 }
 0x5f3   :  { %3193 = vmatpush.msra.mxu1 %v3087_v20  ;;  %v6290_v20 = vld [vmem:[#allocation14_spill] sm:$0xff] }
 0x5f4   :  { %v3099_v6 = vmul.f32 %v3650_v2, %v6290_v20 }
 0x5f5   :  { %3194 = vmatpush.msra.mxu1 %v3086_v17  ;;  %v3147_v19 = vpop.f32.mrf.mxu1 }
 0x5f6   :  { %v3148_v58 = vadd.f32 %v3147_v19, %v3119_v53 }
 0x5f7   :  { %3195 = vmatpush.msra.mxu1 %v3085_v52  ;;  %v3125_v52 = vadd.f32 %v3124_v35, %v3099_v6 }
 0x5f9   :  { %3196 = vmatpush.msra.mxu1 %v3084_v40 }
 0x5fb   :  { %3197 = vmatpush.msra.mxu1 %v3083_v42  ;;  %v6291_v42 = vld [vmem:[#allocation15_spill] sm:$0xff] }
 0x5fc   :  { %v3100_v3 = vmul.f32 %v3650_v2, %v6291_v42 }
 0x5fd   :  { %3198 = vmatpush.msra.mxu1 %v3082_v27  ;;  %v3150_v24 = vpop.f32.mrf.mxu1  ;;  %v3306_v27 = vpop.permute.xlu2 %3305 }
 0x5fe   :  { %v3151_v59 = vadd.f32 %v3150_v24, %v3122_v29  ;;  %v3128_v16 = vadd.f32 %v3127_v5, %v3100_v3 }
 0x5ff   :  { %3199 = vmatpush.msra.mxu1 %v3081_v21 }
 0x601   :  { %3200 = vmatpush.msra.mxu1 %v3080_v62 }
 0x603   :  { %3201 = vmatpush.msra.mxu1 %v3079_v38  ;;  %v3308_v38 = vpop.permute.xlu0 %3307 }
 0x605   :  { %3202 = vmatpush.msra.mxu1 %v3078_v49  ;;  %v3153_v44 = vpop.f32.mrf.mxu1 }
 0x606   :  { %v3154_v14 = vadd.f32 %v3153_v44, %v3125_v52 }
 0x607   :  { %3203 = vmatpush.msra.mxu1 %v3077_v31 }
 0x608   :  { %3204 = vmatmul.f32.vlgmr.msra.gmra.mxu1 %v2952_v41 }
 0x609   :  { %3345 = vmatpush.msrb.mxu1 %v3324_v13 }
 0x60b   :  { %3346 = vmatpush.msrb.mxu1 %v3323_v46 }
 0x60d   :  { %3347 = vmatpush.msrb.mxu1 %v3322_v57  ;;  %v3156_v63 = vpop.f32.mrf.mxu1 }
 0x60e   :  { %v3157_v21 = vadd.f32 %v3156_v63, %v3128_v16 }
 0x60f   :  { %3348 = vmatpush.msrb.mxu1 %v3321_v9 }
 0x610   :  { %3207 = vmatmul.f32.gmra.mxu1 %v2956_v12 }
 0x611   :  { %3349 = vmatpush.msrb.mxu1 %v3320_v33 }
 0x613   :  { %3350 = vmatpush.msrb.mxu1 %v3319_v34 }
 0x615   :  { %3351 = vmatpush.msrb.mxu1 %v3318_v18 }
 0x617   :  { %3352 = vmatpush.msrb.mxu1 %v3317_v50 }
 0x618   :  { %3210 = vmatmul.f32.gmra.mxu1 %v2960_v36 }
 0x620   :  { %3213 = vmatmul.f32.gmra.mxu1 %v2964_v39 }
 0x63b   :  { %v3176_v1 = vpop.f32.mrf.mxu1 }
 0x63c   :  { %v3177_v60 = vadd.f32 %v3176_v1, %v3148_v58 }
 0x643   :  { %v3179_v43 = vpop.f32.mrf.mxu1 }
 0x644   :  { %v3180_v0 = vadd.f32 %v3179_v43, %v3151_v59 }
 0x64b   :  { %v3182_v10 = vpop.f32.mrf.mxu1 }
 0x64c   :  { %v3183_v40 = vadd.f32 %v3182_v10, %v3154_v14 }
 0x653   :  { %v3185_v48 = vpop.f32.mrf.mxu1 }
 0x654   :  { %v3186_v22 = vadd.f32 %v3185_v48, %v3157_v21 }
 0x685   :  { %v3205_v47 = vpop.f32.mrf.mxu1 }
 0x686   :  { %v3206_v7 = vadd.f32 %v3205_v47, %v3177_v60 }
 0x688   :  { %v3313_v25 = vmul.f32 %v3302_v23, %v3206_v7 }
 0x68a   :  { %3596 = vmatmul.msk.f32.vlgmr.msrb.gmra.mxu1 %vm312_vm10, %v3313_v25 }
 0x68d   :  { %v3208_v61 = vpop.f32.mrf.mxu1 }
 0x68e   :  { %v3209_v17 = vadd.f32 %v3208_v61, %v3180_v0 }
 0x690   :  { %v3314_v11 = vmul.f32 %v3304_v37, %v3209_v17 }
 0x692   :  { %3597 = vmatmul.msk.f32.gmra.mxu1 %vm312_vm10, %v3314_v11 }
 0x695   :  { %v3211_v26 = vpop.f32.mrf.mxu1 }
 0x696   :  { %v3212_v54 = vadd.f32 %v3211_v26, %v3183_v40 }
 0x698   :  { %v3315_v55 = vmul.f32 %v3306_v27, %v3212_v54 }
 0x69a   :  { %3598 = vmatmul.msk.f32.gmra.mxu1 %vm312_vm10, %v3315_v55 }
 0x69d   :  { %v3214_v62 = vpop.f32.mrf.mxu1 }
 0x69e   :  { %v3215_v51 = vadd.f32 %v3214_v62, %v3186_v22 }
 0x6a0   :  { %v3316_v28 = vmul.f32 %v3308_v38, %v3215_v51 }
 0x6a2   :  { %3599 = vmatmul.msk.f32.gmra.mxu1 %vm312_vm10, %v3316_v28 }
 0x707   :  { %v3354_v30 = vpop.f32.mrf.mxu1 }
 0x708   :  { %3366 = vst [vmem:[#allocation5] sm:$0xff] %v3354_v30 }
 0x70f   :  { %v3357_v49 = vpop.f32.mrf.mxu1 }
 0x710   :  { %3367 = vst [vmem:[#allocation5 + $0x8] sm:$0xff] %v3357_v49 }
 0x717   :  { %v3360_v31 = vpop.f32.mrf.mxu1 }
 0x718   :  { %3368 = vst [vmem:[#allocation5 + $0x10] sm:$0xff] %v3360_v31 }
 0x71f   :  { %v3363_v41 = vpop.f32.mrf.mxu1 }
 0x720   :  { %3369 = vst [vmem:[#allocation5 + $0x18] sm:$0xff] %v3363_v41 }
 0x721   :  { %3382 = dma.vmem_to_hbm [thread:$0]  %s3375_s8, 512, %s3377_s18, [#allocation6], %s3855_s3, %s3855_s3, %s3856_s19  }
 0x722   :  { %3851 = dma.done.wait [#allocation6], 512  }
 0x723   :  { %3852 = vsyncadd [#allocation6], 4294966784 }
 0x724   :  { %3387 = vsyncpa [#allocation6], 1 }

</bundles_post_ra>
